<compile_context>
chip_gen: v7x
topology: tpu7x:2x2x1
jax: 0.10.0
libtpu: 0.0.40
codegen_flags: <defaults>
</compile_context>

<pallas_src>
import functools

import jax
import jax.numpy as jnp
from jax import lax
from jax.experimental import pallas as pl
from jax.experimental.pallas import tpu as pltpu


# ----------------------------------------------------------------------------
# Kernel
# ----------------------------------------------------------------------------
def _attention_kernel(x_ref, wqkv_ref, wo_ref, bo_ref, o_ref,
                      *, groups, seq, heads):
    """Fused QKV + softmax(QK^T)V + out-proj for `groups` token groups.

    x_ref   : (groups*seq, D) float32       tokens, groups flattened into rows
    wqkv_ref: (3, heads, D, dh) bfloat16    per-head Q/K/V projection weights;
                                            the softmax scale is pre-folded
                                            into the Q slice
    wo_ref  : (heads, dh, D) bfloat16       per-head slices of the out proj
    bo_ref  : (1, D) float32                out-proj bias
    o_ref   : (groups*seq, D) float32
    """
    gn, d = x_ref.shape
    dh = wqkv_ref.shape[-1]
    xb = x_ref[...].astype(jnp.bfloat16)          # single cast: bf16 MXU feed
    # Bias folded into the accumulator init (saves the epilogue add).
    acc = jnp.broadcast_to(bo_ref[...], (gn, d)).astype(jnp.float32)

    for h in range(heads):                        # static unroll, static ref index
        q = jnp.dot(xb, wqkv_ref[0, h], preferred_element_type=jnp.float32)
        k = jnp.dot(xb, wqkv_ref[1, h], preferred_element_type=jnp.float32)
        v = jnp.dot(xb, wqkv_ref[2, h], preferred_element_type=jnp.float32)
        # (groups*seq, dh) -> (groups, seq, dh): split of the leading dim only
        # (no lane/sublane crossing -> no relayout).
        q3 = q.astype(jnp.bfloat16).reshape(groups, seq, dh)
        k3 = k.astype(jnp.bfloat16).reshape(groups, seq, dh)
        v3 = v.astype(jnp.bfloat16).reshape(groups, seq, dh)

        # batched over groups: (g,n,d) x (g,m,d) -> (g,n,m)
        dots = lax.dot_general(q3, k3, (((2,), (2,)), ((0,), (0,))),
                               preferred_element_type=jnp.float32)
        dots = dots - jnp.max(dots, axis=-1, keepdims=True)
        e = jnp.exp(dots)                                       # EUP slot
        attn = e * pl.reciprocal(jnp.sum(e, axis=-1, keepdims=True), approx=True)

        # (g,n,m) x (g,m,d) -> (g,n,d)
        oh = lax.dot_general(attn.astype(jnp.bfloat16), v3,
                             (((2,), (1,)), ((0,), (0,))),
                             preferred_element_type=jnp.float32)
        # per-head slice of the output projection; heads accumulate, no concat
        acc = acc + jnp.dot(oh.reshape(gn, dh).astype(jnp.bfloat16), wo_ref[h],
                            preferred_element_type=jnp.float32)

    o_ref[...] = acc.astype(o_ref.dtype)


# ----------------------------------------------------------------------------
# Wrapper
# ----------------------------------------------------------------------------
def attention_forward(x, kp, heads):
    B, P, N, D = x.shape
    dh = kp["wqkv"].shape[-1]
    BP = B * P

    # Block several (B*P) groups per grid step: >=2 parallel steps when
    # possible (keeps both v7x TensorCores busy via "parallel" semantics)
    # while keeping the VMEM block small.
    gb = BP // 2 if (BP % 2 == 0 and BP >= 2) else BP
    while gb % 2 == 0 and gb * N * D * 4 * 4 > (8 << 20):   # ~2 MiB/block cap
        gb //= 2
    grid = (BP // gb,)
    rows = gb * N

    xf = x.reshape(BP * N, D)
    out = pl.pallas_call(
        functools.partial(_attention_kernel, groups=gb, seq=N, heads=heads),
        out_shape=jax.ShapeDtypeStruct((BP * N, D), x.dtype),
        grid=grid,
        in_specs=[
            pl.BlockSpec((rows, D), lambda i: (i, 0)),
            pl.BlockSpec((3, heads, D, dh), lambda i: (0, 0, 0, 0)),
            pl.BlockSpec((heads, dh, D), lambda i: (0, 0, 0)),
            pl.BlockSpec((1, D), lambda i: (0, 0)),
        ],
        out_specs=pl.BlockSpec((rows, D), lambda i: (i, 0)),
        compiler_params=pltpu.CompilerParams(
            dimension_semantics=("parallel",)),
    )(xf, kp["wqkv"], kp["wo"], kp["bo"])
    return out.reshape(B, P, N, D)


# ----------------------------------------------------------------------------
# Parameters (synthetic, PyTorch-module layout) + one-time kernel-layout prep
# ----------------------------------------------------------------------------
def init_attention_params(key, dim, heads, dim_head):
    inner = heads * dim_head
    k1, k2, k3 = jax.random.split(key, 3)
    return dict(
        w_qkv=jax.random.normal(k1, (dim, 3 * inner), jnp.float32) * 0.1,  # to_qkv (no bias)
        w_out=jax.random.normal(k2, (inner, dim), jnp.float32) * 0.1,      # to_out Linear
        b_out=jax.random.normal(k3, (dim,), jnp.float32) * 0.1,
    )


def prep_kernel_params(p, dim, heads, dim_head):
    """One-time weight transform outside the kernel:
       * split per head (head-leading) so the kernel never lane-slices,
       * fold the softmax scale dh**-0.5 into the Q projection,
       * pack Q/K/V into one (3, heads, dim, dh) bf16 tensor."""
    wq, wk, wv = jnp.split(p["w_qkv"], 3, axis=-1)            # (dim, inner) each
    scale = float(dim_head) ** -0.5
    to_heads = lambda w: jnp.transpose(w.reshape(dim, heads, dim_head), (1, 0, 2))
    wqkv = jnp.stack([to_heads(wq) * scale, to_heads(wk), to_heads(wv)],
                     axis=0).astype(jnp.bfloat16)             # (3, heads, dim, dh)
    wo = p["w_out"].reshape(heads, dim_head, dim).astype(jnp.bfloat16)
    return dict(wqkv=wqkv, wo=wo,
                bo=p["b_out"].reshape(1, dim).astype(jnp.float32))


def attention_reference(x, p, heads, dim_head):
    """Plain-JAX reference matching the PyTorch Attention.forward."""
    B, P, N, D = x.shape
    inner = heads * dim_head
    qkv = x @ p["w_qkv"]
    q, k, v = jnp.split(qkv, 3, axis=-1)
    sh = lambda t: jnp.transpose(t.reshape(B, P, N, heads, dim_head),
                                 (0, 1, 3, 2, 4))
    q, k, v = sh(q), sh(k), sh(v)
    dots = jnp.einsum('bphnd,bphmd->bphnm', q, k) * (float(dim_head) ** -0.5)
    attn = jax.nn.softmax(dots, axis=-1)
    out = jnp.einsum('bphnm,bphmd->bphnd', attn, v)
    out = jnp.transpose(out, (0, 1, 3, 2, 4)).reshape(B, P, N, inner)
    return out @ p["w_out"] + p["b_out"]          # TODO(synk): Dropout(0.0) == identity


# ----------------------------------------------------------------------------
if __name__ == "__main__":
    # Attention(dim=16, heads=4, dim_head=8, dropout=0.0) on MobileViT-style
    # tokens: B=2 images, P=4 patch positions (2x2), N=64 tokens, D=16.
    B, P, N, D = 2, 4, 64, 16
    heads, dim_head = 4, 8

    kx, kparam = jax.random.split(jax.random.PRNGKey(0))
    x = jax.random.normal(kx, (B, P, N, D), jnp.float32)
    params = init_attention_params(kparam, D, heads, dim_head)
    kparams = prep_kernel_params(params, D, heads, dim_head)

    out = attention_forward(x, kparams, heads)
    out = jax.block_until_ready(out)

    assert out.shape == (B, P, N, D), out.shape
    assert bool(jnp.all(jnp.isfinite(out)))
    ref = attention_reference(x, params, heads, dim_head)
    assert bool(jnp.allclose(out, ref, atol=5e-2, rtol=5e-2)), float(
        jnp.max(jnp.abs(out - ref)))
    print("KERNEL_OK")
</pallas_src>

<mosaic_0001>
module attributes {stable_mosaic.version = 11 : i64} {
  func.func @_attention_kernel(%arg0: i32, %arg1: memref<256x16xf32, #tpu.memory_space<vmem>>, %arg2: memref<3x4x16x8xbf16, #tpu.memory_space<vmem>>, %arg3: memref<4x8x16xbf16, #tpu.memory_space<vmem>>, %arg4: memref<1x16xf32, #tpu.memory_space<vmem>>, %arg5: memref<256x16xf32, #tpu.memory_space<vmem>>) attributes {dimension_semantics = [#tpu.dimension_semantics<parallel>], iteration_bounds = array<i64: 2>, scalar_prefetch = 0 : i64, scratch_operands = 0 : i64, tpu.core_type = #tpu.core_type<tc>, window_params = [{transform_indices = @transform_0, window_bounds = array<i64: 256, 16>}, {pipeline_mode = #tpu.pipeline_mode<synchronous>, transform_indices = @transform_1, window_bounds = array<i64: 3, 4, 16, 8>}, {pipeline_mode = #tpu.pipeline_mode<synchronous>, transform_indices = @transform_2, window_bounds = array<i64: 4, 8, 16>}, {pipeline_mode = #tpu.pipeline_mode<synchronous>, transform_indices = @transform_3, window_bounds = array<i64: 1, 16>}, {transform_indices = @transform_4, window_bounds = array<i64: 256, 16>}]} {
    %c0 = arith.constant 0 : index
    %c0_0 = arith.constant 0 : index
    %0 = vector.load %arg1[%c0, %c0_0] : memref<256x16xf32, #tpu.memory_space<vmem>>, vector<256x16xf32>
    %1 = arith.truncf %0 : vector<256x16xf32> to vector<256x16xbf16>
    %c0_1 = arith.constant 0 : index
    %c0_2 = arith.constant 0 : index
    %2 = vector.load %arg4[%c0_1, %c0_2] : memref<1x16xf32, #tpu.memory_space<vmem>>, vector<1x16xf32>
    %3 = vector.shape_cast %2 : vector<1x16xf32> to vector<1x16xf32>
    %4 = vector.broadcast %3 : vector<1x16xf32> to vector<256x16xf32>
    %c0_3 = arith.constant 0 : index
    %c0_4 = arith.constant 0 : index
    %c0_5 = arith.constant 0 : index
    %c0_6 = arith.constant 0 : index
    %5 = vector.load %arg2[%c0_3, %c0_4, %c0_5, %c0_6] : memref<3x4x16x8xbf16, #tpu.memory_space<vmem>>, vector<1x1x16x8xbf16>
    %6 = vector.shape_cast %5 : vector<1x1x16x8xbf16> to vector<16x8xbf16>
    %cst = arith.constant dense<0.000000e+00> : vector<256x8xf32>
    %7 = tpu.matmul %1, %6, %cst {dimension_numbers = #tpu.dot_dimension_numbers<[1], [0], [0], [1], [0, 0, 1, 1], [], []>} : vector<256x16xbf16>, vector<16x8xbf16>, vector<256x8xf32> -> vector<256x8xf32>
    %c1 = arith.constant 1 : index
    %c0_7 = arith.constant 0 : index
    %c0_8 = arith.constant 0 : index
    %c0_9 = arith.constant 0 : index
    %8 = vector.load %arg2[%c1, %c0_7, %c0_8, %c0_9] : memref<3x4x16x8xbf16, #tpu.memory_space<vmem>>, vector<1x1x16x8xbf16>
    %9 = vector.shape_cast %8 : vector<1x1x16x8xbf16> to vector<16x8xbf16>
    %cst_10 = arith.constant dense<0.000000e+00> : vector<256x8xf32>
    %10 = tpu.matmul %1, %9, %cst_10 {dimension_numbers = #tpu.dot_dimension_numbers<[1], [0], [0], [1], [0, 0, 1, 1], [], []>} : vector<256x16xbf16>, vector<16x8xbf16>, vector<256x8xf32> -> vector<256x8xf32>
    %c2 = arith.constant 2 : index
    %c0_11 = arith.constant 0 : index
    %c0_12 = arith.constant 0 : index
    %c0_13 = arith.constant 0 : index
    %11 = vector.load %arg2[%c2, %c0_11, %c0_12, %c0_13] : memref<3x4x16x8xbf16, #tpu.memory_space<vmem>>, vector<1x1x16x8xbf16>
    %12 = vector.shape_cast %11 : vector<1x1x16x8xbf16> to vector<16x8xbf16>
    %cst_14 = arith.constant dense<0.000000e+00> : vector<256x8xf32>
    %13 = tpu.matmul %1, %12, %cst_14 {dimension_numbers = #tpu.dot_dimension_numbers<[1], [0], [0], [1], [0, 0, 1, 1], [], []>} : vector<256x16xbf16>, vector<16x8xbf16>, vector<256x8xf32> -> vector<256x8xf32>
    %14 = arith.truncf %7 : vector<256x8xf32> to vector<256x8xbf16>
    %15 = vector.shape_cast %14 : vector<256x8xbf16> to vector<4x64x8xbf16>
    %16 = arith.truncf %10 : vector<256x8xf32> to vector<256x8xbf16>
    %17 = vector.shape_cast %16 : vector<256x8xbf16> to vector<4x64x8xbf16>
    %18 = arith.truncf %13 : vector<256x8xf32> to vector<256x8xbf16>
    %19 = vector.shape_cast %18 : vector<256x8xbf16> to vector<4x64x8xbf16>
    %cst_15 = arith.constant dense<0.000000e+00> : vector<4x64x64xf32>
    %20 = tpu.matmul %15, %17, %cst_15 {dimension_numbers = #tpu.dot_dimension_numbers<[2], [2], [1], [1], [0, 0, 0, 1, 1, 1], [0], [0]>} : vector<4x64x8xbf16>, vector<4x64x8xbf16>, vector<4x64x64xf32> -> vector<4x64x64xf32>
    %cst_16 = arith.constant dense<0xFF800000> : vector<4x64xf32>
    %21 = vector.multi_reduction <maximumf>, %20, %cst_16 [2] : vector<4x64x64xf32> to vector<4x64xf32>
    %22 = vector.shape_cast %21 : vector<4x64xf32> to vector<4x64x1xf32>
    %23 = vector.broadcast %22 : vector<4x64x1xf32> to vector<4x64x64xf32>
    %24 = arith.subf %20, %23 : vector<4x64x64xf32>
    %25 = math.exp %24 : vector<4x64x64xf32>
    %cst_17 = arith.constant dense<0.000000e+00> : vector<4x64xf32>
    %26 = vector.multi_reduction <add>, %25, %cst_17 [2] : vector<4x64x64xf32> to vector<4x64xf32>
    %27 = vector.shape_cast %26 : vector<4x64xf32> to vector<4x64x1xf32>
    %28 = tpu.reciprocal %27 {approx = true} : vector<4x64x1xf32> -> vector<4x64x1xf32>
    %29 = vector.broadcast %28 : vector<4x64x1xf32> to vector<4x64x64xf32>
    %30 = arith.mulf %25, %29 : vector<4x64x64xf32>
    %31 = arith.truncf %30 : vector<4x64x64xf32> to vector<4x64x64xbf16>
    %cst_18 = arith.constant dense<0.000000e+00> : vector<4x64x8xf32>
    %32 = tpu.matmul %31, %19, %cst_18 {dimension_numbers = #tpu.dot_dimension_numbers<[2], [1], [1], [2], [0, 0, 0, 1, 1, 2], [0], [0]>} : vector<4x64x64xbf16>, vector<4x64x8xbf16>, vector<4x64x8xf32> -> vector<4x64x8xf32>
    %33 = vector.shape_cast %32 : vector<4x64x8xf32> to vector<256x8xf32>
    %34 = arith.truncf %33 : vector<256x8xf32> to vector<256x8xbf16>
    %c0_19 = arith.constant 0 : index
    %c0_20 = arith.constant 0 : index
    %c0_21 = arith.constant 0 : index
    %35 = vector.load %arg3[%c0_19, %c0_20, %c0_21] : memref<4x8x16xbf16, #tpu.memory_space<vmem>>, vector<1x8x16xbf16>
    %36 = vector.shape_cast %35 : vector<1x8x16xbf16> to vector<8x16xbf16>
    %cst_22 = arith.constant dense<0.000000e+00> : vector<256x16xf32>
    %37 = tpu.matmul %34, %36, %cst_22 {dimension_numbers = #tpu.dot_dimension_numbers<[1], [0], [0], [1], [0, 0, 1, 1], [], []>} : vector<256x8xbf16>, vector<8x16xbf16>, vector<256x16xf32> -> vector<256x16xf32>
    %38 = arith.addf %4, %37 : vector<256x16xf32>
    %c0_23 = arith.constant 0 : index
    %c1_24 = arith.constant 1 : index
    %c0_25 = arith.constant 0 : index
    %c0_26 = arith.constant 0 : index
    %39 = vector.load %arg2[%c0_23, %c1_24, %c0_25, %c0_26] : memref<3x4x16x8xbf16, #tpu.memory_space<vmem>>, vector<1x1x16x8xbf16>
    %40 = vector.shape_cast %39 : vector<1x1x16x8xbf16> to vector<16x8xbf16>
    %cst_27 = arith.constant dense<0.000000e+00> : vector<256x8xf32>
    %41 = tpu.matmul %1, %40, %cst_27 {dimension_numbers = #tpu.dot_dimension_numbers<[1], [0], [0], [1], [0, 0, 1, 1], [], []>} : vector<256x16xbf16>, vector<16x8xbf16>, vector<256x8xf32> -> vector<256x8xf32>
    %c1_28 = arith.constant 1 : index
    %c1_29 = arith.constant 1 : index
    %c0_30 = arith.constant 0 : index
    %c0_31 = arith.constant 0 : index
    %42 = vector.load %arg2[%c1_28, %c1_29, %c0_30, %c0_31] : memref<3x4x16x8xbf16, #tpu.memory_space<vmem>>, vector<1x1x16x8xbf16>
    %43 = vector.shape_cast %42 : vector<1x1x16x8xbf16> to vector<16x8xbf16>
    %cst_32 = arith.constant dense<0.000000e+00> : vector<256x8xf32>
    %44 = tpu.matmul %1, %43, %cst_32 {dimension_numbers = #tpu.dot_dimension_numbers<[1], [0], [0], [1], [0, 0, 1, 1], [], []>} : vector<256x16xbf16>, vector<16x8xbf16>, vector<256x8xf32> -> vector<256x8xf32>
    %c2_33 = arith.constant 2 : index
    %c1_34 = arith.constant 1 : index
    %c0_35 = arith.constant 0 : index
    %c0_36 = arith.constant 0 : index
    %45 = vector.load %arg2[%c2_33, %c1_34, %c0_35, %c0_36] : memref<3x4x16x8xbf16, #tpu.memory_space<vmem>>, vector<1x1x16x8xbf16>
    %46 = vector.shape_cast %45 : vector<1x1x16x8xbf16> to vector<16x8xbf16>
    %cst_37 = arith.constant dense<0.000000e+00> : vector<256x8xf32>
    %47 = tpu.matmul %1, %46, %cst_37 {dimension_numbers = #tpu.dot_dimension_numbers<[1], [0], [0], [1], [0, 0, 1, 1], [], []>} : vector<256x16xbf16>, vector<16x8xbf16>, vector<256x8xf32> -> vector<256x8xf32>
    %48 = arith.truncf %41 : vector<256x8xf32> to vector<256x8xbf16>
    %49 = vector.shape_cast %48 : vector<256x8xbf16> to vector<4x64x8xbf16>
    %50 = arith.truncf %44 : vector<256x8xf32> to vector<256x8xbf16>
    %51 = vector.shape_cast %50 : vector<256x8xbf16> to vector<4x64x8xbf16>
    %52 = arith.truncf %47 : vector<256x8xf32> to vector<256x8xbf16>
    %53 = vector.shape_cast %52 : vector<256x8xbf16> to vector<4x64x8xbf16>
    %cst_38 = arith.constant dense<0.000000e+00> : vector<4x64x64xf32>
    %54 = tpu.matmul %49, %51, %cst_38 {dimension_numbers = #tpu.dot_dimension_numbers<[2], [2], [1], [1], [0, 0, 0, 1, 1, 1], [0], [0]>} : vector<4x64x8xbf16>, vector<4x64x8xbf16>, vector<4x64x64xf32> -> vector<4x64x64xf32>
    %cst_39 = arith.constant dense<0xFF800000> : vector<4x64xf32>
    %55 = vector.multi_reduction <maximumf>, %54, %cst_39 [2] : vector<4x64x64xf32> to vector<4x64xf32>
    %56 = vector.shape_cast %55 : vector<4x64xf32> to vector<4x64x1xf32>
    %57 = vector.broadcast %56 : vector<4x64x1xf32> to vector<4x64x64xf32>
    %58 = arith.subf %54, %57 : vector<4x64x64xf32>
    %59 = math.exp %58 : vector<4x64x64xf32>
    %cst_40 = arith.constant dense<0.000000e+00> : vector<4x64xf32>
    %60 = vector.multi_reduction <add>, %59, %cst_40 [2] : vector<4x64x64xf32> to vector<4x64xf32>
    %61 = vector.shape_cast %60 : vector<4x64xf32> to vector<4x64x1xf32>
    %62 = tpu.reciprocal %61 {approx = true} : vector<4x64x1xf32> -> vector<4x64x1xf32>
    %63 = vector.broadcast %62 : vector<4x64x1xf32> to vector<4x64x64xf32>
    %64 = arith.mulf %59, %63 : vector<4x64x64xf32>
    %65 = arith.truncf %64 : vector<4x64x64xf32> to vector<4x64x64xbf16>
    %cst_41 = arith.constant dense<0.000000e+00> : vector<4x64x8xf32>
    %66 = tpu.matmul %65, %53, %cst_41 {dimension_numbers = #tpu.dot_dimension_numbers<[2], [1], [1], [2], [0, 0, 0, 1, 1, 2], [0], [0]>} : vector<4x64x64xbf16>, vector<4x64x8xbf16>, vector<4x64x8xf32> -> vector<4x64x8xf32>
    %67 = vector.shape_cast %66 : vector<4x64x8xf32> to vector<256x8xf32>
    %68 = arith.truncf %67 : vector<256x8xf32> to vector<256x8xbf16>
    %c1_42 = arith.constant 1 : index
    %c0_43 = arith.constant 0 : index
    %c0_44 = arith.constant 0 : index
    %69 = vector.load %arg3[%c1_42, %c0_43, %c0_44] : memref<4x8x16xbf16, #tpu.memory_space<vmem>>, vector<1x8x16xbf16>
    %70 = vector.shape_cast %69 : vector<1x8x16xbf16> to vector<8x16xbf16>
    %cst_45 = arith.constant dense<0.000000e+00> : vector<256x16xf32>
    %71 = tpu.matmul %68, %70, %cst_45 {dimension_numbers = #tpu.dot_dimension_numbers<[1], [0], [0], [1], [0, 0, 1, 1], [], []>} : vector<256x8xbf16>, vector<8x16xbf16>, vector<256x16xf32> -> vector<256x16xf32>
    %72 = arith.addf %38, %71 : vector<256x16xf32>
    %c0_46 = arith.constant 0 : index
    %c2_47 = arith.constant 2 : index
    %c0_48 = arith.constant 0 : index
    %c0_49 = arith.constant 0 : index
    %73 = vector.load %arg2[%c0_46, %c2_47, %c0_48, %c0_49] : memref<3x4x16x8xbf16, #tpu.memory_space<vmem>>, vector<1x1x16x8xbf16>
    %74 = vector.shape_cast %73 : vector<1x1x16x8xbf16> to vector<16x8xbf16>
    %cst_50 = arith.constant dense<0.000000e+00> : vector<256x8xf32>
    %75 = tpu.matmul %1, %74, %cst_50 {dimension_numbers = #tpu.dot_dimension_numbers<[1], [0], [0], [1], [0, 0, 1, 1], [], []>} : vector<256x16xbf16>, vector<16x8xbf16>, vector<256x8xf32> -> vector<256x8xf32>
    %c1_51 = arith.constant 1 : index
    %c2_52 = arith.constant 2 : index
    %c0_53 = arith.constant 0 : index
    %c0_54 = arith.constant 0 : index
    %76 = vector.load %arg2[%c1_51, %c2_52, %c0_53, %c0_54] : memref<3x4x16x8xbf16, #tpu.memory_space<vmem>>, vector<1x1x16x8xbf16>
    %77 = vector.shape_cast %76 : vector<1x1x16x8xbf16> to vector<16x8xbf16>
    %cst_55 = arith.constant dense<0.000000e+00> : vector<256x8xf32>
    %78 = tpu.matmul %1, %77, %cst_55 {dimension_numbers = #tpu.dot_dimension_numbers<[1], [0], [0], [1], [0, 0, 1, 1], [], []>} : vector<256x16xbf16>, vector<16x8xbf16>, vector<256x8xf32> -> vector<256x8xf32>
    %c2_56 = arith.constant 2 : index
    %c2_57 = arith.constant 2 : index
    %c0_58 = arith.constant 0 : index
    %c0_59 = arith.constant 0 : index
    %79 = vector.load %arg2[%c2_56, %c2_57, %c0_58, %c0_59] : memref<3x4x16x8xbf16, #tpu.memory_space<vmem>>, vector<1x1x16x8xbf16>
    %80 = vector.shape_cast %79 : vector<1x1x16x8xbf16> to vector<16x8xbf16>
    %cst_60 = arith.constant dense<0.000000e+00> : vector<256x8xf32>
    %81 = tpu.matmul %1, %80, %cst_60 {dimension_numbers = #tpu.dot_dimension_numbers<[1], [0], [0], [1], [0, 0, 1, 1], [], []>} : vector<256x16xbf16>, vector<16x8xbf16>, vector<256x8xf32> -> vector<256x8xf32>
    %82 = arith.truncf %75 : vector<256x8xf32> to vector<256x8xbf16>
    %83 = vector.shape_cast %82 : vector<256x8xbf16> to vector<4x64x8xbf16>
    %84 = arith.truncf %78 : vector<256x8xf32> to vector<256x8xbf16>
    %85 = vector.shape_cast %84 : vector<256x8xbf16> to vector<4x64x8xbf16>
    %86 = arith.truncf %81 : vector<256x8xf32> to vector<256x8xbf16>
    %87 = vector.shape_cast %86 : vector<256x8xbf16> to vector<4x64x8xbf16>
    %cst_61 = arith.constant dense<0.000000e+00> : vector<4x64x64xf32>
    %88 = tpu.matmul %83, %85, %cst_61 {dimension_numbers = #tpu.dot_dimension_numbers<[2], [2], [1], [1], [0, 0, 0, 1, 1, 1], [0], [0]>} : vector<4x64x8xbf16>, vector<4x64x8xbf16>, vector<4x64x64xf32> -> vector<4x64x64xf32>
    %cst_62 = arith.constant dense<0xFF800000> : vector<4x64xf32>
    %89 = vector.multi_reduction <maximumf>, %88, %cst_62 [2] : vector<4x64x64xf32> to vector<4x64xf32>
    %90 = vector.shape_cast %89 : vector<4x64xf32> to vector<4x64x1xf32>
    %91 = vector.broadcast %90 : vector<4x64x1xf32> to vector<4x64x64xf32>
    %92 = arith.subf %88, %91 : vector<4x64x64xf32>
    %93 = math.exp %92 : vector<4x64x64xf32>
    %cst_63 = arith.constant dense<0.000000e+00> : vector<4x64xf32>
    %94 = vector.multi_reduction <add>, %93, %cst_63 [2] : vector<4x64x64xf32> to vector<4x64xf32>
    %95 = vector.shape_cast %94 : vector<4x64xf32> to vector<4x64x1xf32>
    %96 = tpu.reciprocal %95 {approx = true} : vector<4x64x1xf32> -> vector<4x64x1xf32>
    %97 = vector.broadcast %96 : vector<4x64x1xf32> to vector<4x64x64xf32>
    %98 = arith.mulf %93, %97 : vector<4x64x64xf32>
    %99 = arith.truncf %98 : vector<4x64x64xf32> to vector<4x64x64xbf16>
    %cst_64 = arith.constant dense<0.000000e+00> : vector<4x64x8xf32>
    %100 = tpu.matmul %99, %87, %cst_64 {dimension_numbers = #tpu.dot_dimension_numbers<[2], [1], [1], [2], [0, 0, 0, 1, 1, 2], [0], [0]>} : vector<4x64x64xbf16>, vector<4x64x8xbf16>, vector<4x64x8xf32> -> vector<4x64x8xf32>
    %101 = vector.shape_cast %100 : vector<4x64x8xf32> to vector<256x8xf32>
    %102 = arith.truncf %101 : vector<256x8xf32> to vector<256x8xbf16>
    %c2_65 = arith.constant 2 : index
    %c0_66 = arith.constant 0 : index
    %c0_67 = arith.constant 0 : index
    %103 = vector.load %arg3[%c2_65, %c0_66, %c0_67] : memref<4x8x16xbf16, #tpu.memory_space<vmem>>, vector<1x8x16xbf16>
    %104 = vector.shape_cast %103 : vector<1x8x16xbf16> to vector<8x16xbf16>
    %cst_68 = arith.constant dense<0.000000e+00> : vector<256x16xf32>
    %105 = tpu.matmul %102, %104, %cst_68 {dimension_numbers = #tpu.dot_dimension_numbers<[1], [0], [0], [1], [0, 0, 1, 1], [], []>} : vector<256x8xbf16>, vector<8x16xbf16>, vector<256x16xf32> -> vector<256x16xf32>
    %106 = arith.addf %72, %105 : vector<256x16xf32>
    %c0_69 = arith.constant 0 : index
    %c3 = arith.constant 3 : index
    %c0_70 = arith.constant 0 : index
    %c0_71 = arith.constant 0 : index
    %107 = vector.load %arg2[%c0_69, %c3, %c0_70, %c0_71] : memref<3x4x16x8xbf16, #tpu.memory_space<vmem>>, vector<1x1x16x8xbf16>
    %108 = vector.shape_cast %107 : vector<1x1x16x8xbf16> to vector<16x8xbf16>
    %cst_72 = arith.constant dense<0.000000e+00> : vector<256x8xf32>
    %109 = tpu.matmul %1, %108, %cst_72 {dimension_numbers = #tpu.dot_dimension_numbers<[1], [0], [0], [1], [0, 0, 1, 1], [], []>} : vector<256x16xbf16>, vector<16x8xbf16>, vector<256x8xf32> -> vector<256x8xf32>
    %c1_73 = arith.constant 1 : index
    %c3_74 = arith.constant 3 : index
    %c0_75 = arith.constant 0 : index
    %c0_76 = arith.constant 0 : index
    %110 = vector.load %arg2[%c1_73, %c3_74, %c0_75, %c0_76] : memref<3x4x16x8xbf16, #tpu.memory_space<vmem>>, vector<1x1x16x8xbf16>
    %111 = vector.shape_cast %110 : vector<1x1x16x8xbf16> to vector<16x8xbf16>
    %cst_77 = arith.constant dense<0.000000e+00> : vector<256x8xf32>
    %112 = tpu.matmul %1, %111, %cst_77 {dimension_numbers = #tpu.dot_dimension_numbers<[1], [0], [0], [1], [0, 0, 1, 1], [], []>} : vector<256x16xbf16>, vector<16x8xbf16>, vector<256x8xf32> -> vector<256x8xf32>
    %c2_78 = arith.constant 2 : index
    %c3_79 = arith.constant 3 : index
    %c0_80 = arith.constant 0 : index
    %c0_81 = arith.constant 0 : index
    %113 = vector.load %arg2[%c2_78, %c3_79, %c0_80, %c0_81] : memref<3x4x16x8xbf16, #tpu.memory_space<vmem>>, vector<1x1x16x8xbf16>
    %114 = vector.shape_cast %113 : vector<1x1x16x8xbf16> to vector<16x8xbf16>
    %cst_82 = arith.constant dense<0.000000e+00> : vector<256x8xf32>
    %115 = tpu.matmul %1, %114, %cst_82 {dimension_numbers = #tpu.dot_dimension_numbers<[1], [0], [0], [1], [0, 0, 1, 1], [], []>} : vector<256x16xbf16>, vector<16x8xbf16>, vector<256x8xf32> -> vector<256x8xf32>
    %116 = arith.truncf %109 : vector<256x8xf32> to vector<256x8xbf16>
    %117 = vector.shape_cast %116 : vector<256x8xbf16> to vector<4x64x8xbf16>
    %118 = arith.truncf %112 : vector<256x8xf32> to vector<256x8xbf16>
    %119 = vector.shape_cast %118 : vector<256x8xbf16> to vector<4x64x8xbf16>
    %120 = arith.truncf %115 : vector<256x8xf32> to vector<256x8xbf16>
    %121 = vector.shape_cast %120 : vector<256x8xbf16> to vector<4x64x8xbf16>
    %cst_83 = arith.constant dense<0.000000e+00> : vector<4x64x64xf32>
    %122 = tpu.matmul %117, %119, %cst_83 {dimension_numbers = #tpu.dot_dimension_numbers<[2], [2], [1], [1], [0, 0, 0, 1, 1, 1], [0], [0]>} : vector<4x64x8xbf16>, vector<4x64x8xbf16>, vector<4x64x64xf32> -> vector<4x64x64xf32>
    %cst_84 = arith.constant dense<0xFF800000> : vector<4x64xf32>
    %123 = vector.multi_reduction <maximumf>, %122, %cst_84 [2] : vector<4x64x64xf32> to vector<4x64xf32>
    %124 = vector.shape_cast %123 : vector<4x64xf32> to vector<4x64x1xf32>
    %125 = vector.broadcast %124 : vector<4x64x1xf32> to vector<4x64x64xf32>
    %126 = arith.subf %122, %125 : vector<4x64x64xf32>
    %127 = math.exp %126 : vector<4x64x64xf32>
    %cst_85 = arith.constant dense<0.000000e+00> : vector<4x64xf32>
    %128 = vector.multi_reduction <add>, %127, %cst_85 [2] : vector<4x64x64xf32> to vector<4x64xf32>
    %129 = vector.shape_cast %128 : vector<4x64xf32> to vector<4x64x1xf32>
    %130 = tpu.reciprocal %129 {approx = true} : vector<4x64x1xf32> -> vector<4x64x1xf32>
    %131 = vector.broadcast %130 : vector<4x64x1xf32> to vector<4x64x64xf32>
    %132 = arith.mulf %127, %131 : vector<4x64x64xf32>
    %133 = arith.truncf %132 : vector<4x64x64xf32> to vector<4x64x64xbf16>
    %cst_86 = arith.constant dense<0.000000e+00> : vector<4x64x8xf32>
    %134 = tpu.matmul %133, %121, %cst_86 {dimension_numbers = #tpu.dot_dimension_numbers<[2], [1], [1], [2], [0, 0, 0, 1, 1, 2], [0], [0]>} : vector<4x64x64xbf16>, vector<4x64x8xbf16>, vector<4x64x8xf32> -> vector<4x64x8xf32>
    %135 = vector.shape_cast %134 : vector<4x64x8xf32> to vector<256x8xf32>
    %136 = arith.truncf %135 : vector<256x8xf32> to vector<256x8xbf16>
    %c3_87 = arith.constant 3 : index
    %c0_88 = arith.constant 0 : index
    %c0_89 = arith.constant 0 : index
    %137 = vector.load %arg3[%c3_87, %c0_88, %c0_89] : memref<4x8x16xbf16, #tpu.memory_space<vmem>>, vector<1x8x16xbf16>
    %138 = vector.shape_cast %137 : vector<1x8x16xbf16> to vector<8x16xbf16>
    %cst_90 = arith.constant dense<0.000000e+00> : vector<256x16xf32>
    %139 = tpu.matmul %136, %138, %cst_90 {dimension_numbers = #tpu.dot_dimension_numbers<[1], [0], [0], [1], [0, 0, 1, 1], [], []>} : vector<256x8xbf16>, vector<8x16xbf16>, vector<256x16xf32> -> vector<256x16xf32>
    %140 = arith.addf %106, %139 : vector<256x16xf32>
    %c0_91 = arith.constant 0 : index
    %c0_92 = arith.constant 0 : index
    %141 = vector.load %arg5[%c0_91, %c0_92] : memref<256x16xf32, #tpu.memory_space<vmem>>, vector<256x16xf32>
    tpu.vector_store %arg5[%c0_91, %c0_92], %140 {strides = array<i32>} : memref<256x16xf32, #tpu.memory_space<vmem>>, vector<256x16xf32>,
    return
  }
  func.func @transform_0(%arg0: i32) -> (i32, i32) {
    %c0_i32 = arith.constant 0 : i32
    %c0_i32_0 = arith.constant 0 : i32
    return %arg0, %c0_i32 : i32, i32
  }
  func.func @transform_1(%arg0: i32) -> (i32, i32, i32, i32) {
    %c0_i32 = arith.constant 0 : i32
    %c0_i32_0 = arith.constant 0 : i32
    %c0_i32_1 = arith.constant 0 : i32
    %c0_i32_2 = arith.constant 0 : i32
    %c0_i32_3 = arith.constant 0 : i32
    return %c0_i32, %c0_i32_0, %c0_i32_1, %c0_i32_2 : i32, i32, i32, i32
  }
  func.func @transform_2(%arg0: i32) -> (i32, i32, i32) {
    %c0_i32 = arith.constant 0 : i32
    %c0_i32_0 = arith.constant 0 : i32
    %c0_i32_1 = arith.constant 0 : i32
    %c0_i32_2 = arith.constant 0 : i32
    return %c0_i32, %c0_i32_0, %c0_i32_1 : i32, i32, i32
  }
  func.func @transform_3(%arg0: i32) -> (i32, i32) {
    %c0_i32 = arith.constant 0 : i32
    %c0_i32_0 = arith.constant 0 : i32
    %c0_i32_1 = arith.constant 0 : i32
    return %c0_i32, %c0_i32_0 : i32, i32
  }
  func.func @transform_4(%arg0: i32) -> (i32, i32) {
    %c0_i32 = arith.constant 0 : i32
    %c0_i32_0 = arith.constant 0 : i32
    return %arg0, %c0_i32 : i32, i32
  }
}

</mosaic_0001>

<bundles_post_ra>
// kernel: tpu_custom_call.1
= control target key start
LH: loop header
LB: loop body
LE: loop exit
PB: predicated region body
PF: predicated region fallthrough
CT: control target
= control target key end

     0   :  { %s10583_s15 = smov 0   ;;  %s13574_s0 = inlined_call_operand.vmem [shape: f32[512,16], index: 0, kind: input, shape index: {}]   ;;  %s13575_s1 = inlined_call_operand.vmem [shape: bf16[3,4,16,8], index: 1, kind: input, shape index: {}]   ;;  %s13576_s2 = inlined_call_operand.vmem [shape: bf16[4,8,16], index: 2, kind: input, shape index: {}]   ;;  %s13577_s3 = inlined_call_operand.vmem [shape: f32[1,16], index: 3, kind: input, shape index: {}]   ;;  %s13578_s4 = inlined_call_operand.vmem [shape: f32[512,16], index: 4, kind: output, shape index: {}]  }
   0x1 LB: > { %s7803_s16 = sadd.s32 4294967295, %s10556_s15   ;;  %p7807_p0 = scmp.ge.s32.totalorder %s10556_s15, 1  ;;  %s10556_s15 = sphi %s10583_s15, %s14_s15  }
   0x2   : > { %p163_p1 = scmp.lt.s32.totalorder %s10556_s15, 3 }
   0x4   : > { %p164_p2 = pnand %p7807_p0, %p163_p1 }
   0x6   : > { %167 = sbr.rel (%p164_p2) target bundleno = 4545 (0x11c1), region = 36 }
   0xd   : > { %v10026_v0 = vld [vmem:[%s13575_s1] sm:$0xff]   ;;  %s7808_s19 = sshll.u32 %s7803_s16, 5  ;;  %vm265_vm0 = vcmask 130048   ;;  %vm863_vm1 = vcmask 64512   ;;  %vm1220_vm2 = vcmask 523264   ;;  %vm1962_vm3 = vcmask 1043456  }
   0xe   : > { %p190_p3 = scmp.lt.s32.totalorder %s7808_s19, 63  ;;  %9820 = vmatprep.subr.bf16.mxu1 %v10026_v0  ;;  %v10027_v1 = vld [vmem:[%s13575_s1 + $0x20] sm:$0xff]   ;;  %8764 = vmatprep.subr.bf16.mxu0 %v10026_v0 }
   0xf   : > { %9821 = vmatpush3.bf16.msra.mxu1 %v10026_v0  ;;  %8765 = vmatpush3.bf16.msra.mxu0 %v10026_v0  ;;  %v10028_v2 = vld [vmem:[%s13575_s1 + $0x40] sm:$0xff]  }
  0x10   : > { %s13710_s19 = smov (!%p190_p3, %s7808_s19), 63  ;;  %8798 = vmatprep.subr.bf16.mxu1 %v10027_v1  ;;  %8832 = vmatprep.subr.bf16.mxu0 %v10028_v2 }
  0x11   : > { %s7809_s24 = sshll.u32 %s13710_s19, 3 }
  0x12   : > { %s10608_s27 = scalar_lea.vmem %s13574_s0, %s7809_s24  ;;  %s13473_s9 = scalar_lea.vmem %s13578_s4, %s7809_s24 }
  0x13   : > { %v218_v3 = vld [vmem:[%s10608_s27 + $0x80] sm:$0xff]  ;;  %v219_v4 = vld [vmem:[%s10608_s27 + $0x88] sm:$0xff]  ;;  %v220_v5 = vld [vmem:[%s10608_s27 + $0x90] sm:$0xff] }
  0x14   : > { %v10613_v6 = vpack.c.bf16 %v219_v4, %v218_v3  ;;  %v221_v7 = vld [vmem:[%s10608_s27 + $0x98] sm:$0xff]  ;;  %v222_v8 = vld [vmem:[%s10608_s27 + $0xa0] sm:$0xff]  ;;  %v223_v9 = vld [vmem:[%s10608_s27 + $0xa8] sm:$0xff] }
  0x15   : > { %v10618_v10 = vpack.c.bf16 %v221_v7, %v220_v5  ;;  %v10620_v11 = vpack.c.bf16 %v223_v9, %v222_v8  ;;  %v224_v12 = vld [vmem:[%s10608_s27 + $0xb0] sm:$0xff]  ;;  %v225_v13 = vld [vmem:[%s10608_s27 + $0xb8] sm:$0xff]  ;;  %v226_v14 = vld [vmem:[%s10608_s27 + $0xc0] sm:$0xff] }
  0x16   : > { %13621 = vst [vmem:[#allocation2_spill] sm:$0xff] %v10613_v6  ;;  %8782 = vmatprep.mubr.msk.bf16.mxu1 %vm265_vm0, %v10613_v6  ;;  %v227_v15 = vld [vmem:[%s10608_s27 + $0xc8] sm:$0xff]  ;;  %v202_v16 = vld [vmem:[%s10608_s27] sm:$0xff]  ;;  %v204_v19 = vld [vmem:[%s10608_s27 + $0x10] sm:$0xff]  ;;  %v10642_v24 = vpack.c.bf16 %v225_v13, %v224_v12 }
  0x17   : > { %13622 = vst [vmem:[#allocation3_spill] sm:$0xff] %v10618_v10  ;;  %13623 = vst [vmem:[#allocation4_spill] sm:$0xff] %v10620_v11  ;;  %8783 = vmatmul.mubr.msk.bf16.vlgmr.msra.gmra.mrb[0].mxu1 %vm265_vm0, %v10618_v10  ;;  %v203_v17 = vld [vmem:[%s10608_s27 + $0x8] sm:$0xff]  ;;  %v205_v20 = vld [vmem:[%s10608_s27 + $0x18] sm:$0xff]  ;;  %v10648_v26 = vpack.c.bf16 %v227_v15, %v226_v14 }
  0x18   : > { %8786 = vmatprep.mubr.msk.bf16.mxu1 %vm265_vm0, %v10620_v11  ;;  %8799 = vmatpush3.bf16.msra.mxu1 %v10027_v1  ;;  %v10634_v18 = vpack.c.bf16 %v203_v17, %v202_v16  ;;  %v206_v21 = vld [vmem:[%s10608_s27 + $0x20] sm:$0xff]  ;;  %v10639_v22 = vpack.c.bf16 %v205_v20, %v204_v19  ;;  %v207_v23 = vld [vmem:[%s10608_s27 + $0x28] sm:$0xff]  ;;  %13624 = vst [vmem:[#allocation5_spill] sm:$0xff] %v10642_v24  ;;  %v208_v27 = vld [vmem:[%s10608_s27 + $0x30] sm:$0xff] }
  0x19   : > { %v10644_v25 = vpack.c.bf16 %v207_v23, %v206_v21  ;;  %13625 = vst [vmem:[#allocation6_spill] sm:$0xff] %v10648_v26  ;;  %v209_v28 = vld [vmem:[%s10608_s27 + $0x38] sm:$0xff]  ;;  %v228_v29 = vld [vmem:[%s10608_s27 + $0xd0] sm:$0xff]  ;;  %v210_v31 = vld [vmem:[%s10608_s27 + $0x40] sm:$0xff] }
  0x1a   : > { %8766 = vmatprep.mubr.msk.bf16.mxu0 %vm265_vm0, %v10634_v18  ;;  %v229_v30 = vld [vmem:[%s10608_s27 + $0xd8] sm:$0xff]  ;;  %v211_v32 = vld [vmem:[%s10608_s27 + $0x48] sm:$0xff]  ;;  %v230_v33 = vld [vmem:[%s10608_s27 + $0xe0] sm:$0xff]  ;;  %v10666_v35 = vpack.c.bf16 %v209_v28, %v208_v27 }
  0x1b   : > { %8767 = vmatmul.mubr.msk.bf16.vlgmr.msra.gmra.mrb[0].mxu0 %vm265_vm0, %v10639_v22  ;;  %v231_v34 = vld [vmem:[%s10608_s27 + $0xe8] sm:$0xff]  ;;  %v10668_v36 = vpack.c.bf16 %v229_v30, %v228_v29  ;;  %v10670_v37 = vpack.c.bf16 %v211_v32, %v210_v31  ;;  %v232_v39 = vld [vmem:[%s10608_s27 + $0xf0] sm:$0xff]  ;;  %v213_v41 = vld [vmem:[%s10608_s27 + $0x58] sm:$0xff] }
  0x1c   : > { %8770 = vmatprep.mubr.msk.bf16.mxu0 %vm265_vm0, %v10644_v25  ;;  %8833 = vmatpush3.bf16.msra.mxu0 %v10028_v2  ;;  %v10672_v38 = vpack.c.bf16 %v231_v34, %v230_v33  ;;  %v212_v40 = vld [vmem:[%s10608_s27 + $0x50] sm:$0xff]  ;;  %v233_v42 = vld [vmem:[%s10608_s27 + $0xf8] sm:$0xff]  ;;  %v214_v43 = vld [vmem:[%s10608_s27 + $0x60] sm:$0xff] }
  0x1d   : > { %13626 = vst [vmem:[#allocation7_spill] sm:$0xff] %v10668_v36  ;;  %13627 = vst [vmem:[#allocation8_spill] sm:$0xff] %v10670_v37  ;;  %v215_v44 = vld [vmem:[%s10608_s27 + $0x68] sm:$0xff]  ;;  %v10688_v45 = vpack.c.bf16 %v213_v41, %v212_v40  ;;  %v10690_v46 = vpack.c.bf16 %v233_v42, %v232_v39  ;;  %v216_v48 = vld [vmem:[%s10608_s27 + $0x70] sm:$0xff] }
  0x1e   : > { %13628 = vst [vmem:[#allocation9_spill] sm:$0xff] %v10672_v38  ;;  %v10692_v47 = vpack.c.bf16 %v215_v44, %v214_v43  ;;  %v217_v49 = vld [vmem:[%s10608_s27 + $0x78] sm:$0xff] }
  0x1f   : > { %8787 = vmatmul.mubr.msk.bf16.gmra.mrb[4].mxu1 %vm265_vm0, %v10642_v24  ;;  %13629 = vst [vmem:[#allocation10_spill] sm:$0xff] %v10688_v45  ;;  %13630 = vst [vmem:[#allocation11_spill] sm:$0xff] %v10690_v46  ;;  %v10704_v50 = vpack.c.bf16 %v217_v49, %v216_v48 }
  0x20   : > { %8790 = vmatprep.mubr.msk.bf16.mxu1 %vm265_vm0, %v10648_v26  ;;  %13631 = vst [vmem:[#allocation12_spill] sm:$0xff] %v10692_v47 }
  0x21   : > { %13632 = vst [vmem:[#allocation13_spill] sm:$0xff] %v10704_v50 }
  0x23   : > { %8771 = vmatmul.mubr.msk.bf16.gmra.mrb[4].mxu0 %vm265_vm0, %v10666_v35 }
  0x24   : > { %8774 = vmatprep.mubr.msk.bf16.mxu0 %vm265_vm0, %v10670_v37 }
  0x27   : > { %8791 = vmatmul.mubr.msk.bf16.gmra.mrb[8].mxu1 %vm265_vm0, %v10668_v36 }
  0x28   : > { %8794 = vmatprep.mubr.msk.bf16.mxu1 %vm265_vm0, %v10672_v38 }
  0x2b   : > { %8775 = vmatmul.mubr.msk.bf16.gmra.mrb[8].mxu0 %vm265_vm0, %v10688_v45 }
  0x2c   : > { %8778 = vmatprep.mubr.msk.bf16.mxu0 %vm265_vm0, %v10692_v47 }
  0x2f   : > { %8795 = vmatmul.mubr.msk.bf16.gmra.mrb[12].mxu1 %vm265_vm0, %v10690_v46 }
  0x30   : > { %8800 = vmatprep.mubr.msk.bf16.mxu1 %vm265_vm0, %v10634_v18 }
  0x33   : > { %8779 = vmatmul.mubr.msk.bf16.gmra.mrb[12].mxu0 %vm265_vm0, %v10704_v50 }
  0x34   : > { %8834 = vmatprep.mubr.msk.bf16.mxu0 %vm265_vm0, %v10634_v18 }
  0x37   : > { %8801 = vmatmul.mubr.msk.bf16.vlgmr.msra.gmra.mrb[16].mxu1 %vm265_vm0, %v10639_v22 }
  0x38   : > { %8804 = vmatprep.mubr.msk.bf16.mxu1 %vm265_vm0, %v10644_v25 }
  0x3b   : > { %8835 = vmatmul.mubr.msk.bf16.vlgmr.msra.gmra.mrb[16].mxu0 %vm265_vm0, %v10639_v22 }
  0x3c   : > { %8838 = vmatprep.mubr.msk.bf16.mxu0 %vm265_vm0, %v10644_v25 }
  0x3f   : > { %8805 = vmatmul.mubr.msk.bf16.gmra.mrb[20].mxu1 %vm265_vm0, %v10666_v35 }
  0x40   : > { %8808 = vmatprep.mubr.msk.bf16.mxu1 %vm265_vm0, %v10670_v37 }
  0x43   : > { %8839 = vmatmul.mubr.msk.bf16.gmra.mrb[20].mxu0 %vm265_vm0, %v10666_v35 }
  0x44   : > { %8842 = vmatprep.mubr.msk.bf16.mxu0 %vm265_vm0, %v10670_v37 }
  0x47   : > { %8809 = vmatmul.mubr.msk.bf16.gmra.mrb[24].mxu1 %vm265_vm0, %v10688_v45 }
  0x48   : > { %8812 = vmatprep.mubr.msk.bf16.mxu1 %vm265_vm0, %v10692_v47 }
  0x4b   : > { %8843 = vmatmul.mubr.msk.bf16.gmra.mrb[24].mxu0 %vm265_vm0, %v10688_v45 }
  0x4c   : > { %8846 = vmatprep.mubr.msk.bf16.mxu0 %vm265_vm0, %v10692_v47 }
  0x4f   : > { %8813 = vmatmul.mubr.msk.bf16.gmra.mrb[28].mxu1 %vm265_vm0, %v10704_v50 }
  0x50   : > { %8816 = vmatprep.mubr.msk.bf16.mxu1 %vm265_vm0, %v10613_v6 }
  0x53   : > { %8847 = vmatmul.mubr.msk.bf16.gmra.mrb[28].mxu0 %vm265_vm0, %v10704_v50 }
  0x54   : > { %8850 = vmatprep.mubr.msk.bf16.mxu0 %vm265_vm0, %v10613_v6 }
  0x57   : > { %8817 = vmatmul.mubr.msk.bf16.gmra.mrb[32].mxu1 %vm265_vm0, %v10618_v10 }
  0x58   : > { %8820 = vmatprep.mubr.msk.bf16.mxu1 %vm265_vm0, %v10620_v11 }
  0x5b   : > { %8851 = vmatmul.mubr.msk.bf16.gmra.mrb[32].mxu0 %vm265_vm0, %v10618_v10 }
  0x5c   : > { %8854 = vmatprep.mubr.msk.bf16.mxu0 %vm265_vm0, %v10620_v11 }
  0x5f   : > { %8821 = vmatmul.mubr.msk.bf16.gmra.mrb[36].mxu1 %vm265_vm0, %v10642_v24 }
  0x60   : > { %8824 = vmatprep.mubr.msk.bf16.mxu1 %vm265_vm0, %v10648_v26 }
  0x63   : > { %8855 = vmatmul.mubr.msk.bf16.gmra.mrb[36].mxu0 %vm265_vm0, %v10642_v24 }
  0x64   : > { %8858 = vmatprep.mubr.msk.bf16.mxu0 %vm265_vm0, %v10648_v26 }
  0x67   : > { %8825 = vmatmul.mubr.msk.bf16.gmra.mrb[40].mxu1 %vm265_vm0, %v10668_v36 }
  0x68   : > { %8828 = vmatprep.mubr.msk.bf16.mxu1 %vm265_vm0, %v10672_v38 }
  0x6b   : > { %8859 = vmatmul.mubr.msk.bf16.gmra.mrb[40].mxu0 %vm265_vm0, %v10668_v36 }
  0x6c   : > { %8862 = vmatprep.mubr.msk.bf16.mxu0 %vm265_vm0, %v10672_v38 }
  0x6f   : > { %8829 = vmatmul.mubr.msk.bf16.gmra.mrb[44].mxu1 %vm265_vm0, %v10690_v46 }
  0x73   : > { %8863 = vmatmul.mubr.msk.bf16.gmra.mrb[44].mxu0 %vm265_vm0, %v10690_v46 }
  0xea   : > { %v10770_v51 = vpop.f32.mrb[0].mxu1 }
  0xeb   : > { %v412_v52 = vpop.f32.mrb[1].mxu1 }
  0xec   : > { %v10772_v53 = vpop.f32.mrb[2].mxu1 }
  0xed   : > { %v415_v55 = vpop.f32.mrb[3].mxu1 }
  0xee   : > { %v823_v56 = vpack.c.bf16 %v415_v55, %v412_v52  ;;  %v10776_v57 = vpop.f32.mrb[0].mxu0 }
  0xef   : > { %v348_v58 = vpop.f32.mrb[1].mxu0 }
  0xf0   : > { %8906 = vmatprep.mubr.msk.bf16.mxu0 %vm863_vm1, %v823_v56  ;;  %v10779_v59 = vpop.f32.mrb[2].mxu0 }
  0xf1   : > { %v351_v62 = vpop.f32.mrb[3].mxu0 }
  0xf2   : > { %v10781_v60 = vpop.f32.mrb[4].mxu1  ;;  %v815_v0 = vpack.c.bf16 %v351_v62, %v348_v58 }
  0xf3   : > { %v10785_v63 = vpop.f32.mrb[5].mxu1 }
  0xf4   : > { %v10787_v1 = vpop.f32.mrb[6].mxu1  ;;  %8874 = vmatprep.mubr.msk.bf16.mxu1 %vm863_vm1, %v815_v0 }
  0xf5   : > { %v10791_v3 = vpop.f32.mrb[7].mxu1 }
  0xf6   : > { %v10796_v5 = vpop.f32.mrb[4].mxu0 }
  0xf7   : > { %v10798_v7 = vpop.f32.mrb[5].mxu0 }
  0xf8   : > { %v10800_v8 = vpop.f32.mrb[6].mxu0 }
  0xf9   : > { %v10806_v13 = vpop.f32.mrb[7].mxu0 }
  0xfa   : > { %v10802_v9 = vpop.f32.mrb[8].mxu1 }
  0xfb   : > { %v10808_v14 = vpop.f32.mrb[9].mxu1 }
  0xfc   : > { %v10812_v16 = vpop.f32.mrb[10].mxu1 }
  0xfd   : > { %v10816_v19 = vpop.f32.mrb[11].mxu1 }
  0xfe   : > { %v10820_v21 = vpop.f32.mrb[8].mxu0 }
  0xff   : > { %v10822_v23 = vpop.f32.mrb[9].mxu0 }
 0x100   : > { %v10824_v27 = vpop.f32.mrb[10].mxu0 }
 0x101   : > { %v10830_v30 = vpop.f32.mrb[11].mxu0 }
 0x102   : > { %v10826_v28 = vpop.f32.mrb[12].mxu1 }
 0x103   : > { %v10832_v31 = vpop.f32.mrb[13].mxu1 }
 0x104   : > { %v10836_v33 = vpop.f32.mrb[14].mxu1 }
 0x105   : > { %v10840_v39 = vpop.f32.mrb[15].mxu1 }
 0x106   : > { %v10844_v41 = vpop.f32.mrb[12].mxu0 }
 0x107   : > { %v10846_v42 = vpop.f32.mrb[13].mxu0 }
 0x108   : > { %v10848_v43 = vpop.f32.mrb[14].mxu0 }
 0x109   : > { %v10852_v49 = vpop.f32.mrb[15].mxu0 }
 0x10a   : > { %v8802_v44 = vpop.f32.mrb[16].mxu1 }
 0x10b   : > { %v518_v52 = vpop.f32.mrb[17].mxu1 }
 0x10c   : > { %v8803_v56 = vpop.f32.mrb[18].mxu1 }
 0x10d   : > { %v832_v58 = vpack.c.bf16 %v8803_v56, %v8802_v44  ;;  %v521_v62 = vpop.f32.mrb[19].mxu1 }
 0x10e   : > { %v831_v0 = vpack.c.bf16 %v521_v62, %v518_v52  ;;  %v8836_v34 = vpop.f32.mrb[16].mxu0 }
 0x10f   : > { %v688_v17 = vpop.f32.mrb[17].mxu0  ;;  %v880_v32 = vsel %vm863_vm1, %v832_v58, 0 }
 0x110   : > { %9950 = vmatprep.subr.msk.bf16.mxu1 %vm863_vm1, %v831_v0  ;;  %v877_v40 = vsel %vm863_vm1, %v831_v0, 0  ;;  %v8837_v20 = vpop.f32.mrb[18].mxu0 }
 0x111   : > { %8867 = vmatpush3.bf16.xpose.msra.mxu1 %v877_v40  ;;  %v10859_v48 = vpack.c.bf16 %v8837_v20, %v8836_v34  ;;  %v691_v4 = vpop.f32.mrb[19].mxu0 }
 0x112   : > { %9951 = vmatprep.subr.msk.bf16.mxu1 %vm863_vm1, %v832_v58  ;;  %v8806_v2 = vpop.f32.mrb[20].mxu1  ;;  %v10861_v55 = vpack.c.bf16 %v691_v4, %v688_v17 }
 0x113   : > { %v534_v54 = vpop.f32.mrb[21].mxu1 }
 0x114   : > { %v8807_v44 = vpop.f32.mrb[22].mxu1 }
 0x115   : > { %v834_v56 = vpack.c.bf16 %v8807_v44, %v8806_v2  ;;  %v537_v52 = vpop.f32.mrb[23].mxu1 }
 0x116   : > { %v833_v62 = vpack.c.bf16 %v537_v52, %v534_v54  ;;  %v8840_v29 = vpop.f32.mrb[20].mxu0 }
 0x117   : > { %v704_v0 = vpop.f32.mrb[21].mxu0 }
 0x118   : > { %v8841_v40 = vpop.f32.mrb[22].mxu0  ;;  %v883_v52 = vsel %vm863_vm1, %v833_v62, 0 }
 0x119   : > { %8869 = vmatpush3.bf16.xpose.msra.mxu1 %v880_v32  ;;  %v10865_v15 = vpack.c.bf16 %v8841_v40, %v8840_v29  ;;  %v707_v20 = vpop.f32.mrb[23].mxu0 }
 0x11a   : > { %9952 = vmatprep.subr.msk.bf16.mxu1 %vm863_vm1, %v833_v62  ;;  %v8810_v12 = vpop.f32.mrb[24].mxu1  ;;  %v10867_v61 = vpack.c.bf16 %v707_v20, %v704_v0  ;;  %v886_v62 = vsel %vm863_vm1, %v834_v56, 0 }
 0x11b   : > { %v550_v34 = vpop.f32.mrb[25].mxu1 }
 0x11c   : > { %v8811_v4 = vpop.f32.mrb[26].mxu1 }
 0x11d   : > { %v836_v17 = vpack.c.bf16 %v8811_v4, %v8810_v12  ;;  %v553_v2 = vpop.f32.mrb[27].mxu1 }
 0x11e   : > { %v835_v44 = vpack.c.bf16 %v553_v2, %v550_v34  ;;  %v8844_v54 = vpop.f32.mrb[24].mxu0 }
 0x11f   : > { %v720_v58 = vpop.f32.mrb[25].mxu0 }
 0x120   : > { %v8845_v32 = vpop.f32.mrb[26].mxu0 }
 0x121   : > { %8871 = vmatpush3.bf16.xpose.msra.mxu1 %v883_v52  ;;  %v10871_v38 = vpack.c.bf16 %v8845_v32, %v8844_v54  ;;  %v723_v29 = vpop.f32.mrb[27].mxu0 }
 0x122   : > { %9953 = vmatprep.subr.msk.bf16.mxu1 %vm863_vm1, %v834_v56  ;;  %v8814_v46 = vpop.f32.mrb[28].mxu1  ;;  %v10873_v36 = vpack.c.bf16 %v723_v29, %v720_v58  ;;  %v13633_v58 = vpack.c.bf16 %v10779_v59, %v10776_v57 }
 0x123   : > { %v566_v40 = vpop.f32.mrb[29].mxu1 }
 0x124   : > { %v8815_v0 = vpop.f32.mrb[30].mxu1 }
 0x125   : > { %v838_v20 = vpack.c.bf16 %v8815_v0, %v8814_v46  ;;  %v569_v12 = vpop.f32.mrb[31].mxu1  ;;  %v966_v46 = vsel %vm863_vm1, %v835_v44, 0 }
 0x126   : > { %v837_v4 = vpack.c.bf16 %v569_v12, %v566_v40  ;;  %v10875_v34 = vpop.f32.mrb[28].mxu0 }
 0x129   : > { %8873 = vmatpush3.bf16.xpose.msra.mxu1 %v886_v62  ;;  %v969_v62 = vsel %vm863_vm1, %v836_v17, 0 }
 0x12a   : > { %v8818_v2 = vpop.f32.mrb[32].mxu1  ;;  %9954 = vmatprep.subr.msk.bf16.mxu1 %vm863_vm1, %v835_v44 }
 0x12b   : > { %v582_v52 = vpop.f32.mrb[33].mxu1 }
 0x12c   : > { %v8819_v26 = vpop.f32.mrb[34].mxu1 }
 0x12d   : > { %v840_v54 = vpack.c.bf16 %v8819_v26, %v8818_v2  ;;  %v585_v32 = vpop.f32.mrb[35].mxu1  ;;  %v13634_v26 = vpack.c.bf16 %v10806_v13, %v10798_v7  ;;  %v13636_v2 = vpack.c.bf16 %v10830_v30, %v10822_v23 }
 0x12e   : > { %v839_v24 = vpack.c.bf16 %v585_v32, %v582_v52 }
 0x12f   : > { %v1058_v44 = vsel %vm863_vm1, %v840_v54, 0 }
 0x130   : > { %8875 = vmatmul.mubr.msk.bf16.vlgmr.msra.gmra.mrb[48].mxu1 %vm863_vm1, %v13633_v58  ;;  %9958 = vmatprep.subr.msk.bf16.mxu0 %vm863_vm1, %v839_v24  ;;  %v1055_v56 = vsel %vm863_vm1, %v839_v24, 0  ;;  %v13635_v24 = vpack.c.bf16 %v10800_v8, %v10796_v5 }
 0x131   : > { %8883 = vmatpush3.bf16.xpose.msra.mxu1 %v966_v46  ;;  %8899 = vmatpush3.bf16.xpose.msra.mxu0 %v1055_v56 }
 0x132   : > { %9955 = vmatprep.subr.msk.bf16.mxu1 %vm863_vm1, %v836_v17  ;;  %8878 = vmatprep.mubr.msk.bf16.mxu1 %vm863_vm1, %v13634_v26  ;;  %v8822_v29 = vpop.f32.mrb[36].mxu1  ;;  %v972_v17 = vsel %vm863_vm1, %v837_v4, 0 }
 0x133   : > { %9959 = vmatprep.subr.msk.bf16.mxu0 %vm863_vm1, %v840_v54  ;;  %v598_v57 = vpop.f32.mrb[37].mxu1 }
 0x134   : > { %v8823_v59 = vpop.f32.mrb[38].mxu1 }
 0x135   : > { %v842_v40 = vpack.c.bf16 %v8823_v59, %v8822_v29  ;;  %v601_v0 = vpop.f32.mrb[39].mxu1  ;;  %v975_v29 = vsel %vm863_vm1, %v838_v20, 0  ;;  %v13638_v59 = vpack.c.bf16 %v10772_v53, %v10770_v51  ;;  %v13641_v51 = vpack.c.bf16 %v10848_v43, %v10844_v41 }
 0x136   : > { %v841_v12 = vpack.c.bf16 %v601_v0, %v598_v57  ;;  %v13642_v53 = vpack.c.bf16 %v10787_v1, %v10781_v60 }
 0x137   : > { %v1064_v57 = vsel %vm863_vm1, %v842_v40, 0 }
 0x138   : > { %8879 = vmatmul.mubr.msk.bf16.gmra.mrb[52].mxu1 %vm863_vm1, %v13635_v24  ;;  %v1061_v8 = vsel %vm863_vm1, %v841_v12, 0 }
 0x139   : > { %8885 = vmatpush3.bf16.xpose.msra.mxu1 %v969_v62  ;;  %8901 = vmatpush3.bf16.xpose.msra.mxu0 %v1058_v44 }
 0x13a   : > { %9956 = vmatprep.subr.msk.bf16.mxu1 %vm863_vm1, %v837_v4  ;;  %9960 = vmatprep.subr.msk.bf16.mxu0 %vm863_vm1, %v841_v12  ;;  %v8826_v7 = vpop.f32.mrb[40].mxu1  ;;  %v13637_v4 = vpack.c.bf16 %v10824_v27, %v10820_v21  ;;  %v13640_v21 = vpack.c.bf16 %v10852_v49, %v10846_v42 }
 0x13b   : > { %v614_v13 = vpop.f32.mrb[41].mxu1  ;;  %8890 = vmatprep.mubr.msk.bf16.mxu1 %vm863_vm1, %v13636_v2 }
 0x13c   : > { %v8827_v52 = vpop.f32.mrb[42].mxu1 }
 0x13d   : > { %v844_v54 = vpack.c.bf16 %v8827_v52, %v8826_v7  ;;  %v617_v5 = vpop.f32.mrb[43].mxu1 }
 0x13e   : > { %v843_v32 = vpack.c.bf16 %v617_v5, %v614_v13 }
 0x141   : > { %8887 = vmatpush3.bf16.xpose.msra.mxu1 %v972_v17  ;;  %8903 = vmatpush3.bf16.xpose.msra.mxu0 %v1061_v8 }
 0x142   : > { %9957 = vmatprep.subr.msk.bf16.mxu1 %vm863_vm1, %v838_v20  ;;  %9961 = vmatprep.subr.msk.bf16.mxu0 %vm863_vm1, %v842_v40  ;;  %v8830_v58 = vpop.f32.mrb[44].mxu1  ;;  %v1144_v20 = vsel %vm863_vm1, %v843_v32, 0  ;;  %v13639_v40 = vpack.c.bf16 %v10791_v3, %v10785_v63  ;;  %v1147_v63 = vsel %vm863_vm1, %v844_v54, 0  ;;  %v13643_v3 = vpack.c.bf16 %v10816_v19, %v10808_v14  ;;  %v736_v19 = vpop.f32.mrb[29].mxu0 }
 0x143   : > { %v630_v46 = vpop.f32.mrb[45].mxu1  ;;  %v13644_v14 = vpack.c.bf16 %v10812_v16, %v10802_v9  ;;  %v8849_v9 = vpop.f32.mrb[30].mxu0 }
 0x144   : > { %v8831_v56 = vpop.f32.mrb[46].mxu1  ;;  %v854_v16 = vpack.c.bf16 %v8849_v9, %v10875_v34  ;;  %v739_v27 = vpop.f32.mrb[31].mxu0 }
 0x145   : > { %v846_v23 = vpack.c.bf16 %v8831_v56, %v8830_v58  ;;  %v633_v30 = vpop.f32.mrb[47].mxu1  ;;  %v853_v41 = vpack.c.bf16 %v739_v27, %v736_v19 }
 0x146   : > { %v845_v26 = vpack.c.bf16 %v633_v30, %v630_v46 }
 0x147   : > { %v1153_v1 = vsel %vm863_vm1, %v846_v23, 0 }
 0x148   : > { %v1150_v60 = vsel %vm863_vm1, %v845_v26, 0 }
 0x149   : > { %8889 = vmatpush3.bf16.xpose.msra.mxu1 %v975_v29  ;;  %8905 = vmatpush3.bf16.xpose.msra.mxu0 %v1064_v57 }
 0x14a   : > { %9962 = vmatprep.subr.msk.bf16.mxu1 %vm863_vm1, %v843_v32  ;;  %8930 = vmatprep.subr.bf16.mxu0 %v10861_v55 }
 0x150   : > { %8891 = vmatmul.mubr.msk.bf16.vlgmr.msra.gmra.mrb[56].mxu1 %vm863_vm1, %v13637_v4  ;;  %8907 = vmatmul.mubr.msk.bf16.vlgmr.msra.gmra.mrb[48].mxu0 %vm863_vm1, %v13638_v59 }
 0x151   : > { %8910 = vmatprep.mubr.msk.bf16.mxu0 %vm863_vm1, %v13639_v40  ;;  %8915 = vmatpush3.bf16.xpose.msra.mxu1 %v1144_v20 }
 0x152   : > { %9963 = vmatprep.subr.msk.bf16.mxu1 %vm863_vm1, %v844_v54  ;;  %8894 = vmatprep.mubr.msk.bf16.mxu1 %vm863_vm1, %v13640_v21 }
 0x153   : > { %8931 = vmatpush3.bf16.msra.mxu0 %v10861_v55 }
 0x154   : > { %8932 = vmatprep.subr.bf16.mxu0 %v10859_v48 }
 0x157   : > { %8933 = vmatpush3.bf16.msra.mxu0 %v10859_v48 }
 0x158   : > { %8895 = vmatmul.mubr.msk.bf16.gmra.mrb[60].mxu1 %vm863_vm1, %v13641_v51  ;;  %8911 = vmatmul.mubr.msk.bf16.gmra.mrb[52].mxu0 %vm863_vm1, %v13642_v53 }
 0x159   : > { %8917 = vmatpush3.bf16.xpose.msra.mxu1 %v1147_v63  ;;  %8922 = vmatprep.mubr.msk.bf16.mxu1 %vm863_vm1, %v13643_v3 }
 0x15a   : > { %9964 = vmatprep.subr.msk.bf16.mxu1 %vm863_vm1, %v845_v26  ;;  %8934 = vmatprep.subr.bf16.mxu0 %v10867_v61 }
 0x15b   : > { %8935 = vmatpush3.bf16.msra.mxu0 %v10867_v61  ;;  %v13645_v61 = vpack.c.bf16 %v10840_v39, %v10832_v31 }
 0x15c   : > { %8936 = vmatprep.subr.bf16.mxu0 %v10865_v15 }
 0x15f   : > { %8937 = vmatpush3.bf16.msra.mxu0 %v10865_v15  ;;  %v13646_v15 = vpack.c.bf16 %v10836_v33, %v10826_v28 }
 0x161   : > { %8919 = vmatpush3.bf16.xpose.msra.mxu1 %v1150_v60 }
 0x162   : > { %9965 = vmatprep.subr.msk.bf16.mxu1 %vm863_vm1, %v846_v23 }
 0x169   : > { %8921 = vmatpush3.bf16.xpose.msra.mxu1 %v1153_v1 }
 0x16a   : > { %8946 = vmatprep.subr.bf16.mxu1 %v10873_v36 }
 0x170   : > { %8923 = vmatmul.mubr.msk.bf16.vlgmr.msra.gmra.mrb[64].mxu1 %vm863_vm1, %v13644_v14 }
 0x171   : > { %8926 = vmatprep.mubr.msk.bf16.mxu1 %vm863_vm1, %v13645_v61  ;;  %8947 = vmatpush3.bf16.msra.mxu1 %v10873_v36  ;;  %v8852_v36 = vpop.f32.mrb[32].mxu0 }
 0x172   : > { %8948 = vmatprep.subr.bf16.mxu1 %v10871_v38  ;;  %v752_v31 = vpop.f32.mrb[33].mxu0 }
 0x173   : > { %v8853_v39 = vpop.f32.mrb[34].mxu0 }
 0x174   : > { %v10971_v42 = vpack.c.bf16 %v8853_v39, %v8852_v36 }
 0x175   : > { %8949 = vmatpush3.bf16.msra.mxu1 %v10871_v38  ;;  %v755_v38 = vpop.f32.mrb[35].mxu0 }
 0x176   : > { %8950 = vmatprep.subr.bf16.mxu1 %v853_v41  ;;  %v10973_v43 = vpack.c.bf16 %v755_v38, %v752_v31  ;;  %v8856_v28 = vpop.f32.mrb[36].mxu0 }
 0x177   : > { %v768_v33 = vpop.f32.mrb[37].mxu0 }
 0x178   : > { %8927 = vmatmul.mubr.msk.bf16.gmra.mrb[68].mxu1 %vm863_vm1, %v13646_v15  ;;  %8962 = vmatprep.subr.bf16.mxu0 %v10973_v43  ;;  %v8857_v48 = vpop.f32.mrb[38].mxu0 }
 0x179   : > { %8951 = vmatpush3.bf16.msra.mxu1 %v853_v41  ;;  %v10976_v49 = vpack.c.bf16 %v8857_v48, %v8856_v28  ;;  %v771_v55 = vpop.f32.mrb[39].mxu0 }
 0x17a   : > { %8952 = vmatprep.subr.bf16.mxu1 %v854_v16  ;;  %v10978_v34 = vpack.c.bf16 %v771_v55, %v768_v33  ;;  %v8860_v0 = vpop.f32.mrb[40].mxu0 }
 0x17b   : > { %v784_v44 = vpop.f32.mrb[41].mxu0 }
 0x17c   : > { %v8861_v12 = vpop.f32.mrb[42].mxu0 }
 0x17d   : > { %8953 = vmatpush3.bf16.msra.mxu1 %v854_v16  ;;  %v10980_v24 = vpack.c.bf16 %v8861_v12, %v8860_v0  ;;  %v787_v62 = vpop.f32.mrb[43].mxu0 }
 0x17e   : > { %v10982_v7 = vpack.c.bf16 %v787_v62, %v784_v44  ;;  %v8864_v13 = vpop.f32.mrb[44].mxu0 }
 0x17f   : > { %v800_v2 = vpop.f32.mrb[45].mxu0 }
 0x180   : > { %v8865_v52 = vpop.f32.mrb[46].mxu0  ;;  %8978 = vmatprep.subr.bf16.mxu1 %v10982_v7 }
 0x181   : > { %v10985_v54 = vpack.c.bf16 %v8865_v52, %v8864_v13  ;;  %v803_v5 = vpop.f32.mrb[47].mxu0 }
 0x182   : > { %v10987_v8 = vpack.c.bf16 %v803_v5, %v800_v2 }
 0x203   : > { %v10989_v32 = vpop.f32.mrb[48].mxu1 }
 0x204   : > { %v10991_v17 = vpop.f32.mrb[49].mxu1  ;;  %v1227_v58 = vsel %vm1220_vm2, %v10989_v32, -inf }
 0x205   : > { %1228 = vmax.xlane.f32.xlu1 %v1227_v58  ;;  %v10995_v46 = vpop.f32.mrb[50].mxu1  ;;  %v1221_v56 = vsel %vm1220_vm2, %v10991_v17, -inf }
 0x206   : > { %1222 = vmax.xlane.f32.xlu0 %v1221_v56  ;;  %v10999_v23 = vpop.f32.mrb[51].mxu1  ;;  %v1230_v30 = vsel %vm1220_vm2, %v10995_v46, -inf }
 0x207   : > { %v1224_v26 = vsel %vm1220_vm2, %v10999_v23, -inf }
 0x209   : > { %1231 = vmax.xlane.f32.xlu1 %v1230_v30 }
 0x20a   : > { %1225 = vmax.xlane.f32.xlu0 %v1224_v26 }
 0x20b   : > { %v11005_v29 = vpop.f32.mrb[52].mxu1 }
 0x20c   : > { %v11007_v57 = vpop.f32.mrb[53].mxu1  ;;  %v1239_v21 = vsel %vm1220_vm2, %v11005_v29, -inf }
 0x20d   : > { %v11009_v4 = vpop.f32.mrb[54].mxu1  ;;  %v1233_v59 = vsel %vm1220_vm2, %v11007_v57, -inf }
 0x20e   : > { %1234 = vmax.xlane.f32.xlu0 %v1233_v59  ;;  %v11013_v20 = vpop.f32.mrb[55].mxu1  ;;  %v1242_v51 = vsel %vm1220_vm2, %v11009_v4, -inf }
 0x20f   : > { %v1236_v40 = vsel %vm1220_vm2, %v11013_v20, -inf }
 0x210   : > { %1237 = vmax.xlane.f32.xlu1 %v1236_v40 }
 0x212   : > { %1240 = vmax.xlane.f32.xlu0 %v1239_v21 }
 0x214   : > { %1243 = vmax.xlane.f32.xlu1 %v1242_v51 }
 0x223   : > { %v11021_v53 = vpop.f32.mrb[56].mxu1  ;;  %v11023_v63 = vpop.f32.mrb[48].mxu0 }
 0x224   : > { %v11025_v3 = vpop.f32.mrb[57].mxu1  ;;  %v11027_v60 = vpop.f32.mrb[49].mxu0  ;;  %v1251_v16 = vsel %vm1220_vm2, %v11021_v53, -inf  ;;  %v1275_v2 = vsel %vm1220_vm2, %v11023_v63, -inf }
 0x225   : > { %v11029_v1 = vpop.f32.mrb[58].mxu1  ;;  %v11031_v14 = vpop.f32.mrb[50].mxu0  ;;  %v1245_v61 = vsel %vm1220_vm2, %v11025_v3, -inf  ;;  %v1269_v62 = vsel %vm1220_vm2, %v11027_v60, -inf }
 0x226   : > { %1246 = vmax.xlane.f32.xlu0 %v1245_v61  ;;  %v11035_v15 = vpop.f32.mrb[59].mxu1  ;;  %v11037_v19 = vpop.f32.mrb[51].mxu0  ;;  %v1254_v36 = vsel %vm1220_vm2, %v11029_v1, -inf  ;;  %v1278_v52 = vsel %vm1220_vm2, %v11031_v14, -inf }
 0x227   : > { %v1248_v9 = vsel %vm1220_vm2, %v11035_v15, -inf  ;;  %v1272_v13 = vsel %vm1220_vm2, %v11037_v19, -inf }
 0x228   : > { %1249 = vmax.xlane.f32.xlu1 %v1248_v9 }
 0x22a   : > { %1252 = vmax.xlane.f32.xlu0 %v1251_v16 }
 0x22b   : > { %v11043_v27 = vpop.f32.mrb[60].mxu1  ;;  %v11045_v41 = vpop.f32.mrb[52].mxu0 }
 0x22c   : > { %1255 = vmax.xlane.f32.xlu1 %v1254_v36  ;;  %v11049_v31 = vpop.f32.mrb[61].mxu1  ;;  %v11051_v39 = vpop.f32.mrb[53].mxu0  ;;  %v1263_v44 = vsel %vm1220_vm2, %v11043_v27, -inf  ;;  %v1287_v56 = vsel %vm1220_vm2, %v11045_v41, -inf }
 0x22d   : > { %v11053_v38 = vpop.f32.mrb[62].mxu1  ;;  %v11055_v28 = vpop.f32.mrb[54].mxu0  ;;  %v1257_v33 = vsel %vm1220_vm2, %v11049_v31, -inf  ;;  %v1281_v5 = vsel %vm1220_vm2, %v11051_v39, -inf }
 0x22e   : > { %1258 = vmax.xlane.f32.xlu0 %v1257_v33  ;;  %v11059_v48 = vpop.f32.mrb[63].mxu1  ;;  %v11061_v55 = vpop.f32.mrb[55].mxu0  ;;  %v1266_v12 = vsel %vm1220_vm2, %v11053_v38, -inf  ;;  %v1290_v26 = vsel %vm1220_vm2, %v11055_v28, -inf }
 0x22f   : > { %v1260_v0 = vsel %vm1220_vm2, %v11059_v48, -inf  ;;  %v1284_v58 = vsel %vm1220_vm2, %v11061_v55, -inf }
 0x230   : > { %1261 = vmax.xlane.f32.xlu1 %v1260_v0 }
 0x232   : > { %1264 = vmax.xlane.f32.xlu0 %v1263_v44 }
 0x234   : > { %1267 = vmax.xlane.f32.xlu1 %v1266_v12 }
 0x236   : > { %1270 = vmax.xlane.f32.xlu0 %v1269_v62 }
 0x238   : > { %1273 = vmax.xlane.f32.xlu1 %v1272_v13 }
 0x23a   : > { %1276 = vmax.xlane.f32.xlu0 %v1275_v2 }
 0x23c   : > { %1279 = vmax.xlane.f32.xlu1 %v1278_v52 }
 0x23e   : > { %1282 = vmax.xlane.f32.xlu0 %v1281_v5 }
 0x240   : > { %1285 = vmax.xlane.f32.xlu1 %v1284_v58 }
 0x242   : > { %1288 = vmax.xlane.f32.xlu0 %v1287_v56 }
 0x243   : > { %v11083_v30 = vpop.f32.mrb[64].mxu1 }
 0x244   : > { %v11087_v59 = vpop.f32.mrb[65].mxu1  ;;  %1291 = vmax.xlane.f32.xlu1 %v1290_v26  ;;  %v1299_v9 = vsel %vm1220_vm2, %v11083_v30, -inf }
 0x245   : > { %v11089_v40 = vpop.f32.mrb[66].mxu1  ;;  %v1293_v21 = vsel %vm1220_vm2, %v11087_v59, -inf }
 0x246   : > { %v11093_v51 = vpop.f32.mrb[67].mxu1  ;;  %1294 = vmax.xlane.f32.xlu0 %v1293_v21  ;;  %v1302_v36 = vsel %vm1220_vm2, %v11089_v40, -inf }
 0x247   : > { %v1296_v61 = vsel %vm1220_vm2, %v11093_v51, -inf }
 0x248   : > { %1297 = vmax.xlane.f32.xlu1 %v1296_v61 }
 0x24a   : > { %1300 = vmax.xlane.f32.xlu0 %v1299_v9 }
 0x24b   : > { %v11099_v16 = vpop.f32.mrb[68].mxu1 }
 0x24c   : > { %v11103_v33 = vpop.f32.mrb[69].mxu1  ;;  %1303 = vmax.xlane.f32.xlu1 %v1302_v36  ;;  %v1311_v13 = vsel %vm1220_vm2, %v11099_v16, -inf }
 0x24d   : > { %v11105_v0 = vpop.f32.mrb[70].mxu1  ;;  %v1305_v44 = vsel %vm1220_vm2, %v11103_v33, -inf }
 0x24e   : > { %v11109_v12 = vpop.f32.mrb[71].mxu1  ;;  %1306 = vmax.xlane.f32.xlu0 %v1305_v44  ;;  %v1314_v2 = vsel %vm1220_vm2, %v11105_v0, -inf }
 0x24f   : > { %v1308_v62 = vsel %vm1220_vm2, %v11109_v12, -inf }
 0x250   : > { %1309 = vmax.xlane.f32.xlu1 %v1308_v62 }
 0x252   : > { %1312 = vmax.xlane.f32.xlu0 %v1311_v13 }
 0x254   : > { %1315 = vmax.xlane.f32.xlu1 %v1314_v2 }
 0x292   : > { %v1229_v52 = vpop.xlane.xlu1 %1228 }
 0x293   : > { %v1319_v5 = vsub.f32 %v10989_v32, %v1229_v52  ;;  %v1223_v58 = vpop.xlane.xlu0 %1222 }
 0x294   : > { %v1317_v56 = vsub.f32 %v10991_v17, %v1223_v58 }
 0x295   : > { %v1353_v26 = vmul.f32 1.442695, %v1319_v5 }
 0x296   : > { %v1349_v21 = vmul.f32 1.442695, %v1317_v56  ;;  %v1232_v61 = vpop.xlane.xlu1 %1231 }
 0x297   : > { %v1320_v9 = vsub.f32 %v10995_v46, %v1232_v61  ;;  %v1226_v36 = vpop.xlane.xlu0 %1225 }
 0x298   : > { %10038 = vpow2.f32 %v1349_v21  ;;  %v1318_v44 = vsub.f32 %v10999_v23, %v1226_v36 }
 0x299   : > { %10040 = vpow2.f32 %v1353_v26  ;;  %v1355_v62 = vmul.f32 1.442695, %v1320_v9 }
 0x29a   : > { %v1351_v13 = vmul.f32 1.442695, %v1318_v44 }
 0x29b   : > { %v1235_v11 = vpop.xlane.xlu0 %1234 }
 0x29c   : > { %10042 = vpow2.f32 %v1351_v13  ;;  %v1321_v2 = vsub.f32 %v11007_v57, %v1235_v11 }
 0x29d   : > { %v1238_v32 = vpop.xlane.xlu1 %1237  ;;  %10044 = vpow2.f32 %v1355_v62 }
 0x29e   : > { %v1357_v52 = vmul.f32 1.442695, %v1321_v2  ;;  %v1322_v17 = vsub.f32 %v11013_v20, %v1238_v32 }
 0x29f   : > { %v1241_v5 = vpop.xlane.xlu0 %1240 }
 0x2a0   : > { %10046 = vpow2.f32 %v1357_v52  ;;  %v1359_v58 = vmul.f32 1.442695, %v1322_v17  ;;  %v1323_v46 = vsub.f32 %v11005_v29, %v1241_v5 }
 0x2a1   : > { %v1244_v56 = vpop.xlane.xlu1 %1243 }
 0x2a2   : > { %v11124_v21 = vpop.eup %10038  ;;  %10048 = vpow2.f32 %v1359_v58  ;;  %v1361_v23 = vmul.f32 1.442695, %v1323_v46  ;;  %v1324_v26 = vsub.f32 %v11009_v4, %v1244_v56 }
 0x2a3   : > { %v1413_v11 = vsel %vm1220_vm2, %v11124_v21, 0.0  ;;  %v11129_v57 = vpop.eup %10040 }
 0x2a4   : > { %10050 = vpow2.f32 %v1361_v23  ;;  %v1363_v61 = vmul.f32 1.442695, %v1324_v26  ;;  %1414 = vadd.xlane.f32.xlu0 %v1413_v11  ;;  %v1419_v29 = vsel %vm1220_vm2, %v11129_v57, 0.0 }
 0x2a6   : > { %v11131_v20 = vpop.eup %10042  ;;  %10052 = vpow2.f32 %v1363_v61 }
 0x2a7   : > { %v1416_v9 = vsel %vm1220_vm2, %v11131_v20, 0.0  ;;  %v11137_v36 = vpop.eup %10044 }
 0x2a8   : > { %1420 = vadd.xlane.f32.xlu0 %v1419_v29  ;;  %1417 = vadd.xlane.f32.xlu1 %v1416_v9  ;;  %v1422_v62 = vsel %vm1220_vm2, %v11137_v36, 0.0 }
 0x2aa   : > { %v11139_v4 = vpop.eup %10046 }
 0x2ab   : > { %v1425_v44 = vsel %vm1220_vm2, %v11139_v4, 0.0 }
 0x2ac   : > { %v11145_v13 = vpop.eup %10048  ;;  %1426 = vadd.xlane.f32.xlu0 %v1425_v44  ;;  %1423 = vadd.xlane.f32.xlu1 %v1422_v62 }
 0x2ad   : > { %v1428_v52 = vsel %vm1220_vm2, %v11145_v13, 0.0 }
 0x2ae   : > { %v11147_v2 = vpop.eup %10050 }
 0x2af   : > { %v1431_v32 = vsel %vm1220_vm2, %v11147_v2, 0.0 }
 0x2b0   : > { %v11153_v17 = vpop.eup %10052  ;;  %1432 = vadd.xlane.f32.xlu0 %v1431_v32  ;;  %1429 = vadd.xlane.f32.xlu1 %v1428_v52 }
 0x2b1   : > { %v1434_v58 = vsel %vm1220_vm2, %v11153_v17, 0.0 }
 0x2b3   : > { %v1247_v5 = vpop.xlane.xlu0 %1246 }
 0x2b4   : > { %v1325_v46 = vsub.f32 %v11025_v3, %v1247_v5  ;;  %1435 = vadd.xlane.f32.xlu1 %v1434_v58 }
 0x2b5   : > { %v1250_v56 = vpop.xlane.xlu1 %1249 }
 0x2b6   : > { %v1365_v23 = vmul.f32 1.442695, %v1325_v46  ;;  %v1326_v26 = vsub.f32 %v11035_v15, %v1250_v56 }
 0x2b7   : > { %v1253_v11 = vpop.xlane.xlu0 %1252 }
 0x2b8   : > { %10054 = vpow2.f32 %v1365_v23  ;;  %v1367_v61 = vmul.f32 1.442695, %v1326_v26  ;;  %v1327_v29 = vsub.f32 %v11021_v53, %v1253_v11 }
 0x2b9   : > { %v1256_v9 = vpop.xlane.xlu1 %1255 }
 0x2ba   : > { %10056 = vpow2.f32 %v1367_v61  ;;  %v1369_v44 = vmul.f32 1.442695, %v1327_v29  ;;  %v1328_v62 = vsub.f32 %v11029_v1, %v1256_v9 }
 0x2bb   : > { %v1259_v32 = vpop.xlane.xlu0 %1258 }
 0x2bc   : > { %10058 = vpow2.f32 %v1369_v44  ;;  %v1371_v52 = vmul.f32 1.442695, %v1328_v62  ;;  %v1329_v3 = vsub.f32 %v11049_v31, %v1259_v32 }
 0x2bd   : > { %v1262_v5 = vpop.xlane.xlu1 %1261 }
 0x2be   : > { %10060 = vpow2.f32 %v1371_v52  ;;  %v1373_v58 = vmul.f32 1.442695, %v1329_v3  ;;  %v1330_v15 = vsub.f32 %v11059_v48, %v1262_v5 }
 0x2bf   : > { %v1265_v46 = vpop.xlane.xlu0 %1264 }
 0x2c0   : > { %10062 = vpow2.f32 %v1373_v58  ;;  %v1375_v56 = vmul.f32 1.442695, %v1330_v15  ;;  %v1331_v53 = vsub.f32 %v11043_v27, %v1265_v46 }
 0x2c1   : > { %v1268_v23 = vpop.xlane.xlu1 %1267 }
 0x2c2   : > { %v11164_v26 = vpop.eup %10054  ;;  %10064 = vpow2.f32 %v1375_v56  ;;  %v1377_v1 = vmul.f32 1.442695, %v1331_v53  ;;  %v1332_v11 = vsub.f32 %v11053_v38, %v1268_v23 }
 0x2c3   : > { %v1271_v61 = vpop.xlane.xlu0 %1270  ;;  %v1437_v31 = vsel %vm1220_vm2, %v11164_v26, 0.0 }
 0x2c4   : > { %v11169_v29 = vpop.eup %10056  ;;  %10066 = vpow2.f32 %v1377_v1  ;;  %v1379_v48 = vmul.f32 1.442695, %v1332_v11  ;;  %v1333_v9 = vsub.f32 %v11027_v60, %v1271_v61  ;;  %1438 = vadd.xlane.f32.xlu0 %v1437_v31 }
 0x2c5   : > { %v1274_v44 = vpop.xlane.xlu1 %1273  ;;  %v1440_v27 = vsel %vm1220_vm2, %v11169_v29, 0.0 }
 0x2c6   : > { %v11174_v62 = vpop.eup %10058  ;;  %10068 = vpow2.f32 %v1379_v48  ;;  %v1381_v32 = vmul.f32 1.442695, %v1333_v9  ;;  %v1334_v38 = vsub.f32 %v11037_v19, %v1274_v44  ;;  %1441 = vadd.xlane.f32.xlu1 %v1440_v27 }
 0x2c7   : > { %v1277_v52 = vpop.xlane.xlu0 %1276  ;;  %v1443_v3 = vsel %vm1220_vm2, %v11174_v62, 0.0 }
 0x2c8   : > { %v11179_v5 = vpop.eup %10060  ;;  %10070 = vpow2.f32 %v1381_v32  ;;  %v1383_v60 = vmul.f32 1.442695, %v1334_v38  ;;  %v1335_v58 = vsub.f32 %v11023_v63, %v1277_v52  ;;  %1444 = vadd.xlane.f32.xlu0 %v1443_v3 }
 0x2c9   : > { %v1280_v15 = vpop.xlane.xlu1 %1279  ;;  %v1446_v46 = vsel %vm1220_vm2, %v11179_v5, 0.0 }
 0x2ca   : > { %v11184_v56 = vpop.eup %10062  ;;  %10072 = vpow2.f32 %v1383_v60  ;;  %v1385_v19 = vmul.f32 1.442695, %v1335_v58  ;;  %v1336_v53 = vsub.f32 %v11031_v14, %v1280_v15  ;;  %1447 = vadd.xlane.f32.xlu1 %v1446_v46 }
 0x2cb   : > { %v1283_v23 = vpop.xlane.xlu0 %1282  ;;  %v1449_v1 = vsel %vm1220_vm2, %v11184_v56, 0.0 }
 0x2cc   : > { %v11189_v11 = vpop.eup %10064  ;;  %10074 = vpow2.f32 %v1385_v19  ;;  %v1387_v63 = vmul.f32 1.442695, %v1336_v53  ;;  %v1337_v61 = vsub.f32 %v11051_v39, %v1283_v23  ;;  %1450 = vadd.xlane.f32.xlu0 %v1449_v1 }
 0x2cd   : > { %v1286_v31 = vpop.xlane.xlu1 %1285  ;;  %v1452_v48 = vsel %vm1220_vm2, %v11189_v11, 0.0 }
 0x2ce   : > { %v11194_v9 = vpop.eup %10066  ;;  %10076 = vpow2.f32 %v1387_v63  ;;  %v1389_v14 = vmul.f32 1.442695, %v1337_v61  ;;  %v1338_v44 = vsub.f32 %v11061_v55, %v1286_v31  ;;  %1453 = vadd.xlane.f32.xlu1 %v1452_v48 }
 0x2cf   : > { %v1289_v27 = vpop.xlane.xlu0 %1288  ;;  %v1455_v32 = vsel %vm1220_vm2, %v11194_v9, 0.0 }
 0x2d0   : > { %v11199_v38 = vpop.eup %10068  ;;  %10078 = vpow2.f32 %v1389_v14  ;;  %v1391_v39 = vmul.f32 1.442695, %v1338_v44  ;;  %v1339_v52 = vsub.f32 %v11045_v41, %v1289_v27  ;;  %1456 = vadd.xlane.f32.xlu0 %v1455_v32 }
 0x2d1   : > { %v1292_v3 = vpop.xlane.xlu1 %1291  ;;  %v1458_v60 = vsel %vm1220_vm2, %v11199_v38, 0.0 }
 0x2d2   : > { %v11204_v58 = vpop.eup %10070  ;;  %10080 = vpow2.f32 %v1391_v39  ;;  %v1393_v55 = vmul.f32 1.442695, %v1339_v52  ;;  %v1340_v15 = vsub.f32 %v11055_v28, %v1292_v3  ;;  %1459 = vadd.xlane.f32.xlu1 %v1458_v60 }
 0x2d3   : > { %v1295_v46 = vpop.xlane.xlu0 %1294  ;;  %v1461_v19 = vsel %vm1220_vm2, %v11204_v58, 0.0 }
 0x2d4   : > { %v11209_v53 = vpop.eup %10072  ;;  %10082 = vpow2.f32 %v1393_v55  ;;  %v1395_v41 = vmul.f32 1.442695, %v1340_v15  ;;  %v1341_v23 = vsub.f32 %v11087_v59, %v1295_v46  ;;  %1462 = vadd.xlane.f32.xlu0 %v1461_v19 }
 0x2d5   : > { %v1298_v1 = vpop.xlane.xlu1 %1297  ;;  %v1464_v63 = vsel %vm1220_vm2, %v11209_v53, 0.0 }
 0x2d6   : > { %v11214_v61 = vpop.eup %10074  ;;  %10084 = vpow2.f32 %v1395_v41  ;;  %v1397_v28 = vmul.f32 1.442695, %v1341_v23  ;;  %v1342_v31 = vsub.f32 %v11093_v51, %v1298_v1  ;;  %1465 = vadd.xlane.f32.xlu1 %v1464_v63 }
 0x2d7   : > { %v1301_v48 = vpop.xlane.xlu0 %1300  ;;  %v1467_v14 = vsel %vm1220_vm2, %v11214_v61, 0.0 }
 0x2d8   : > { %v11219_v44 = vpop.eup %10076  ;;  %10086 = vpow2.f32 %v1397_v28  ;;  %v1399_v59 = vmul.f32 1.442695, %v1342_v31  ;;  %v1343_v27 = vsub.f32 %v11083_v30, %v1301_v48  ;;  %1468 = vadd.xlane.f32.xlu0 %v1467_v14 }
 0x2d9   : > { %v1304_v32 = vpop.xlane.xlu1 %1303  ;;  %v1470_v39 = vsel %vm1220_vm2, %v11219_v44, 0.0 }
 0x2da   : > { %v11224_v52 = vpop.eup %10078  ;;  %10088 = vpow2.f32 %v1399_v59  ;;  %v1401_v51 = vmul.f32 1.442695, %v1343_v27  ;;  %v1344_v3 = vsub.f32 %v11089_v40, %v1304_v32  ;;  %1471 = vadd.xlane.f32.xlu1 %v1470_v39 }
 0x2db   : > { %v1307_v60 = vpop.xlane.xlu0 %1306  ;;  %v1473_v55 = vsel %vm1220_vm2, %v11224_v52, 0.0 }
 0x2dc   : > { %v11229_v15 = vpop.eup %10080  ;;  %10090 = vpow2.f32 %v1401_v51  ;;  %v1403_v30 = vmul.f32 1.442695, %v1344_v3  ;;  %v1345_v46 = vsub.f32 %v11103_v33, %v1307_v60  ;;  %1474 = vadd.xlane.f32.xlu0 %v1473_v55 }
 0x2dd   : > { %v1310_v19 = vpop.xlane.xlu1 %1309  ;;  %v1476_v41 = vsel %vm1220_vm2, %v11229_v15, 0.0 }
 0x2de   : > { %v11234_v23 = vpop.eup %10082  ;;  %10092 = vpow2.f32 %v1403_v30  ;;  %v1405_v40 = vmul.f32 1.442695, %v1345_v46  ;;  %v1346_v1 = vsub.f32 %v11109_v12, %v1310_v19  ;;  %1477 = vadd.xlane.f32.xlu1 %v1476_v41 }
 0x2df   : > { %v1313_v63 = vpop.xlane.xlu0 %1312  ;;  %v1479_v28 = vsel %vm1220_vm2, %v11234_v23, 0.0 }
 0x2e0   : > { %v11239_v31 = vpop.eup %10084  ;;  %10094 = vpow2.f32 %v1405_v40  ;;  %v1407_v33 = vmul.f32 1.442695, %v1346_v1  ;;  %v1347_v48 = vsub.f32 %v11099_v16, %v1313_v63  ;;  %1480 = vadd.xlane.f32.xlu0 %v1479_v28 }
 0x2e1   : > { %v1316_v14 = vpop.xlane.xlu1 %1315  ;;  %v1482_v59 = vsel %vm1220_vm2, %v11239_v31, 0.0 }
 0x2e2   : > { %v11244_v27 = vpop.eup %10086  ;;  %10096 = vpow2.f32 %v1407_v33  ;;  %v1409_v12 = vmul.f32 1.442695, %v1347_v48  ;;  %v1348_v32 = vsub.f32 %v11105_v0, %v1316_v14  ;;  %1483 = vadd.xlane.f32.xlu1 %v1482_v59 }
 0x2e3   : > { %v1485_v39 = vsel %vm1220_vm2, %v11244_v27, 0.0 }
 0x2e4   : > { %v11249_v51 = vpop.eup %10088  ;;  %10098 = vpow2.f32 %v1409_v12  ;;  %v1411_v3 = vmul.f32 1.442695, %v1348_v32  ;;  %1486 = vadd.xlane.f32.xlu0 %v1485_v39 }
 0x2e5   : > { %v1488_v16 = vsel %vm1220_vm2, %v11249_v51, 0.0 }
 0x2e6   : > { %v11253_v60 = vpop.eup %10090  ;;  %10100 = vpow2.f32 %v1411_v3  ;;  %1489 = vadd.xlane.f32.xlu1 %v1488_v16 }
 0x2e7   : > { %v1491_v55 = vsel %vm1220_vm2, %v11253_v60, 0.0 }
 0x2e8   : > { %v11257_v0 = vpop.eup %10092  ;;  %1492 = vadd.xlane.f32.xlu0 %v1491_v55 }
 0x2e9   : > { %v1494_v30 = vsel %vm1220_vm2, %v11257_v0, 0.0 }
 0x2ea   : > { %v11261_v46 = vpop.eup %10094  ;;  %1495 = vadd.xlane.f32.xlu1 %v1494_v30 }
 0x2eb   : > { %v1497_v19 = vsel %vm1220_vm2, %v11261_v46, 0.0 }
 0x2ec   : > { %v11265_v41 = vpop.eup %10096  ;;  %1498 = vadd.xlane.f32.xlu0 %v1497_v19 }
 0x2ed   : > { %v1500_v40 = vsel %vm1220_vm2, %v11265_v41, 0.0 }
 0x2ee   : > { %v11269_v1 = vpop.eup %10098  ;;  %1501 = vadd.xlane.f32.xlu1 %v1500_v40 }
 0x2ef   : > { %v1503_v63 = vsel %vm1220_vm2, %v11269_v1, 0.0 }
 0x2f0   : > { %v11273_v28 = vpop.eup %10100  ;;  %1504 = vadd.xlane.f32.xlu0 %v1503_v63 }
 0x2f1   : > { %v1506_v33 = vsel %vm1220_vm2, %v11273_v28, 0.0 }
 0x2f2   : > { %1507 = vadd.xlane.f32.xlu1 %v1506_v33 }
 0x331   : > { %v1415_v48 = vpop.xlane.xlu0 %1414 }
 0x332   : > { %10102 = vrcp.f32 %v1415_v48 }
 0x335   : > { %v1421_v14 = vpop.xlane.xlu0 %1420  ;;  %v1418_v59 = vpop.xlane.xlu1 %1417 }
 0x336   : > { %10104 = vrcp.f32 %v1418_v59 }
 0x337   : > { %10106 = vrcp.f32 %v1421_v14 }
 0x339   : > { %v1427_v12 = vpop.xlane.xlu0 %1426  ;;  %v1424_v32 = vpop.xlane.xlu1 %1423 }
 0x33a   : > { %10108 = vrcp.f32 %v1424_v32 }
 0x33b   : > { %10110 = vrcp.f32 %v1427_v12 }
 0x33c   : > { %v10103_v16 = vpop.eup %10102 }
 0x33d   : > { %v1433_v39 = vpop.xlane.xlu0 %1432  ;;  %v1430_v3 = vpop.xlane.xlu1 %1429  ;;  %v1541_v19 = vmul.f32 %v10103_v16, %v11124_v21 }
 0x33e   : > { %10112 = vrcp.f32 %v1430_v3 }
 0x33f   : > { %10114 = vrcp.f32 %v1433_v39 }
 0x340   : > { %v10105_v55 = vpop.eup %10104 }
 0x341   : > { %v1436_v30 = vpop.xlane.xlu1 %1435  ;;  %v1542_v40 = vmul.f32 %v10105_v55, %v11131_v20  ;;  %v10107_v63 = vpop.eup %10106 }
 0x342   : > { %10116 = vrcp.f32 %v1436_v30  ;;  %v1543_v14 = vmul.f32 %v10107_v63, %v11129_v57 }
 0x343   : > { %v1573_v33 = vpack.c.bf16 %v1542_v40, %v1541_v19 }
 0x344   : > { %v10109_v48 = vpop.eup %10108 }
 0x345   : > { %v1544_v59 = vmul.f32 %v10109_v48, %v11137_v36  ;;  %8938 = vmatprep.mubr.msk.bf16.mxu0 %vm1220_vm2, %v1573_v33  ;;  %v10111_v12 = vpop.eup %10110 }
 0x346   : > { %v1545_v30 = vmul.f32 %v10111_v12, %v11139_v4 }
 0x347   : > { %v1574_v32 = vpack.c.bf16 %v1544_v59, %v1543_v14 }
 0x348   : > { %v10113_v3 = vpop.eup %10112 }
 0x349   : > { %v10115_v39 = vpop.eup %10114  ;;  %8939 = vmatmul.mubr.msk.bf16.vlgmr.msra.gmra.mrb[56].mxu0 %vm1220_vm2, %v1574_v32  ;;  %v1546_v21 = vmul.f32 %v10113_v3, %v11145_v13 }
 0x34a   : > { %8963 = vmatpush3.bf16.msra.mxu0 %v10973_v43  ;;  %v1547_v36 = vmul.f32 %v10115_v39, %v11147_v2 }
 0x34b   : > { %8964 = vmatprep.subr.bf16.mxu0 %v10971_v42  ;;  %v1575_v57 = vpack.c.bf16 %v1546_v21, %v1545_v30 }
 0x34c   : > { %v10117_v20 = vpop.eup %10116 }
 0x34d   : > { %v1548_v16 = vmul.f32 %v10117_v20, %v11153_v17  ;;  %8942 = vmatprep.mubr.msk.bf16.mxu0 %vm1220_vm2, %v1575_v57 }
 0x34e   : > { %8965 = vmatpush3.bf16.msra.mxu0 %v10971_v42 }
 0x34f   : > { %v1576_v55 = vpack.c.bf16 %v1548_v16, %v1547_v36  ;;  %8966 = vmatprep.subr.bf16.mxu0 %v10978_v34 }
 0x351   : > { %v1439_v4 = vpop.xlane.xlu0 %1438  ;;  %8943 = vmatmul.mubr.msk.bf16.gmra.mrb[60].mxu0 %vm1220_vm2, %v1576_v55 }
 0x352   : > { %10118 = vrcp.f32 %v1439_v4  ;;  %8967 = vmatpush3.bf16.msra.mxu0 %v10978_v34 }
 0x353   : > { %v1442_v43 = vpop.xlane.xlu1 %1441  ;;  %8968 = vmatprep.subr.bf16.mxu0 %v10976_v49 }
 0x354   : > { %10120 = vrcp.f32 %v1442_v43 }
 0x355   : > { %v1445_v13 = vpop.xlane.xlu0 %1444 }
 0x356   : > { %10122 = vrcp.f32 %v1445_v13  ;;  %8969 = vmatpush3.bf16.msra.mxu0 %v10976_v49 }
 0x357   : > { %v1448_v2 = vpop.xlane.xlu1 %1447 }
 0x358   : > { %10124 = vrcp.f32 %v1448_v2 }
 0x359   : > { %v1451_v42 = vpop.xlane.xlu0 %1450 }
 0x35a   : > { %10126 = vrcp.f32 %v1451_v42 }
 0x35b   : > { %v1454_v17 = vpop.xlane.xlu1 %1453 }
 0x35c   : > { %v10119_v19 = vpop.eup %10118  ;;  %10128 = vrcp.f32 %v1454_v17 }
 0x35d   : > { %v1457_v40 = vpop.xlane.xlu0 %1456  ;;  %v1549_v34 = vmul.f32 %v10119_v19, %v11164_v26 }
 0x35e   : > { %v10121_v63 = vpop.eup %10120  ;;  %10130 = vrcp.f32 %v1457_v40 }
 0x35f   : > { %v1460_v33 = vpop.xlane.xlu1 %1459  ;;  %v1550_v48 = vmul.f32 %v10121_v63, %v11169_v29 }
 0x360   : > { %v10123_v14 = vpop.eup %10122  ;;  %10132 = vrcp.f32 %v1460_v33 }
 0x361   : > { %v1463_v59 = vpop.xlane.xlu0 %1462  ;;  %v1577_v12 = vpack.c.bf16 %v1550_v48, %v1549_v34  ;;  %v1551_v32 = vmul.f32 %v10123_v14, %v11174_v62 }
 0x362   : > { %v10125_v49 = vpop.eup %10124  ;;  %10134 = vrcp.f32 %v1463_v59 }
 0x363   : > { %v1552_v3 = vmul.f32 %v10125_v49, %v11179_v5  ;;  %8954 = vmatprep.mubr.msk.bf16.mxu1 %vm1220_vm2, %v1577_v12  ;;  %v1466_v39 = vpop.xlane.xlu1 %1465 }
 0x364   : > { %v10127_v30 = vpop.eup %10126  ;;  %10136 = vrcp.f32 %v1466_v39 }
 0x365   : > { %v1578_v21 = vpack.c.bf16 %v1552_v3, %v1551_v32  ;;  %v1469_v20 = vpop.xlane.xlu0 %1468  ;;  %v1553_v57 = vmul.f32 %v10127_v30, %v11184_v56 }
 0x366   : > { %v10129_v26 = vpop.eup %10128  ;;  %10138 = vrcp.f32 %v1469_v20 }
 0x367   : > { %8955 = vmatmul.mubr.msk.bf16.vlgmr.msra.gmra.mrb[72].mxu1 %vm1220_vm2, %v1578_v21  ;;  %v1472_v29 = vpop.xlane.xlu1 %1471  ;;  %v1554_v36 = vmul.f32 %v10129_v26, %v11189_v11 }
 0x368   : > { %v10131_v16 = vpop.eup %10130  ;;  %8979 = vmatpush3.bf16.msra.mxu1 %v10982_v7  ;;  %10140 = vrcp.f32 %v1472_v29 }
 0x369   : > { %8980 = vmatprep.subr.bf16.mxu1 %v10980_v24  ;;  %v1475_v62 = vpop.xlane.xlu0 %1474  ;;  %v1579_v5 = vpack.c.bf16 %v1554_v36, %v1553_v57  ;;  %v1555_v43 = vmul.f32 %v10131_v16, %v11194_v9 }
 0x36a   : > { %v10133_v55 = vpop.eup %10132  ;;  %10142 = vrcp.f32 %v1475_v62 }
 0x36b   : > { %8958 = vmatprep.mubr.msk.bf16.mxu1 %vm1220_vm2, %v1579_v5  ;;  %v1478_v4 = vpop.xlane.xlu1 %1477  ;;  %v1556_v13 = vmul.f32 %v10133_v55, %v11199_v38 }
 0x36c   : > { %v10135_v56 = vpop.eup %10134  ;;  %8981 = vmatpush3.bf16.msra.mxu1 %v10980_v24  ;;  %10144 = vrcp.f32 %v1478_v4 }
 0x36d   : > { %8982 = vmatprep.subr.bf16.mxu1 %v10987_v8  ;;  %v1481_v7 = vpop.xlane.xlu0 %1480  ;;  %v1580_v11 = vpack.c.bf16 %v1556_v13, %v1555_v43  ;;  %v1557_v17 = vmul.f32 %v10135_v56, %v11204_v58 }
 0x36e   : > { %v10137_v2 = vpop.eup %10136  ;;  %10146 = vrcp.f32 %v1481_v7 }
 0x36f   : > { %8959 = vmatmul.mubr.msk.bf16.gmra.mrb[76].mxu1 %vm1220_vm2, %v1580_v11  ;;  %v1484_v42 = vpop.xlane.xlu1 %1483  ;;  %v1558_v19 = vmul.f32 %v10137_v2, %v11209_v53 }
 0x370   : > { %v10139_v9 = vpop.eup %10138  ;;  %10148 = vrcp.f32 %v1484_v42  ;;  %8983 = vmatpush3.bf16.msra.mxu1 %v10987_v8 }
 0x371   : > { %8984 = vmatprep.subr.bf16.mxu1 %v10985_v54  ;;  %v1487_v24 = vpop.xlane.xlu0 %1486  ;;  %v1581_v38 = vpack.c.bf16 %v1558_v19, %v1557_v17  ;;  %v1559_v63 = vmul.f32 %v10139_v9, %v11214_v61 }
 0x372   : > { %v10141_v40 = vpop.eup %10140  ;;  %10150 = vrcp.f32 %v1487_v24 }
 0x373   : > { %v1560_v33 = vmul.f32 %v10141_v40, %v11219_v44  ;;  %8970 = vmatprep.mubr.msk.bf16.mxu0 %vm1220_vm2, %v1581_v38  ;;  %v1490_v34 = vpop.xlane.xlu1 %1489 }
 0x374   : > { %v10143_v58 = vpop.eup %10142  ;;  %10152 = vrcp.f32 %v1490_v34  ;;  %8985 = vmatpush3.bf16.msra.mxu1 %v10985_v54  ;;  %v13647_v34 = vld [vmem:[#allocation4_spill] sm:$0xff] }
 0x375   : > { %v1582_v53 = vpack.c.bf16 %v1560_v33, %v1559_v63  ;;  %v1493_v48 = vpop.xlane.xlu0 %1492  ;;  %v1561_v59 = vmul.f32 %v10143_v58, %v11224_v52  ;;  %v10031_v58 = vld [vmem:[%s13575_s1 + $0x48] sm:$0xff]  }
 0x376   : > { %v10145_v8 = vpop.eup %10144  ;;  %10154 = vrcp.f32 %v1493_v48  ;;  %v13649_v48 = vld [vmem:[#allocation6_spill] sm:$0xff] }
 0x377   : > { %8971 = vmatmul.mubr.msk.bf16.vlgmr.msra.gmra.mrb[64].mxu0 %vm1220_vm2, %v1582_v53  ;;  %v1496_v14 = vpop.xlane.xlu1 %1495  ;;  %v1562_v61 = vmul.f32 %v10145_v8, %v11229_v15  ;;  %v13648_v53 = vld [vmem:[#allocation5_spill] sm:$0xff]  ;;  %v13650_v8 = vld [vmem:[#allocation7_spill] sm:$0xff] }
 0x378   : > { %v10147_v12 = vpop.eup %10146  ;;  %10156 = vrcp.f32 %v1496_v14  ;;  %v13651_v14 = vld [vmem:[#allocation9_spill] sm:$0xff] }
 0x379   : > { %v1499_v44 = vpop.xlane.xlu0 %1498  ;;  %v1583_v49 = vpack.c.bf16 %v1562_v61, %v1561_v59  ;;  %v1563_v3 = vmul.f32 %v10147_v12, %v11234_v23 }
 0x37a   : > { %v10149_v32 = vpop.eup %10148  ;;  %10158 = vrcp.f32 %v1499_v44 }
 0x37b   : > { %8974 = vmatprep.mubr.msk.bf16.mxu0 %vm1220_vm2, %v1583_v49  ;;  %v1502_v54 = vpop.xlane.xlu1 %1501  ;;  %v1564_v39 = vmul.f32 %v10149_v32, %v11239_v31 }
 0x37c   : > { %v10151_v30 = vpop.eup %10150  ;;  %10160 = vrcp.f32 %v1502_v54  ;;  %v13652_v54 = vld [vmem:[#allocation11_spill] sm:$0xff] }
 0x37d   : > { %v1505_v21 = vpop.xlane.xlu0 %1504  ;;  %v1584_v20 = vpack.c.bf16 %v1564_v39, %v1563_v3  ;;  %v1565_v26 = vmul.f32 %v10151_v30, %v11244_v27 }
 0x37e   : > { %v10153_v52 = vpop.eup %10152  ;;  %10162 = vrcp.f32 %v1505_v21 }
 0x37f   : > { %8975 = vmatmul.mubr.msk.bf16.gmra.mrb[68].mxu0 %vm1220_vm2, %v1584_v20  ;;  %v1508_v15 = vpop.xlane.xlu1 %1507  ;;  %v1566_v29 = vmul.f32 %v10153_v52, %v11249_v51 }
 0x380   : > { %v10155_v57 = vpop.eup %10154  ;;  %10164 = vrcp.f32 %v1508_v15 }
 0x381   : > { %v1585_v36 = vpack.c.bf16 %v1566_v29, %v1565_v26  ;;  %v1567_v23 = vmul.f32 %v10155_v57, %v11253_v60 }
 0x382   : > { %v10157_v16 = vpop.eup %10156 }
 0x383   : > { %v1568_v31 = vmul.f32 %v10157_v16, %v11257_v0  ;;  %8986 = vmatprep.mubr.msk.bf16.mxu1 %vm1220_vm2, %v1585_v36 }
 0x384   : > { %v10159_v62 = vpop.eup %10158 }
 0x385   : > { %v1586_v5 = vpack.c.bf16 %v1568_v31, %v1567_v23  ;;  %v1569_v4 = vmul.f32 %v10159_v62, %v11261_v46  ;;  %v1913_v46 = vld [vmem:[%s13576_s2] sm:$0xf] }
 0x386   : > { %v10161_v55 = vpop.eup %10160  ;;  %9966 = vmatprep.subr.msk.bf16.mxu0 %vm1962_vm3, %v1913_v46 }
 0x387   : > { %8987 = vmatmul.mubr.msk.bf16.vlgmr.msra.gmra.mrb[80].mxu1 %vm1220_vm2, %v1586_v5  ;;  %v1570_v27 = vmul.f32 %v10161_v55, %v11265_v41  ;;  %v1964_v41 = vsel %vm1962_vm3, %v1913_v46, 0 }
 0x388   : > { %v10163_v51 = vpop.eup %10162  ;;  %8995 = vmatpush3.bf16.msra.mxu0 %v1964_v41 }
 0x389   : > { %v1587_v43 = vpack.c.bf16 %v1570_v27, %v1569_v4  ;;  %v1571_v60 = vmul.f32 %v10163_v51, %v11269_v1  ;;  %v10029_v1 = vld [vmem:[%s13575_s1 + $0x28] sm:$0xff]  }
 0x38a   : > { %v10165_v13 = vpop.eup %10164  ;;  %9062 = vmatprep.subr.bf16.mxu0 %v10029_v1 }
 0x38b   : > { %8990 = vmatprep.mubr.msk.bf16.mxu1 %vm1220_vm2, %v1587_v43  ;;  %v1572_v0 = vmul.f32 %v10165_v13, %v11273_v28  ;;  %v10030_v28 = vld [vmem:[%s13575_s1 + $0x8] sm:$0xff]  }
 0x38c   : > { %9028 = vmatprep.subr.bf16.mxu1 %v10030_v28 }
 0x38d   : > { %v1588_v56 = vpack.c.bf16 %v1572_v0, %v1571_v60  ;;  %9029 = vmatpush3.bf16.msra.mxu1 %v10030_v28 }
 0x38e   : > { %9096 = vmatprep.subr.bf16.mxu1 %v10031_v58 }
 0x38f   : > { %8991 = vmatmul.mubr.msk.bf16.gmra.mrb[84].mxu1 %vm1220_vm2, %v1588_v56 }
 0x390   : > { %9030 = vmatprep.mubr.msk.bf16.mxu1 %vm265_vm0, %v10634_v18 }
 0x397   : > { %9031 = vmatmul.mubr.msk.bf16.vlgmr.msra.gmra.mrb[88].mxu1 %vm265_vm0, %v10639_v22 }
 0x398   : > { %9034 = vmatprep.mubr.msk.bf16.mxu1 %vm265_vm0, %v10644_v25  ;;  %9097 = vmatpush3.bf16.msra.mxu1 %v10031_v58 }
 0x39f   : > { %9035 = vmatmul.mubr.msk.bf16.gmra.mrb[92].mxu1 %vm265_vm0, %v10666_v35 }
 0x3a0   : > { %9038 = vmatprep.mubr.msk.bf16.mxu1 %vm265_vm0, %v10670_v37 }
 0x3a7   : > { %9039 = vmatmul.mubr.msk.bf16.gmra.mrb[96].mxu1 %vm265_vm0, %v10688_v45 }
 0x3a8   : > { %9042 = vmatprep.mubr.msk.bf16.mxu1 %vm265_vm0, %v10692_v47 }
 0x3af   : > { %9043 = vmatmul.mubr.msk.bf16.gmra.mrb[100].mxu1 %vm265_vm0, %v10704_v50 }
 0x3b0   : > { %9046 = vmatprep.mubr.msk.bf16.mxu1 %vm265_vm0, %v10613_v6 }
 0x3b7   : > { %9047 = vmatmul.mubr.msk.bf16.gmra.mrb[104].mxu1 %vm265_vm0, %v10618_v10 }
 0x3b8   : > { %9050 = vmatprep.mubr.msk.bf16.mxu1 %vm265_vm0, %v13647_v34 }
 0x3bf   : > { %9051 = vmatmul.mubr.msk.bf16.gmra.mrb[108].mxu1 %vm265_vm0, %v13648_v53 }
 0x3c0   : > { %9054 = vmatprep.mubr.msk.bf16.mxu1 %vm265_vm0, %v13649_v48 }
 0x3c7   : > { %9055 = vmatmul.mubr.msk.bf16.gmra.mrb[112].mxu1 %vm265_vm0, %v13650_v8 }
 0x3c8   : > { %9058 = vmatprep.mubr.msk.bf16.mxu1 %vm265_vm0, %v13651_v14 }
 0x3cf   : > { %9059 = vmatmul.mubr.msk.bf16.gmra.mrb[116].mxu1 %vm265_vm0, %v13652_v54 }
 0x3d0   : > { %9098 = vmatprep.mubr.msk.bf16.mxu1 %vm265_vm0, %v10634_v18 }
 0x3d7   : > { %9099 = vmatmul.mubr.msk.bf16.vlgmr.msra.gmra.mrb[120].mxu1 %vm265_vm0, %v10639_v22 }
 0x3d8   : > { %9102 = vmatprep.mubr.msk.bf16.mxu1 %vm265_vm0, %v10644_v25 }
 0x3df   : > { %9103 = vmatmul.mubr.msk.bf16.gmra.mrb[124].mxu1 %vm265_vm0, %v10666_v35 }
 0x3e0   : > { %9106 = vmatprep.mubr.msk.bf16.mxu1 %vm265_vm0, %v10670_v37 }
 0x3e7   : > { %9107 = vmatmul.mubr.msk.bf16.gmra.mrb[128].mxu1 %vm265_vm0, %v10688_v45 }
 0x3e8   : > { %9110 = vmatprep.mubr.msk.bf16.mxu1 %vm265_vm0, %v10692_v47 }
 0x3ef   : > { %9111 = vmatmul.mubr.msk.bf16.gmra.mrb[132].mxu1 %vm265_vm0, %v10704_v50 }
 0x3f0   : > { %9114 = vmatprep.mubr.msk.bf16.mxu1 %vm265_vm0, %v10613_v6 }
 0x3f7   : > { %9115 = vmatmul.mubr.msk.bf16.gmra.mrb[136].mxu1 %vm265_vm0, %v10618_v10 }
 0x3f8   : > { %9118 = vmatprep.mubr.msk.bf16.mxu1 %vm265_vm0, %v13647_v34 }
 0x3ff   : > { %9119 = vmatmul.mubr.msk.bf16.gmra.mrb[140].mxu1 %vm265_vm0, %v13648_v53 }
 0x400   : > { %9122 = vmatprep.mubr.msk.bf16.mxu1 %vm265_vm0, %v13649_v48 }
 0x407   : > { %9123 = vmatmul.mubr.msk.bf16.gmra.mrb[144].mxu1 %vm265_vm0, %v13650_v8 }
 0x408   : > { %9126 = vmatprep.mubr.msk.bf16.mxu1 %vm265_vm0, %v13651_v14 }
 0x40f   : > { %9127 = vmatmul.mubr.msk.bf16.gmra.mrb[148].mxu1 %vm265_vm0, %v13652_v54 }
 0x41c   : > { %v8940_v7 = vpop.f32.mrb[56].mxu0 }
 0x41d   : > { %v1635_v11 = vpop.f32.mrb[57].mxu0 }
 0x41e   : > { %v8941_v2 = vpop.f32.mrb[58].mxu0 }
 0x41f   : > { %v1898_v42 = vpack.c.bf16 %v8941_v2, %v8940_v7  ;;  %v1638_v17 = vpop.f32.mrb[59].mxu0 }
 0x420   : > { %v1897_v19 = vpack.c.bf16 %v1638_v17, %v1635_v11 }
 0x422   : > { %8996 = vmatprep.mubr.msk.bf16.mxu0 %vm863_vm1, %v1897_v19 }
 0x423   : > { %8997 = vmatmul.mubr.msk.bf16.vlgmr.msra.gmra.mrb[72].mxu0 %vm863_vm1, %v1898_v42 }
 0x424   : > { %v8944_v9 = vpop.f32.mrb[60].mxu0  ;;  %9063 = vmatpush3.bf16.msra.mxu0 %v10029_v1 }
 0x425   : > { %v1651_v24 = vpop.f32.mrb[61].mxu0 }
 0x426   : > { %v8945_v38 = vpop.f32.mrb[62].mxu0 }
 0x427   : > { %v1900_v40 = vpack.c.bf16 %v8945_v38, %v8944_v9  ;;  %v1654_v63 = vpop.f32.mrb[63].mxu0 }
 0x428   : > { %v1899_v33 = vpack.c.bf16 %v1654_v63, %v1651_v24 }
 0x42a   : > { %9000 = vmatprep.mubr.msk.bf16.mxu0 %vm863_vm1, %v1899_v33 }
 0x42b   : > { %9001 = vmatmul.mubr.msk.bf16.gmra.mrb[76].mxu0 %vm863_vm1, %v1900_v40 }
 0x43a   : > { %v8956_v59 = vpop.f32.mrb[72].mxu1 }
 0x43b   : > { %v1712_v61 = vpop.f32.mrb[73].mxu1 }
 0x43c   : > { %v8957_v12 = vpop.f32.mrb[74].mxu1 }
 0x43d   : > { %v1902_v44 = vpack.c.bf16 %v8957_v12, %v8956_v59  ;;  %v1715_v49 = vpop.f32.mrb[75].mxu1 }
 0x43e   : > { %v1901_v32 = vpack.c.bf16 %v1715_v49, %v1712_v61 }
 0x440   : > { %9004 = vmatprep.mubr.msk.bf16.mxu0 %vm863_vm1, %v1901_v32 }
 0x441   : > { %9005 = vmatmul.mubr.msk.bf16.gmra.mrb[80].mxu0 %vm863_vm1, %v1902_v44 }
 0x442   : > { %v8960_v3 = vpop.f32.mrb[76].mxu1 }
 0x443   : > { %v1728_v39 = vpop.f32.mrb[77].mxu1 }
 0x444   : > { %v8961_v30 = vpop.f32.mrb[78].mxu1 }
 0x445   : > { %v1904_v21 = vpack.c.bf16 %v8961_v30, %v8960_v3  ;;  %v1731_v20 = vpop.f32.mrb[79].mxu1 }
 0x446   : > { %v1903_v52 = vpack.c.bf16 %v1731_v20, %v1728_v39 }
 0x448   : > { %9008 = vmatprep.mubr.msk.bf16.mxu0 %vm863_vm1, %v1903_v52 }
 0x449   : > { %9009 = vmatmul.mubr.msk.bf16.gmra.mrb[84].mxu0 %vm863_vm1, %v1904_v21 }
 0x44a   : > { %v8972_v15 = vpop.f32.mrb[64].mxu0 }
 0x44b   : > { %v1789_v26 = vpop.f32.mrb[65].mxu0 }
 0x44c   : > { %v8973_v29 = vpop.f32.mrb[66].mxu0 }
 0x44d   : > { %v1906_v57 = vpack.c.bf16 %v8973_v29, %v8972_v15  ;;  %v1792_v36 = vpop.f32.mrb[67].mxu0 }
 0x44e   : > { %v1905_v16 = vpack.c.bf16 %v1792_v36, %v1789_v26 }
 0x450   : > { %9012 = vmatprep.mubr.msk.bf16.mxu0 %vm863_vm1, %v1905_v16 }
 0x451   : > { %9013 = vmatmul.mubr.msk.bf16.gmra.mrb[88].mxu0 %vm863_vm1, %v1906_v57 }
 0x452   : > { %v8976_v23 = vpop.f32.mrb[68].mxu0 }
 0x453   : > { %v1805_v31 = vpop.f32.mrb[69].mxu0 }
 0x454   : > { %v8977_v62 = vpop.f32.mrb[70].mxu0 }
 0x455   : > { %v1908_v5 = vpack.c.bf16 %v8977_v62, %v8976_v23  ;;  %v1808_v55 = vpop.f32.mrb[71].mxu0 }
 0x456   : > { %v1907_v4 = vpack.c.bf16 %v1808_v55, %v1805_v31 }
 0x458   : > { %9016 = vmatprep.mubr.msk.bf16.mxu0 %vm863_vm1, %v1907_v4 }
 0x459   : > { %9017 = vmatmul.mubr.msk.bf16.gmra.mrb[92].mxu0 %vm863_vm1, %v1908_v5 }
 0x45a   : > { %v8988_v27 = vpop.f32.mrb[80].mxu1 }
 0x45b   : > { %v1866_v51 = vpop.f32.mrb[81].mxu1 }
 0x45c   : > { %v8989_v43 = vpop.f32.mrb[82].mxu1 }
 0x45d   : > { %v1910_v13 = vpack.c.bf16 %v8989_v43, %v8988_v27  ;;  %v1869_v60 = vpop.f32.mrb[83].mxu1 }
 0x45e   : > { %v1909_v0 = vpack.c.bf16 %v1869_v60, %v1866_v51 }
 0x460   : > { %9020 = vmatprep.mubr.msk.bf16.mxu0 %vm863_vm1, %v1909_v0 }
 0x461   : > { %9021 = vmatmul.mubr.msk.bf16.gmra.mrb[96].mxu0 %vm863_vm1, %v1910_v13 }
 0x462   : > { %v8992_v56 = vpop.f32.mrb[84].mxu1 }
 0x463   : > { %v1882_v46 = vpop.f32.mrb[85].mxu1 }
 0x464   : > { %v8993_v41 = vpop.f32.mrb[86].mxu1 }
 0x465   : > { %v1912_v1 = vpack.c.bf16 %v8993_v41, %v8992_v56  ;;  %v1885_v28 = vpop.f32.mrb[87].mxu1 }
 0x466   : > { %v1911_v7 = vpack.c.bf16 %v1885_v28, %v1882_v46 }
 0x468   : > { %9024 = vmatprep.mubr.msk.bf16.mxu0 %vm863_vm1, %v1911_v7 }
 0x469   : > { %9025 = vmatmul.mubr.msk.bf16.gmra.mrb[100].mxu0 %vm863_vm1, %v1912_v1 }
 0x46a   : > { %9064 = vmatprep.mubr.msk.bf16.mxu0 %vm265_vm0, %v10634_v18  ;;  %v11465_v11 = vpop.f32.mrb[88].mxu1 }
 0x46b   : > { %v2202_v2 = vpop.f32.mrb[89].mxu1 }
 0x46c   : > { %v11467_v42 = vpop.f32.mrb[90].mxu1 }
 0x46d   : > { %v2205_v19 = vpop.f32.mrb[91].mxu1 }
 0x46e   : > { %v2669_v9 = vpack.c.bf16 %v2205_v19, %v2202_v2 }
 0x471   : > { %9065 = vmatmul.mubr.msk.bf16.vlgmr.msra.gmra.mrb[104].mxu0 %vm265_vm0, %v10639_v22 }
 0x472   : > { %9068 = vmatprep.mubr.msk.bf16.mxu0 %vm265_vm0, %v10644_v25  ;;  %v11472_v24 = vpop.f32.mrb[92].mxu1 }
 0x473   : > { %v11474_v38 = vpop.f32.mrb[93].mxu1 }
 0x474   : > { %v11476_v40 = vpop.f32.mrb[94].mxu1 }
 0x475   : > { %v11480_v33 = vpop.f32.mrb[95].mxu1 }
 0x479   : > { %9069 = vmatmul.mubr.msk.bf16.gmra.mrb[108].mxu0 %vm265_vm0, %v10666_v35 }
 0x47a   : > { %9072 = vmatprep.mubr.msk.bf16.mxu0 %vm265_vm0, %v10670_v37  ;;  %v11484_v59 = vpop.f32.mrb[96].mxu1 }
 0x47b   : > { %v2234_v61 = vpop.f32.mrb[97].mxu1 }
 0x47c   : > { %v11486_v12 = vpop.f32.mrb[98].mxu1 }
 0x47d   : > { %v2237_v49 = vpop.f32.mrb[99].mxu1 }
 0x47e   : > { %v2673_v32 = vpack.c.bf16 %v2237_v49, %v2234_v61 }
 0x480   : > { %9154 = vmatprep.mubr.msk.bf16.mxu1 %vm863_vm1, %v2673_v32 }
 0x481   : > { %9073 = vmatmul.mubr.msk.bf16.gmra.mrb[112].mxu0 %vm265_vm0, %v10688_v45 }
 0x482   : > { %9076 = vmatprep.mubr.msk.bf16.mxu0 %vm265_vm0, %v10692_v47  ;;  %v11491_v3 = vpop.f32.mrb[100].mxu1 }
 0x483   : > { %v11493_v39 = vpop.f32.mrb[101].mxu1 }
 0x484   : > { %v11495_v30 = vpop.f32.mrb[102].mxu1 }
 0x485   : > { %v11499_v20 = vpop.f32.mrb[103].mxu1 }
 0x489   : > { %9077 = vmatmul.mubr.msk.bf16.gmra.mrb[116].mxu0 %vm265_vm0, %v10704_v50 }
 0x48a   : > { %9080 = vmatprep.mubr.msk.bf16.mxu0 %vm265_vm0, %v10613_v6  ;;  %v11503_v15 = vpop.f32.mrb[104].mxu1 }
 0x48b   : > { %v11505_v26 = vpop.f32.mrb[105].mxu1 }
 0x48c   : > { %v11507_v29 = vpop.f32.mrb[106].mxu1 }
 0x48d   : > { %v11511_v36 = vpop.f32.mrb[107].mxu1 }
 0x491   : > { %9081 = vmatmul.mubr.msk.bf16.gmra.mrb[120].mxu0 %vm265_vm0, %v10618_v10 }
 0x492   : > { %9084 = vmatprep.mubr.msk.bf16.mxu0 %vm265_vm0, %v13647_v34  ;;  %v11515_v23 = vpop.f32.mrb[108].mxu1 }
 0x493   : > { %v11517_v31 = vpop.f32.mrb[109].mxu1 }
 0x494   : > { %v11519_v62 = vpop.f32.mrb[110].mxu1 }
 0x495   : > { %v11523_v55 = vpop.f32.mrb[111].mxu1 }
 0x499   : > { %9085 = vmatmul.mubr.msk.bf16.gmra.mrb[124].mxu0 %vm265_vm0, %v13648_v53 }
 0x49a   : > { %9088 = vmatprep.mubr.msk.bf16.mxu0 %vm265_vm0, %v13649_v48  ;;  %v11527_v27 = vpop.f32.mrb[112].mxu1 }
 0x49b   : > { %v11529_v51 = vpop.f32.mrb[113].mxu1 }
 0x49c   : > { %v11531_v43 = vpop.f32.mrb[114].mxu1 }
 0x49d   : > { %v11535_v60 = vpop.f32.mrb[115].mxu1 }
 0x4a1   : > { %9089 = vmatmul.mubr.msk.bf16.gmra.mrb[128].mxu0 %vm265_vm0, %v13650_v8 }
 0x4a2   : > { %9092 = vmatprep.mubr.msk.bf16.mxu0 %vm265_vm0, %v13651_v14  ;;  %v11539_v56 = vpop.f32.mrb[116].mxu1 }
 0x4a3   : > { %v11541_v46 = vpop.f32.mrb[117].mxu1 }
 0x4a4   : > { %v11543_v41 = vpop.f32.mrb[118].mxu1 }
 0x4a5   : > { %v11547_v28 = vpop.f32.mrb[119].mxu1 }
 0x4a9   : > { %9093 = vmatmul.mubr.msk.bf16.gmra.mrb[132].mxu0 %vm265_vm0, %v13652_v54 }
 0x4aa   : > { %9138 = vmatprep.mubr.msk.bf16.mxu0 %vm863_vm1, %v2669_v9  ;;  %v9100_v2 = vpop.f32.mrb[120].mxu1 }
 0x4ab   : > { %v2542_v19 = vpop.f32.mrb[121].mxu1 }
 0x4ac   : > { %v9101_v9 = vpop.f32.mrb[122].mxu1 }
 0x4ad   : > { %v11551_v61 = vpack.c.bf16 %v9101_v9, %v9100_v2  ;;  %v2545_v49 = vpop.f32.mrb[123].mxu1 }
 0x4ae   : > { %v11553_v32 = vpack.c.bf16 %v2545_v49, %v2542_v19 }
 0x4b2   : > { %v9104_v13 = vpop.f32.mrb[124].mxu1 }
 0x4b3   : > { %v2558_v5 = vpop.f32.mrb[125].mxu1 }
 0x4b4   : > { %v9105_v4 = vpop.f32.mrb[126].mxu1 }
 0x4b5   : > { %v11555_v57 = vpack.c.bf16 %v9105_v4, %v9104_v13  ;;  %v2561_v0 = vpop.f32.mrb[127].mxu1 }
 0x4b6   : > { %v11557_v1 = vpack.c.bf16 %v2561_v0, %v2558_v5 }
 0x4ba   : > { %v9108_v21 = vpop.f32.mrb[128].mxu1 }
 0x4bb   : > { %v2574_v52 = vpop.f32.mrb[129].mxu1 }
 0x4bc   : > { %v9109_v44 = vpop.f32.mrb[130].mxu1 }
 0x4bd   : > { %v11559_v7 = vpack.c.bf16 %v9109_v44, %v9108_v21  ;;  %v2577_v16 = vpop.f32.mrb[131].mxu1 }
 0x4be   : > { %v11561_v63 = vpack.c.bf16 %v2577_v16, %v2574_v52 }
 0x4c2   : > { %v9112_v2 = vpop.f32.mrb[132].mxu1 }
 0x4c3   : > { %v2590_v9 = vpop.f32.mrb[133].mxu1 }
 0x4c4   : > { %v9113_v19 = vpop.f32.mrb[134].mxu1 }
 0x4c5   : > { %v11563_v49 = vpack.c.bf16 %v9113_v19, %v9112_v2  ;;  %v2593_v58 = vpop.f32.mrb[135].mxu1 }
 0x4c6   : > { %v11565_v17 = vpack.c.bf16 %v2593_v58, %v2590_v9 }
 0x4ca   : > { %v9116_v4 = vpop.f32.mrb[136].mxu1 }
 0x4cb   : > { %v2606_v13 = vpop.f32.mrb[137].mxu1 }
 0x4cc   : > { %v9117_v5 = vpop.f32.mrb[138].mxu1 }
 0x4cd   : > { %v11567_v0 = vpack.c.bf16 %v9117_v5, %v9116_v4  ;;  %v2609_v54 = vpop.f32.mrb[139].mxu1 }
 0x4ce   : > { %v11569_v14 = vpack.c.bf16 %v2609_v54, %v2606_v13 }
 0x4d2   : > { %v9120_v44 = vpop.f32.mrb[140].mxu1 }
 0x4d3   : > { %v2622_v52 = vpop.f32.mrb[141].mxu1 }
 0x4d4   : > { %v9121_v8 = vpop.f32.mrb[142].mxu1 }
 0x4d5   : > { %v11571_v53 = vpack.c.bf16 %v9121_v8, %v9120_v44  ;;  %v2625_v2 = vpop.f32.mrb[143].mxu1 }
 0x4d6   : > { %v11573_v9 = vpack.c.bf16 %v2625_v2, %v2622_v52 }
 0x4da   : > { %v9124_v54 = vpop.f32.mrb[144].mxu1 }
 0x4db   : > { %v2638_v5 = vpop.f32.mrb[145].mxu1 }
 0x4dc   : > { %v9125_v6 = vpop.f32.mrb[146].mxu1 }
 0x4dd   : > { %v11578_v44 = vpack.c.bf16 %v9125_v6, %v9124_v54 }
 0x544   : > { %v9066_v21 = vpop.f32.mrb[104].mxu0 }
 0x545   : > { %v2372_v16 = vpop.f32.mrb[105].mxu0 }
 0x546   : > { %v9067_v48 = vpop.f32.mrb[106].mxu0 }
 0x547   : > { %v2686_v19 = vpack.c.bf16 %v9067_v48, %v9066_v21  ;;  %v2375_v58 = vpop.f32.mrb[107].mxu0  ;;  %v2641_v48 = vpop.f32.mrb[147].mxu1 }
 0x548   : > { %v2685_v34 = vpack.c.bf16 %v2375_v58, %v2372_v16  ;;  %v11580_v2 = vpack.c.bf16 %v2641_v48, %v2638_v5 }
 0x549   : > { %v2733_v58 = vsel %vm863_vm1, %v2686_v19, 0 }
 0x54a   : > { %v2730_v4 = vsel %vm863_vm1, %v2685_v34, 0  ;;  %9967 = vmatprep.subr.msk.bf16.mxu0 %vm863_vm1, %v2685_v34 }
 0x54b   : > { %9131 = vmatpush3.bf16.xpose.msra.mxu0 %v2730_v4 }
 0x54c   : > { %v9070_v13 = vpop.f32.mrb[108].mxu0  ;;  %9968 = vmatprep.subr.msk.bf16.mxu0 %vm863_vm1, %v2686_v19 }
 0x54d   : > { %v2388_v10 = vpop.f32.mrb[109].mxu0 }
 0x54e   : > { %v9071_v8 = vpop.f32.mrb[110].mxu0 }
 0x54f   : > { %v2688_v21 = vpack.c.bf16 %v9071_v8, %v9070_v13  ;;  %v2391_v52 = vpop.f32.mrb[111].mxu0 }
 0x550   : > { %v2687_v16 = vpack.c.bf16 %v2391_v52, %v2388_v10 }
 0x552   : > { %v2736_v6 = vsel %vm863_vm1, %v2687_v16, 0 }
 0x553   : > { %9133 = vmatpush3.bf16.xpose.msra.mxu0 %v2733_v58 }
 0x554   : > { %v9074_v34 = vpop.f32.mrb[112].mxu0  ;;  %9969 = vmatprep.subr.msk.bf16.mxu0 %vm863_vm1, %v2687_v16 }
 0x555   : > { %v2404_v4 = vpop.f32.mrb[113].mxu0 }
 0x556   : > { %v9075_v50 = vpop.f32.mrb[114].mxu0 }
 0x557   : > { %v2690_v47 = vpack.c.bf16 %v9075_v50, %v9074_v34  ;;  %v2407_v45 = vpop.f32.mrb[115].mxu0 }
 0x558   : > { %v2689_v37 = vpack.c.bf16 %v2407_v45, %v2404_v4  ;;  %v2739_v45 = vsel %vm863_vm1, %v2688_v21, 0 }
 0x559   : > { %v2822_v48 = vsel %vm863_vm1, %v2690_v47, 0 }
 0x55a   : > { %v2819_v54 = vsel %vm863_vm1, %v2689_v37, 0  ;;  %9971 = vmatprep.subr.msk.bf16.mxu1 %vm863_vm1, %v2689_v37 }
 0x55b   : > { %9135 = vmatpush3.bf16.xpose.msra.mxu0 %v2736_v6  ;;  %9147 = vmatpush3.bf16.xpose.msra.mxu1 %v2819_v54 }
 0x55c   : > { %v9078_v10 = vpop.f32.mrb[116].mxu0  ;;  %9970 = vmatprep.subr.msk.bf16.mxu0 %vm863_vm1, %v2688_v21  ;;  %9972 = vmatprep.subr.msk.bf16.mxu1 %vm863_vm1, %v2690_v47 }
 0x55d   : > { %v2420_v19 = vpop.f32.mrb[117].mxu0 }
 0x55e   : > { %v9079_v13 = vpop.f32.mrb[118].mxu0 }
 0x55f   : > { %v2692_v5 = vpack.c.bf16 %v9079_v13, %v9078_v10  ;;  %v2423_v8 = vpop.f32.mrb[119].mxu0  ;;  %v13653_v10 = vpack.c.bf16 %v11467_v42, %v11465_v11 }
 0x560   : > { %v2691_v50 = vpack.c.bf16 %v2423_v8, %v2420_v19  ;;  %v13654_v19 = vpack.c.bf16 %v11480_v33, %v11474_v38  ;;  %v13656_v38 = vpack.c.bf16 %v11511_v36, %v11505_v26  ;;  %v13658_v36 = vpack.c.bf16 %v11499_v20, %v11493_v39 }
 0x561   : > { %v13660_v39 = vpack.c.bf16 %v11535_v60, %v11529_v51 }
 0x562   : > { %v2825_v6 = vsel %vm863_vm1, %v2691_v50, 0 }
 0x563   : > { %9137 = vmatpush3.bf16.xpose.msra.mxu0 %v2739_v45  ;;  %9149 = vmatpush3.bf16.xpose.msra.mxu1 %v2822_v48  ;;  %v13655_v48 = vpack.c.bf16 %v11476_v40, %v11472_v24  ;;  %v13657_v40 = vpack.c.bf16 %v11486_v12, %v11484_v59 }
 0x564   : > { %v9082_v52 = vpop.f32.mrb[120].mxu0  ;;  %9973 = vmatprep.subr.msk.bf16.mxu1 %vm863_vm1, %v2691_v50  ;;  %v2828_v50 = vsel %vm863_vm1, %v2692_v5, 0 }
 0x565   : > { %v2436_v37 = vpop.f32.mrb[121].mxu0 }
 0x566   : > { %v9083_v16 = vpop.f32.mrb[122].mxu0 }
 0x567   : > { %v2694_v58 = vpack.c.bf16 %v9083_v16, %v9082_v52  ;;  %v2439_v34 = vpop.f32.mrb[123].mxu0 }
 0x568   : > { %v2693_v4 = vpack.c.bf16 %v2439_v34, %v2436_v37 }
 0x569   : > { %v2911_v45 = vsel %vm863_vm1, %v2694_v58, 0 }
 0x56a   : > { %v2908_v54 = vsel %vm863_vm1, %v2693_v4, 0  ;;  %9139 = vmatmul.mubr.msk.bf16.vlgmr.msra.gmra.mrb[136].mxu0 %vm863_vm1, %v13653_v10  ;;  %9975 = vmatprep.subr.msk.bf16.mxu0 %vm863_vm1, %v2693_v4 }
 0x56b   : > { %9151 = vmatpush3.bf16.xpose.msra.mxu1 %v2825_v6  ;;  %9163 = vmatpush3.bf16.xpose.msra.mxu0 %v2908_v54 }
 0x56c   : > { %v9086_v47 = vpop.f32.mrb[124].mxu0  ;;  %9974 = vmatprep.subr.msk.bf16.mxu1 %vm863_vm1, %v2692_v5  ;;  %9976 = vmatprep.subr.msk.bf16.mxu0 %vm863_vm1, %v2694_v58 }
 0x56d   : > { %v2452_v21 = vpop.f32.mrb[125].mxu0  ;;  %9142 = vmatprep.mubr.msk.bf16.mxu0 %vm863_vm1, %v13654_v19  ;;  %v13661_v19 = vpack.c.bf16 %v11507_v29, %v11503_v15  ;;  %v13663_v15 = vpack.c.bf16 %v11519_v62, %v11515_v23  ;;  %v13664_v29 = vpack.c.bf16 %v11531_v43, %v11527_v27  ;;  %v13665_v23 = vpack.c.bf16 %v11547_v28, %v11541_v46 }
 0x56e   : > { %v9087_v13 = vpop.f32.mrb[126].mxu0 }
 0x56f   : > { %v2696_v8 = vpack.c.bf16 %v9087_v13, %v9086_v47  ;;  %v2455_v11 = vpop.f32.mrb[127].mxu0 }
 0x570   : > { %v2695_v42 = vpack.c.bf16 %v2455_v11, %v2452_v21  ;;  %v13659_v21 = vpack.c.bf16 %v11495_v30, %v11491_v3  ;;  %v13662_v3 = vpack.c.bf16 %v11523_v55, %v11517_v31 }
 0x571   : > { %v2917_v10 = vsel %vm863_vm1, %v2696_v8, 0 }
 0x572   : > { %9143 = vmatmul.mubr.msk.bf16.gmra.mrb[140].mxu0 %vm863_vm1, %v13655_v48  ;;  %v2914_v34 = vsel %vm863_vm1, %v2695_v42, 0 }
 0x573   : > { %9153 = vmatpush3.bf16.xpose.msra.mxu1 %v2828_v50  ;;  %9165 = vmatpush3.bf16.xpose.msra.mxu0 %v2911_v45 }
 0x574   : > { %v9090_v52 = vpop.f32.mrb[128].mxu0  ;;  %9977 = vmatprep.subr.msk.bf16.mxu0 %vm863_vm1, %v2695_v42  ;;  %9170 = vmatprep.mubr.msk.bf16.mxu0 %vm863_vm1, %v13656_v38 }
 0x575   : > { %v2468_v33 = vpop.f32.mrb[129].mxu0 }
 0x576   : > { %v9091_v37 = vpop.f32.mrb[130].mxu0 }
 0x577   : > { %v2698_v5 = vpack.c.bf16 %v9091_v37, %v9090_v52  ;;  %v2471_v16 = vpop.f32.mrb[131].mxu0 }
 0x578   : > { %v2697_v58 = vpack.c.bf16 %v2471_v16, %v2468_v33 }
 0x579   : > { %v3000_v47 = vsel %vm863_vm1, %v2698_v5, 0 }
 0x57a   : > { %v2997_v24 = vsel %vm863_vm1, %v2697_v58, 0  ;;  %9155 = vmatmul.mubr.msk.bf16.vlgmr.msra.gmra.mrb[152].mxu1 %vm863_vm1, %v13657_v40  ;;  %9979 = vmatprep.subr.msk.bf16.mxu1 %vm863_vm1, %v2697_v58 }
 0x57b   : > { %9167 = vmatpush3.bf16.xpose.msra.mxu0 %v2914_v34  ;;  %9179 = vmatpush3.bf16.xpose.msra.mxu1 %v2997_v24 }
 0x57c   : > { %9978 = vmatprep.subr.msk.bf16.mxu0 %vm863_vm1, %v2696_v8  ;;  %9980 = vmatprep.subr.msk.bf16.mxu1 %vm863_vm1, %v2698_v5  ;;  %v9094_v26 = vpop.f32.mrb[132].mxu0 }
 0x57d   : > { %9158 = vmatprep.mubr.msk.bf16.mxu1 %vm863_vm1, %v13658_v36  ;;  %v2484_v4 = vpop.f32.mrb[133].mxu0 }
 0x57e   : > { %v9095_v6 = vpop.f32.mrb[134].mxu0 }
 0x57f   : > { %v2700_v54 = vpack.c.bf16 %v9095_v6, %v9094_v26  ;;  %v2487_v59 = vpop.f32.mrb[135].mxu0 }
 0x580   : > { %v2699_v12 = vpack.c.bf16 %v2487_v59, %v2484_v4 }
 0x581   : > { %v3006_v30 = vsel %vm863_vm1, %v2700_v54, 0 }
 0x582   : > { %9159 = vmatmul.mubr.msk.bf16.gmra.mrb[156].mxu1 %vm863_vm1, %v13659_v21  ;;  %v3003_v20 = vsel %vm863_vm1, %v2699_v12, 0 }
 0x583   : > { %9169 = vmatpush3.bf16.xpose.msra.mxu0 %v2917_v10  ;;  %9181 = vmatpush3.bf16.xpose.msra.mxu1 %v3000_v47 }
 0x584   : > { %9981 = vmatprep.subr.msk.bf16.mxu1 %vm863_vm1, %v2699_v12  ;;  %9186 = vmatprep.mubr.msk.bf16.mxu1 %vm863_vm1, %v13660_v39 }
 0x585   : > { %9194 = vmatprep.subr.bf16.mxu0 %v11553_v32 }
 0x58a   : > { %9171 = vmatmul.mubr.msk.bf16.vlgmr.msra.gmra.mrb[144].mxu0 %vm863_vm1, %v13661_v19 }
 0x58b   : > { %9183 = vmatpush3.bf16.xpose.msra.mxu1 %v3003_v20  ;;  %9174 = vmatprep.mubr.msk.bf16.mxu0 %vm863_vm1, %v13662_v3 }
 0x58c   : > { %9982 = vmatprep.subr.msk.bf16.mxu1 %vm863_vm1, %v2700_v54  ;;  %9195 = vmatpush3.bf16.msra.mxu0 %v11553_v32 }
 0x58d   : > { %9196 = vmatprep.subr.bf16.mxu0 %v11551_v61 }
 0x590   : > { %9197 = vmatpush3.bf16.msra.mxu0 %v11551_v61 }
 0x591   : > { %9198 = vmatprep.subr.bf16.mxu0 %v11557_v1 }
 0x592   : > { %9175 = vmatmul.mubr.msk.bf16.gmra.mrb[148].mxu0 %vm863_vm1, %v13663_v15 }
 0x593   : > { %9185 = vmatpush3.bf16.xpose.msra.mxu1 %v3006_v30 }
 0x594   : > { %9199 = vmatpush3.bf16.msra.mxu0 %v11557_v1  ;;  %9210 = vmatprep.subr.bf16.mxu1 %v11561_v63 }
 0x595   : > { %9200 = vmatprep.subr.bf16.mxu0 %v11555_v57 }
 0x598   : > { %9201 = vmatpush3.bf16.msra.mxu0 %v11555_v57  ;;  %v13666_v57 = vpack.c.bf16 %v11543_v41, %v11539_v56 }
 0x599   : > { %9226 = vmatprep.subr.bf16.mxu0 %v11569_v14 }
 0x59a   : > { %9187 = vmatmul.mubr.msk.bf16.vlgmr.msra.gmra.mrb[160].mxu1 %vm863_vm1, %v13664_v29 }
 0x59b   : > { %9190 = vmatprep.mubr.msk.bf16.mxu1 %vm863_vm1, %v13665_v23  ;;  %9211 = vmatpush3.bf16.msra.mxu1 %v11561_v63  ;;  %v9128_v63 = vpop.f32.mrb[148].mxu1 }
 0x59c   : > { %9212 = vmatprep.subr.bf16.mxu1 %v11559_v7  ;;  %v2654_v31 = vpop.f32.mrb[149].mxu1 }
 0x59d   : > { %v9129_v62 = vpop.f32.mrb[150].mxu1 }
 0x59e   : > { %v11685_v55 = vpack.c.bf16 %v9129_v62, %v9128_v63  ;;  %v2657_v27 = vpop.f32.mrb[151].mxu1 }
 0x59f   : > { %9213 = vmatpush3.bf16.msra.mxu1 %v11559_v7  ;;  %v11687_v51 = vpack.c.bf16 %v2657_v27, %v2654_v31 }
 0x5a0   : > { %9214 = vmatprep.subr.bf16.mxu1 %v11565_v17 }
 0x5a2   : > { %9191 = vmatmul.mubr.msk.bf16.gmra.mrb[164].mxu1 %vm863_vm1, %v13666_v57 }
 0x5a3   : > { %9215 = vmatpush3.bf16.msra.mxu1 %v11565_v17 }
 0x5a4   : > { %9216 = vmatprep.subr.bf16.mxu1 %v11563_v49 }
 0x5a7   : > { %9217 = vmatpush3.bf16.msra.mxu1 %v11563_v49 }
 0x5a8   : > { %9242 = vmatprep.subr.bf16.mxu1 %v11580_v2 }
 0x63d   : > { %v11689_v43 = vpop.f32.mrb[136].mxu0 }
 0x63e   : > { %v11691_v60 = vpop.f32.mrb[137].mxu0  ;;  %v3079_v1 = vsel %vm1220_vm2, %v11689_v43, -inf }
 0x63f   : > { %v11693_v56 = vpop.f32.mrb[138].mxu0  ;;  %v3073_v17 = vsel %vm1220_vm2, %v11691_v60, -inf }
 0x640   : > { %3074 = vmax.xlane.f32.xlu0 %v3073_v17  ;;  %v11697_v46 = vpop.f32.mrb[139].mxu0  ;;  %v3082_v7 = vsel %vm1220_vm2, %v11693_v56, -inf }
 0x641   : > { %v3076_v41 = vsel %vm1220_vm2, %v11697_v46, -inf }
 0x642   : > { %3077 = vmax.xlane.f32.xlu1 %v3076_v41 }
 0x644   : > { %3080 = vmax.xlane.f32.xlu0 %v3079_v1 }
 0x645   : > { %v11703_v28 = vpop.f32.mrb[140].mxu0 }
 0x646   : > { %3083 = vmax.xlane.f32.xlu1 %v3082_v7  ;;  %v11707_v61 = vpop.f32.mrb[141].mxu0  ;;  %v3091_v11 = vsel %vm1220_vm2, %v11703_v28, -inf }
 0x647   : > { %v11709_v32 = vpop.f32.mrb[142].mxu0  ;;  %v3085_v49 = vsel %vm1220_vm2, %v11707_v61, -inf }
 0x648   : > { %3086 = vmax.xlane.f32.xlu0 %v3085_v49  ;;  %v11713_v13 = vpop.f32.mrb[143].mxu0  ;;  %v3094_v50 = vsel %vm1220_vm2, %v11709_v32, -inf }
 0x649   : > { %v3088_v8 = vsel %vm1220_vm2, %v11713_v13, -inf }
 0x64a   : > { %3089 = vmax.xlane.f32.xlu1 %v3088_v8 }
 0x64c   : > { %3092 = vmax.xlane.f32.xlu0 %v3091_v11 }
 0x64d   : > { %v11719_v42 = vpop.f32.mrb[152].mxu1 }
 0x64e   : > { %v11723_v45 = vpop.f32.mrb[153].mxu1  ;;  %3095 = vmax.xlane.f32.xlu1 %v3094_v50  ;;  %v3103_v37 = vsel %vm1220_vm2, %v11719_v42, -inf }
 0x64f   : > { %v11725_v48 = vpop.f32.mrb[154].mxu1  ;;  %v3097_v52 = vsel %vm1220_vm2, %v11723_v45, -inf }
 0x650   : > { %v11729_v38 = vpop.f32.mrb[155].mxu1  ;;  %3098 = vmax.xlane.f32.xlu0 %v3097_v52  ;;  %v3106_v16 = vsel %vm1220_vm2, %v11725_v48, -inf }
 0x651   : > { %v3100_v33 = vsel %vm1220_vm2, %v11729_v38, -inf }
 0x652   : > { %3101 = vmax.xlane.f32.xlu1 %v3100_v33 }
 0x654   : > { %3104 = vmax.xlane.f32.xlu0 %v3103_v37 }
 0x655   : > { %v11735_v5 = vpop.f32.mrb[156].mxu1 }
 0x656   : > { %v11739_v58 = vpop.f32.mrb[157].mxu1  ;;  %3107 = vmax.xlane.f32.xlu1 %v3106_v16  ;;  %v3115_v36 = vsel %vm1220_vm2, %v11735_v5, -inf }
 0x657   : > { %v11741_v34 = vpop.f32.mrb[158].mxu1  ;;  %v3109_v24 = vsel %vm1220_vm2, %v11739_v58, -inf }
 0x658   : > { %v11745_v40 = vpop.f32.mrb[159].mxu1  ;;  %3110 = vmax.xlane.f32.xlu0 %v3109_v24  ;;  %v3118_v6 = vsel %vm1220_vm2, %v11741_v34, -inf }
 0x659   : > { %v3112_v26 = vsel %vm1220_vm2, %v11745_v40, -inf }
 0x65a   : > { %3113 = vmax.xlane.f32.xlu1 %v3112_v26 }
 0x65c   : > { %3116 = vmax.xlane.f32.xlu0 %v3115_v36 }
 0x65d   : > { %v11751_v4 = vpop.f32.mrb[144].mxu0 }
 0x65e   : > { %3119 = vmax.xlane.f32.xlu1 %v3118_v6  ;;  %v11755_v54 = vpop.f32.mrb[145].mxu0  ;;  %v3127_v21 = vsel %vm1220_vm2, %v11751_v4, -inf }
 0x65f   : > { %v11757_v59 = vpop.f32.mrb[146].mxu0  ;;  %v3121_v12 = vsel %vm1220_vm2, %v11755_v54, -inf }
 0x660   : > { %3122 = vmax.xlane.f32.xlu0 %v3121_v12  ;;  %v11761_v10 = vpop.f32.mrb[147].mxu0  ;;  %v3130_v20 = vsel %vm1220_vm2, %v11757_v59, -inf }
 0x661   : > { %v3124_v47 = vsel %vm1220_vm2, %v11761_v10, -inf }
 0x662   : > { %3125 = vmax.xlane.f32.xlu1 %v3124_v47 }
 0x664   : > { %3128 = vmax.xlane.f32.xlu0 %v3127_v21 }
 0x665   : > { %v11767_v39 = vpop.f32.mrb[148].mxu0 }
 0x666   : > { %3131 = vmax.xlane.f32.xlu1 %v3130_v20  ;;  %v11771_v19 = vpop.f32.mrb[149].mxu0  ;;  %v3139_v23 = vsel %vm1220_vm2, %v11767_v39, -inf }
 0x667   : > { %v11773_v3 = vpop.f32.mrb[150].mxu0  ;;  %v3133_v30 = vsel %vm1220_vm2, %v11771_v19, -inf }
 0x668   : > { %3134 = vmax.xlane.f32.xlu0 %v3133_v30  ;;  %v11777_v15 = vpop.f32.mrb[151].mxu0  ;;  %v3142_v63 = vsel %vm1220_vm2, %v11773_v3, -inf }
 0x669   : > { %v3136_v29 = vsel %vm1220_vm2, %v11777_v15, -inf }
 0x66a   : > { %3137 = vmax.xlane.f32.xlu1 %v3136_v29 }
 0x66c   : > { %3140 = vmax.xlane.f32.xlu0 %v3139_v23 }
 0x66d   : > { %v11783_v57 = vpop.f32.mrb[160].mxu1 }
 0x66e   : > { %3143 = vmax.xlane.f32.xlu1 %v3142_v63  ;;  %v11787_v31 = vpop.f32.mrb[161].mxu1  ;;  %v3151_v1 = vsel %vm1220_vm2, %v11783_v57, -inf }
 0x66f   : > { %v11789_v62 = vpop.f32.mrb[162].mxu1  ;;  %v3145_v27 = vsel %vm1220_vm2, %v11787_v31, -inf }
 0x670   : > { %3146 = vmax.xlane.f32.xlu0 %v3145_v27  ;;  %v11793_v17 = vpop.f32.mrb[163].mxu1  ;;  %v3154_v49 = vsel %vm1220_vm2, %v11789_v62, -inf }
 0x671   : > { %v3148_v41 = vsel %vm1220_vm2, %v11793_v17, -inf }
 0x672   : > { %3149 = vmax.xlane.f32.xlu1 %v3148_v41 }
 0x674   : > { %3152 = vmax.xlane.f32.xlu0 %v3151_v1 }
 0x675   : > { %v11799_v7 = vpop.f32.mrb[164].mxu1 }
 0x676   : > { %3155 = vmax.xlane.f32.xlu1 %v3154_v49  ;;  %v11803_v8 = vpop.f32.mrb[165].mxu1  ;;  %v3163_v37 = vsel %vm1220_vm2, %v11799_v7, -inf }
 0x677   : > { %v11805_v11 = vpop.f32.mrb[166].mxu1  ;;  %v3157_v50 = vsel %vm1220_vm2, %v11803_v8, -inf }
 0x678   : > { %3158 = vmax.xlane.f32.xlu0 %v3157_v50  ;;  %v11809_v52 = vpop.f32.mrb[167].mxu1  ;;  %v3166_v16 = vsel %vm1220_vm2, %v11805_v11, -inf }
 0x679   : > { %v3160_v33 = vsel %vm1220_vm2, %v11809_v52, -inf }
 0x67a   : > { %3161 = vmax.xlane.f32.xlu1 %v3160_v33 }
 0x67c   : > { %3164 = vmax.xlane.f32.xlu0 %v3163_v37 }
 0x67e   : > { %3167 = vmax.xlane.f32.xlu1 %v3166_v16 }
 0x6cd   : > { %v3075_v24 = vpop.xlane.xlu0 %3074 }
 0x6ce   : > { %v3169_v26 = vsub.f32 %v11691_v60, %v3075_v24 }
 0x6cf   : > { %v3078_v36 = vpop.xlane.xlu1 %3077 }
 0x6d0   : > { %v3201_v6 = vmul.f32 1.442695, %v3169_v26  ;;  %v3170_v12 = vsub.f32 %v11697_v46, %v3078_v36 }
 0x6d1   : > { %v3081_v47 = vpop.xlane.xlu0 %3080 }
 0x6d2   : > { %10166 = vpow2.f32 %v3201_v6  ;;  %v3203_v21 = vmul.f32 1.442695, %v3170_v12  ;;  %v3171_v20 = vsub.f32 %v11689_v43, %v3081_v47 }
 0x6d3   : > { %v3084_v30 = vpop.xlane.xlu1 %3083 }
 0x6d4   : > { %10168 = vpow2.f32 %v3203_v21  ;;  %v3205_v29 = vmul.f32 1.442695, %v3171_v20  ;;  %v3172_v23 = vsub.f32 %v11693_v56, %v3084_v30 }
 0x6d5   : > { %v3087_v63 = vpop.xlane.xlu0 %3086 }
 0x6d6   : > { %10170 = vpow2.f32 %v3205_v29  ;;  %v3207_v27 = vmul.f32 1.442695, %v3172_v23  ;;  %v3173_v41 = vsub.f32 %v11707_v61, %v3087_v63 }
 0x6d7   : > { %v3090_v60 = vpop.xlane.xlu1 %3089 }
 0x6d8   : > { %10172 = vpow2.f32 %v3207_v27  ;;  %v3209_v1 = vmul.f32 1.442695, %v3173_v41  ;;  %v3174_v46 = vsub.f32 %v11713_v13, %v3090_v60 }
 0x6d9   : > { %v3093_v49 = vpop.xlane.xlu0 %3092 }
 0x6da   : > { %10174 = vpow2.f32 %v3209_v1  ;;  %v3211_v50 = vmul.f32 1.442695, %v3174_v46  ;;  %v3175_v43 = vsub.f32 %v11703_v28, %v3093_v49 }
 0x6db   : > { %v3096_v33 = vpop.xlane.xlu1 %3095 }
 0x6dc   : > { %v11824_v37 = vpop.eup %10166  ;;  %10176 = vpow2.f32 %v3211_v50  ;;  %v3213_v56 = vmul.f32 1.442695, %v3175_v43  ;;  %v3176_v16 = vsub.f32 %v11709_v32, %v3096_v33 }
 0x6dd   : > { %v3099_v24 = vpop.xlane.xlu0 %3098  ;;  %v3265_v61 = vsel %vm1220_vm2, %v11824_v37, 0.0 }
 0x6de   : > { %v11829_v26 = vpop.eup %10168  ;;  %10178 = vpow2.f32 %v3213_v56  ;;  %v3215_v13 = vmul.f32 1.442695, %v3176_v16  ;;  %v3177_v36 = vsub.f32 %v11723_v45, %v3099_v24  ;;  %3266 = vadd.xlane.f32.xlu0 %v3265_v61 }
 0x6df   : > { %v3102_v6 = vpop.xlane.xlu1 %3101  ;;  %v3268_v28 = vsel %vm1220_vm2, %v11829_v26, 0.0 }
 0x6e0   : > { %v11834_v12 = vpop.eup %10170  ;;  %10180 = vpow2.f32 %v3215_v13  ;;  %v3217_v47 = vmul.f32 1.442695, %v3177_v36  ;;  %v3178_v32 = vsub.f32 %v11729_v38, %v3102_v6  ;;  %3269 = vadd.xlane.f32.xlu1 %v3268_v28 }
 0x6e1   : > { %v3105_v21 = vpop.xlane.xlu0 %3104  ;;  %v3271_v20 = vsel %vm1220_vm2, %v11834_v12, 0.0 }
 0x6e2   : > { %v11839_v30 = vpop.eup %10172  ;;  %10182 = vpow2.f32 %v3217_v47  ;;  %v3219_v45 = vmul.f32 1.442695, %v3178_v32  ;;  %v3179_v29 = vsub.f32 %v11719_v42, %v3105_v21  ;;  %3272 = vadd.xlane.f32.xlu0 %v3271_v20 }
 0x6e3   : > { %v3108_v23 = vpop.xlane.xlu1 %3107  ;;  %v3274_v63 = vsel %vm1220_vm2, %v11839_v30, 0.0 }
 0x6e4   : > { %v11844_v27 = vpop.eup %10174  ;;  %10184 = vpow2.f32 %v3219_v45  ;;  %v3221_v38 = vmul.f32 1.442695, %v3179_v29  ;;  %v3180_v41 = vsub.f32 %v11725_v48, %v3108_v23  ;;  %3275 = vadd.xlane.f32.xlu1 %v3274_v63 }
 0x6e5   : > { %v3111_v60 = vpop.xlane.xlu0 %3110  ;;  %v3277_v1 = vsel %vm1220_vm2, %v11844_v27, 0.0 }
 0x6e6   : > { %v11849_v46 = vpop.eup %10176  ;;  %10186 = vpow2.f32 %v3221_v38  ;;  %v3223_v42 = vmul.f32 1.442695, %v3180_v41  ;;  %v3181_v49 = vsub.f32 %v11739_v58, %v3111_v60  ;;  %3278 = vadd.xlane.f32.xlu0 %v3277_v1 }
 0x6e7   : > { %v3114_v50 = vpop.xlane.xlu1 %3113  ;;  %v3280_v43 = vsel %vm1220_vm2, %v11849_v46, 0.0 }
 0x6e8   : > { %v11854_v33 = vpop.eup %10178  ;;  %10188 = vpow2.f32 %v3223_v42  ;;  %v3225_v48 = vmul.f32 1.442695, %v3181_v49  ;;  %v3182_v56 = vsub.f32 %v11745_v40, %v3114_v50  ;;  %3281 = vadd.xlane.f32.xlu1 %v3280_v43 }
 0x6e9   : > { %v3117_v16 = vpop.xlane.xlu0 %3116  ;;  %v3283_v24 = vsel %vm1220_vm2, %v11854_v33, 0.0 }
 0x6ea   : > { %v11859_v61 = vpop.eup %10180  ;;  %10190 = vpow2.f32 %v3225_v48  ;;  %v3227_v58 = vmul.f32 1.442695, %v3182_v56  ;;  %v3183_v13 = vsub.f32 %v11735_v5, %v3117_v16  ;;  %3284 = vadd.xlane.f32.xlu0 %v3283_v24 }
 0x6eb   : > { %v3120_v36 = vpop.xlane.xlu1 %3119  ;;  %v3286_v6 = vsel %vm1220_vm2, %v11859_v61, 0.0 }
 0x6ec   : > { %v11864_v28 = vpop.eup %10182  ;;  %10192 = vpow2.f32 %v3227_v58  ;;  %v3229_v40 = vmul.f32 1.442695, %v3183_v13  ;;  %v3184_v47 = vsub.f32 %v11741_v34, %v3120_v36  ;;  %3287 = vadd.xlane.f32.xlu1 %v3286_v6 }
 0x6ed   : > { %v3123_v32 = vpop.xlane.xlu0 %3122  ;;  %v3289_v21 = vsel %vm1220_vm2, %v11864_v28, 0.0 }
 0x6ee   : > { %v11869_v20 = vpop.eup %10184  ;;  %10194 = vpow2.f32 %v3229_v40  ;;  %v3231_v5 = vmul.f32 1.442695, %v3184_v47  ;;  %v3185_v45 = vsub.f32 %v11755_v54, %v3123_v32  ;;  %3290 = vadd.xlane.f32.xlu0 %v3289_v21 }
 0x6ef   : > { %v3126_v29 = vpop.xlane.xlu1 %3125  ;;  %v3292_v23 = vsel %vm1220_vm2, %v11869_v20, 0.0 }
 0x6f0   : > { %v11874_v63 = vpop.eup %10186  ;;  %10196 = vpow2.f32 %v3231_v5  ;;  %v3233_v34 = vmul.f32 1.442695, %v3185_v45  ;;  %v3186_v38 = vsub.f32 %v11761_v10, %v3126_v29  ;;  %3293 = vadd.xlane.f32.xlu1 %v3292_v23 }
 0x6f1   : > { %v3129_v41 = vpop.xlane.xlu0 %3128  ;;  %v3295_v60 = vsel %vm1220_vm2, %v11874_v63, 0.0 }
 0x6f2   : > { %v11879_v1 = vpop.eup %10188  ;;  %10198 = vpow2.f32 %v3233_v34  ;;  %v3235_v54 = vmul.f32 1.442695, %v3186_v38  ;;  %v3187_v42 = vsub.f32 %v11751_v4, %v3129_v41  ;;  %3296 = vadd.xlane.f32.xlu0 %v3295_v60 }
 0x6f3   : > { %v3132_v49 = vpop.xlane.xlu1 %3131  ;;  %v3298_v50 = vsel %vm1220_vm2, %v11879_v1, 0.0 }
 0x6f4   : > { %v11884_v43 = vpop.eup %10190  ;;  %10200 = vpow2.f32 %v3235_v54  ;;  %v3237_v10 = vmul.f32 1.442695, %v3187_v42  ;;  %v3188_v48 = vsub.f32 %v11757_v59, %v3132_v49  ;;  %3299 = vadd.xlane.f32.xlu1 %v3298_v50 }
 0x6f5   : > { %v3135_v56 = vpop.xlane.xlu0 %3134  ;;  %v3301_v16 = vsel %vm1220_vm2, %v11884_v43, 0.0 }
 0x6f6   : > { %v11889_v24 = vpop.eup %10192  ;;  %10202 = vpow2.f32 %v3237_v10  ;;  %v3239_v4 = vmul.f32 1.442695, %v3188_v48  ;;  %v3189_v58 = vsub.f32 %v11771_v19, %v3135_v56  ;;  %3302 = vadd.xlane.f32.xlu0 %v3301_v16 }
 0x6f7   : > { %v3138_v13 = vpop.xlane.xlu1 %3137  ;;  %v3304_v36 = vsel %vm1220_vm2, %v11889_v24, 0.0 }
 0x6f8   : > { %v11894_v6 = vpop.eup %10194  ;;  %10204 = vpow2.f32 %v3239_v4  ;;  %v3241_v59 = vmul.f32 1.442695, %v3189_v58  ;;  %v3190_v40 = vsub.f32 %v11777_v15, %v3138_v13  ;;  %3305 = vadd.xlane.f32.xlu1 %v3304_v36 }
 0x6f9   : > { %v3141_v47 = vpop.xlane.xlu0 %3140  ;;  %v3307_v32 = vsel %vm1220_vm2, %v11894_v6, 0.0 }
 0x6fa   : > { %v11899_v21 = vpop.eup %10196  ;;  %10206 = vpow2.f32 %v3241_v59  ;;  %v3243_v19 = vmul.f32 1.442695, %v3190_v40  ;;  %v3191_v5 = vsub.f32 %v11767_v39, %v3141_v47  ;;  %3308 = vadd.xlane.f32.xlu0 %v3307_v32 }
 0x6fb   : > { %v3144_v45 = vpop.xlane.xlu1 %3143  ;;  %v3310_v29 = vsel %vm1220_vm2, %v11899_v21, 0.0 }
 0x6fc   : > { %v11904_v23 = vpop.eup %10198  ;;  %10208 = vpow2.f32 %v3243_v19  ;;  %v3245_v15 = vmul.f32 1.442695, %v3191_v5  ;;  %v3192_v34 = vsub.f32 %v11773_v3, %v3144_v45  ;;  %3311 = vadd.xlane.f32.xlu1 %v3310_v29 }
 0x6fd   : > { %v3147_v38 = vpop.xlane.xlu0 %3146  ;;  %v3313_v41 = vsel %vm1220_vm2, %v11904_v23, 0.0 }
 0x6fe   : > { %v11909_v60 = vpop.eup %10200  ;;  %10210 = vpow2.f32 %v3245_v15  ;;  %v3247_v39 = vmul.f32 1.442695, %v3192_v34  ;;  %v3193_v54 = vsub.f32 %v11787_v31, %v3147_v38  ;;  %3314 = vadd.xlane.f32.xlu0 %v3313_v41 }
 0x6ff   : > { %v3150_v42 = vpop.xlane.xlu1 %3149  ;;  %v3316_v49 = vsel %vm1220_vm2, %v11909_v60, 0.0 }
 0x700   : > { %v11914_v50 = vpop.eup %10202  ;;  %10212 = vpow2.f32 %v3247_v39  ;;  %v3249_v3 = vmul.f32 1.442695, %v3193_v54  ;;  %v3194_v10 = vsub.f32 %v11793_v17, %v3150_v42  ;;  %3317 = vadd.xlane.f32.xlu1 %v3316_v49 }
 0x701   : > { %v3153_v48 = vpop.xlane.xlu0 %3152  ;;  %v3319_v56 = vsel %vm1220_vm2, %v11914_v50, 0.0 }
 0x702   : > { %v11919_v16 = vpop.eup %10204  ;;  %10214 = vpow2.f32 %v3249_v3  ;;  %v3251_v31 = vmul.f32 1.442695, %v3194_v10  ;;  %v3195_v4 = vsub.f32 %v11783_v57, %v3153_v48  ;;  %3320 = vadd.xlane.f32.xlu0 %v3319_v56 }
 0x703   : > { %v3156_v58 = vpop.xlane.xlu1 %3155  ;;  %v3322_v13 = vsel %vm1220_vm2, %v11919_v16, 0.0 }
 0x704   : > { %v11924_v36 = vpop.eup %10206  ;;  %10216 = vpow2.f32 %v3251_v31  ;;  %v3253_v17 = vmul.f32 1.442695, %v3195_v4  ;;  %v3196_v59 = vsub.f32 %v11789_v62, %v3156_v58  ;;  %3323 = vadd.xlane.f32.xlu1 %v3322_v13 }
 0x705   : > { %v3159_v40 = vpop.xlane.xlu0 %3158  ;;  %v3325_v47 = vsel %vm1220_vm2, %v11924_v36, 0.0 }
 0x706   : > { %v11929_v32 = vpop.eup %10208  ;;  %10218 = vpow2.f32 %v3253_v17  ;;  %v3255_v57 = vmul.f32 1.442695, %v3196_v59  ;;  %v3197_v19 = vsub.f32 %v11803_v8, %v3159_v40  ;;  %3326 = vadd.xlane.f32.xlu0 %v3325_v47 }
 0x707   : > { %v3162_v5 = vpop.xlane.xlu1 %3161  ;;  %v3328_v45 = vsel %vm1220_vm2, %v11929_v32, 0.0 }
 0x708   : > { %v11934_v29 = vpop.eup %10210  ;;  %10220 = vpow2.f32 %v3255_v57  ;;  %v3257_v62 = vmul.f32 1.442695, %v3197_v19  ;;  %v3198_v15 = vsub.f32 %v11809_v52, %v3162_v5  ;;  %3329 = vadd.xlane.f32.xlu1 %v3328_v45 }
 0x709   : > { %v3165_v34 = vpop.xlane.xlu0 %3164  ;;  %v3331_v38 = vsel %vm1220_vm2, %v11934_v29, 0.0 }
 0x70a   : > { %v11939_v41 = vpop.eup %10212  ;;  %10222 = vpow2.f32 %v3257_v62  ;;  %v3259_v8 = vmul.f32 1.442695, %v3198_v15  ;;  %v3199_v39 = vsub.f32 %v11799_v7, %v3165_v34  ;;  %3332 = vadd.xlane.f32.xlu0 %v3331_v38 }
 0x70b   : > { %v3168_v54 = vpop.xlane.xlu1 %3167  ;;  %v3334_v42 = vsel %vm1220_vm2, %v11939_v41, 0.0 }
 0x70c   : > { %v11944_v49 = vpop.eup %10214  ;;  %10224 = vpow2.f32 %v3259_v8  ;;  %v3261_v52 = vmul.f32 1.442695, %v3199_v39  ;;  %v3200_v3 = vsub.f32 %v11805_v11, %v3168_v54  ;;  %3335 = vadd.xlane.f32.xlu1 %v3334_v42 }
 0x70d   : > { %v3337_v10 = vsel %vm1220_vm2, %v11944_v49, 0.0 }
 0x70e   : > { %v11949_v48 = vpop.eup %10216  ;;  %10226 = vpow2.f32 %v3261_v52  ;;  %v3263_v56 = vmul.f32 1.442695, %v3200_v3  ;;  %3338 = vadd.xlane.f32.xlu0 %v3337_v10 }
 0x70f   : > { %v3340_v7 = vsel %vm1220_vm2, %v11949_v48, 0.0 }
 0x710   : > { %v11953_v31 = vpop.eup %10218  ;;  %10228 = vpow2.f32 %v3263_v56  ;;  %3341 = vadd.xlane.f32.xlu1 %v3340_v7 }
 0x711   : > { %v3343_v4 = vsel %vm1220_vm2, %v11953_v31, 0.0 }
 0x712   : > { %v11957_v11 = vpop.eup %10220  ;;  %3344 = vadd.xlane.f32.xlu0 %v3343_v4 }
 0x713   : > { %v3346_v58 = vsel %vm1220_vm2, %v11957_v11, 0.0 }
 0x714   : > { %v11961_v13 = vpop.eup %10222  ;;  %3347 = vadd.xlane.f32.xlu1 %v3346_v58 }
 0x715   : > { %v3349_v17 = vsel %vm1220_vm2, %v11961_v13, 0.0 }
 0x716   : > { %v11965_v59 = vpop.eup %10224  ;;  %3350 = vadd.xlane.f32.xlu0 %v3349_v17 }
 0x717   : > { %v3352_v40 = vsel %vm1220_vm2, %v11965_v59, 0.0 }
 0x718   : > { %v11969_v47 = vpop.eup %10226  ;;  %3353 = vadd.xlane.f32.xlu1 %v3352_v40 }
 0x719   : > { %v3355_v57 = vsel %vm1220_vm2, %v11969_v47, 0.0 }
 0x71a   : > { %v11973_v19 = vpop.eup %10228  ;;  %3356 = vadd.xlane.f32.xlu0 %v3355_v57 }
 0x71b   : > { %v3358_v5 = vsel %vm1220_vm2, %v11973_v19, 0.0 }
 0x71c   : > { %3359 = vadd.xlane.f32.xlu1 %v3358_v5 }
 0x76b   : > { %v3267_v45 = vpop.xlane.xlu0 %3266 }
 0x76c   : > { %10230 = vrcp.f32 %v3267_v45 }
 0x76d   : > { %v3270_v62 = vpop.xlane.xlu1 %3269 }
 0x76e   : > { %10232 = vrcp.f32 %v3270_v62 }
 0x76f   : > { %v3273_v15 = vpop.xlane.xlu0 %3272 }
 0x770   : > { %10234 = vrcp.f32 %v3273_v15 }
 0x771   : > { %v3276_v34 = vpop.xlane.xlu1 %3275 }
 0x772   : > { %10236 = vrcp.f32 %v3276_v34 }
 0x773   : > { %v3279_v38 = vpop.xlane.xlu0 %3278 }
 0x774   : > { %10238 = vrcp.f32 %v3279_v38 }
 0x775   : > { %v3282_v8 = vpop.xlane.xlu1 %3281 }
 0x776   : > { %v10231_v39 = vpop.eup %10230  ;;  %10240 = vrcp.f32 %v3282_v8 }
 0x777   : > { %v3285_v54 = vpop.xlane.xlu0 %3284  ;;  %v3393_v3 = vmul.f32 %v10231_v39, %v11824_v37 }
 0x778   : > { %v10233_v42 = vpop.eup %10232  ;;  %10242 = vrcp.f32 %v3285_v54 }
 0x779   : > { %v3288_v52 = vpop.xlane.xlu1 %3287  ;;  %v3394_v10 = vmul.f32 %v10233_v42, %v11829_v26 }
 0x77a   : > { %v10235_v56 = vpop.eup %10234  ;;  %10244 = vrcp.f32 %v3288_v52 }
 0x77b   : > { %v3291_v7 = vpop.xlane.xlu0 %3290  ;;  %v3425_v4 = vpack.c.bf16 %v3394_v10, %v3393_v3  ;;  %v3395_v17 = vmul.f32 %v10235_v56, %v11834_v12 }
 0x77c   : > { %v10237_v58 = vpop.eup %10236  ;;  %10246 = vrcp.f32 %v3291_v7 }
 0x77d   : > { %v3396_v40 = vmul.f32 %v10237_v58, %v11839_v30  ;;  %9202 = vmatprep.mubr.msk.bf16.mxu0 %vm1220_vm2, %v3425_v4  ;;  %v3294_v57 = vpop.xlane.xlu1 %3293 }
 0x77e   : > { %v10239_v5 = vpop.eup %10238  ;;  %10248 = vrcp.f32 %v3294_v57 }
 0x77f   : > { %v3426_v45 = vpack.c.bf16 %v3396_v40, %v3395_v17  ;;  %v3297_v62 = vpop.xlane.xlu0 %3296  ;;  %v3397_v15 = vmul.f32 %v10239_v5, %v11844_v27 }
 0x780   : > { %v10241_v37 = vpop.eup %10240  ;;  %10250 = vrcp.f32 %v3297_v62 }
 0x781   : > { %9203 = vmatmul.mubr.msk.bf16.vlgmr.msra.gmra.mrb[152].mxu0 %vm1220_vm2, %v3426_v45  ;;  %v3300_v26 = vpop.xlane.xlu1 %3299  ;;  %v3398_v34 = vmul.f32 %v10241_v37, %v11849_v46 }
 0x782   : > { %v10243_v38 = vpop.eup %10242  ;;  %9227 = vmatpush3.bf16.msra.mxu0 %v11569_v14  ;;  %10252 = vrcp.f32 %v3300_v26 }
 0x783   : > { %9228 = vmatprep.subr.bf16.mxu0 %v11567_v0  ;;  %v3303_v12 = vpop.xlane.xlu0 %3302  ;;  %v3427_v30 = vpack.c.bf16 %v3398_v34, %v3397_v15  ;;  %v3399_v54 = vmul.f32 %v10243_v38, %v11854_v33 }
 0x784   : > { %v10245_v8 = vpop.eup %10244  ;;  %10254 = vrcp.f32 %v3303_v12 }
 0x785   : > { %9206 = vmatprep.mubr.msk.bf16.mxu0 %vm1220_vm2, %v3427_v30  ;;  %v3306_v39 = vpop.xlane.xlu1 %3305  ;;  %v3400_v42 = vmul.f32 %v10245_v8, %v11859_v61 }
 0x786   : > { %v10247_v27 = vpop.eup %10246  ;;  %9229 = vmatpush3.bf16.msra.mxu0 %v11567_v0  ;;  %10256 = vrcp.f32 %v3306_v39 }
 0x787   : > { %9230 = vmatprep.subr.bf16.mxu0 %v11573_v9  ;;  %v3309_v14 = vpop.xlane.xlu0 %3308  ;;  %v3428_v46 = vpack.c.bf16 %v3400_v42, %v3399_v54  ;;  %v3401_v10 = vmul.f32 %v10247_v27, %v11864_v28 }
 0x788   : > { %v10249_v52 = vpop.eup %10248  ;;  %10258 = vrcp.f32 %v3309_v14 }
 0x789   : > { %9207 = vmatmul.mubr.msk.bf16.gmra.mrb[156].mxu0 %vm1220_vm2, %v3428_v46  ;;  %v3312_v3 = vpop.xlane.xlu1 %3311  ;;  %v3402_v56 = vmul.f32 %v10249_v52, %v11869_v20 }
 0x78a   : > { %v10251_v33 = vpop.eup %10250  ;;  %9231 = vmatpush3.bf16.msra.mxu0 %v11573_v9  ;;  %10260 = vrcp.f32 %v3312_v3 }
 0x78b   : > { %9232 = vmatprep.subr.bf16.mxu0 %v11571_v53  ;;  %v3315_v0 = vpop.xlane.xlu0 %3314  ;;  %v3429_v61 = vpack.c.bf16 %v3402_v56, %v3401_v10  ;;  %v3403_v4 = vmul.f32 %v10251_v33, %v11874_v63 }
 0x78c   : > { %v10253_v7 = vpop.eup %10252  ;;  %10262 = vrcp.f32 %v3315_v0 }
 0x78d   : > { %v3404_v58 = vmul.f32 %v10253_v7, %v11879_v1  ;;  %9218 = vmatprep.mubr.msk.bf16.mxu1 %vm1220_vm2, %v3429_v61  ;;  %v3318_v17 = vpop.xlane.xlu1 %3317 }
 0x78e   : > { %v10255_v28 = vpop.eup %10254  ;;  %9233 = vmatpush3.bf16.msra.mxu0 %v11571_v53  ;;  %10264 = vrcp.f32 %v3318_v17 }
 0x78f   : > { %v3430_v20 = vpack.c.bf16 %v3404_v58, %v3403_v4  ;;  %v3321_v9 = vpop.xlane.xlu0 %3320  ;;  %v3405_v5 = vmul.f32 %v10255_v28, %v11884_v43 }
 0x790   : > { %v10257_v40 = vpop.eup %10256  ;;  %10266 = vrcp.f32 %v3321_v9 }
 0x791   : > { %9219 = vmatmul.mubr.msk.bf16.vlgmr.msra.gmra.mrb[168].mxu1 %vm1220_vm2, %v3430_v20  ;;  %v3324_v57 = vpop.xlane.xlu1 %3323  ;;  %v3406_v63 = vmul.f32 %v10257_v40, %v11889_v24 }
 0x792   : > { %v10259_v45 = vpop.eup %10258  ;;  %9243 = vmatpush3.bf16.msra.mxu1 %v11580_v2  ;;  %10268 = vrcp.f32 %v3324_v57 }
 0x793   : > { %9244 = vmatprep.subr.bf16.mxu1 %v11578_v44  ;;  %v3327_v1 = vpop.xlane.xlu0 %3326  ;;  %v3431_v53 = vpack.c.bf16 %v3406_v63, %v3405_v5  ;;  %v3407_v26 = vmul.f32 %v10259_v45, %v11894_v6 }
 0x794   : > { %v10261_v62 = vpop.eup %10260  ;;  %10270 = vrcp.f32 %v3327_v1 }
 0x795   : > { %9222 = vmatprep.mubr.msk.bf16.mxu1 %vm1220_vm2, %v3431_v53  ;;  %v3330_v37 = vpop.xlane.xlu1 %3329  ;;  %v3408_v15 = vmul.f32 %v10261_v62, %v11899_v21  ;;  %v13667_v53 = vld [vmem:[#allocation8_spill] sm:$0xff]  ;;  %v13668_v62 = vld [vmem:[#allocation10_spill] sm:$0xff] }
 0x796   : > { %v10263_v43 = vpop.eup %10262  ;;  %9245 = vmatpush3.bf16.msra.mxu1 %v11578_v44  ;;  %10272 = vrcp.f32 %v3330_v37  ;;  %v13669_v37 = vld [vmem:[#allocation12_spill] sm:$0xff] }
 0x797   : > { %9246 = vmatprep.subr.bf16.mxu1 %v11687_v51  ;;  %v3333_v2 = vpop.xlane.xlu0 %3332  ;;  %v3432_v24 = vpack.c.bf16 %v3408_v15, %v3407_v26  ;;  %v3409_v12 = vmul.f32 %v10263_v43, %v11904_v23  ;;  %v13670_v26 = vld [vmem:[#allocation13_spill] sm:$0xff]  ;;  %v13671_v15 = vld [vmem:[#allocation2_spill] sm:$0xff]  ;;  %v13672_v43 = vld [vmem:[#allocation3_spill] sm:$0xff] }
 0x798   : > { %v10265_v34 = vpop.eup %10264  ;;  %10274 = vrcp.f32 %v3333_v2  ;;  %v13673_v2 = vld [vmem:[#allocation4_spill] sm:$0xff] }
 0x799   : > { %9223 = vmatmul.mubr.msk.bf16.gmra.mrb[172].mxu1 %vm1220_vm2, %v3432_v24  ;;  %v3336_v38 = vpop.xlane.xlu1 %3335  ;;  %v3410_v30 = vmul.f32 %v10265_v34, %v11909_v60  ;;  %v10034_v24 = vld [vmem:[%s13575_s1 + $0x50] sm:$0xff]  }
 0x79a   : > { %v10267_v6 = vpop.eup %10266  ;;  %9247 = vmatpush3.bf16.msra.mxu1 %v11687_v51  ;;  %10276 = vrcp.f32 %v3336_v38 }
 0x79b   : > { %9248 = vmatprep.subr.bf16.mxu1 %v11685_v55  ;;  %v3339_v44 = vpop.xlane.xlu0 %3338  ;;  %v3433_v21 = vpack.c.bf16 %v3410_v30, %v3409_v12  ;;  %v3411_v39 = vmul.f32 %v10267_v6, %v11914_v50 }
 0x79c   : > { %v10269_v8 = vpop.eup %10268  ;;  %10278 = vrcp.f32 %v3339_v44 }
 0x79d   : > { %v3412_v54 = vmul.f32 %v10269_v8, %v11919_v16  ;;  %9234 = vmatprep.mubr.msk.bf16.mxu0 %vm1220_vm2, %v3433_v21  ;;  %v3342_v42 = vpop.xlane.xlu1 %3341  ;;  %v13674_v21 = vld [vmem:[#allocation5_spill] sm:$0xff]  ;;  %v13675_v8 = vld [vmem:[#allocation6_spill] sm:$0xff] }
 0x79e   : > { %v10271_v23 = vpop.eup %10270  ;;  %9249 = vmatpush3.bf16.msra.mxu1 %v11685_v55  ;;  %10280 = vrcp.f32 %v3342_v42 }
 0x79f   : > { %v3434_v60 = vpack.c.bf16 %v3412_v54, %v3411_v39  ;;  %v3345_v51 = vpop.xlane.xlu0 %3344  ;;  %v3413_v46 = vmul.f32 %v10271_v23, %v11924_v36 }
 0x7a0   : > { %v10273_v27 = vpop.eup %10272  ;;  %10282 = vrcp.f32 %v3345_v51 }
 0x7a1   : > { %9235 = vmatmul.mubr.msk.bf16.vlgmr.msra.gmra.mrb[160].mxu0 %vm1220_vm2, %v3434_v60  ;;  %v3348_v14 = vpop.xlane.xlu1 %3347  ;;  %v3414_v50 = vmul.f32 %v10273_v27, %v11929_v32  ;;  %v13676_v27 = vld [vmem:[#allocation7_spill] sm:$0xff] }
 0x7a2   : > { %v10275_v52 = vpop.eup %10274  ;;  %10284 = vrcp.f32 %v3348_v14  ;;  %v13677_v14 = vld [vmem:[#allocation9_spill] sm:$0xff] }
 0x7a3   : > { %v3351_v16 = vpop.xlane.xlu0 %3350  ;;  %v3435_v3 = vpack.c.bf16 %v3414_v50, %v3413_v46  ;;  %v3415_v56 = vmul.f32 %v10275_v52, %v11934_v29 }
 0x7a4   : > { %v10277_v10 = vpop.eup %10276  ;;  %10286 = vrcp.f32 %v3351_v16 }
 0x7a5   : > { %9238 = vmatprep.mubr.msk.bf16.mxu0 %vm1220_vm2, %v3435_v3  ;;  %v3354_v55 = vpop.xlane.xlu1 %3353  ;;  %v3416_v33 = vmul.f32 %v10277_v10, %v11939_v41 }
 0x7a6   : > { %v10279_v0 = vpop.eup %10278  ;;  %10288 = vrcp.f32 %v3354_v55  ;;  %v13678_v55 = vld [vmem:[#allocation11_spill] sm:$0xff] }
 0x7a7   : > { %v3357_v61 = vpop.xlane.xlu0 %3356  ;;  %v3436_v7 = vpack.c.bf16 %v3416_v33, %v3415_v56  ;;  %v3417_v4 = vmul.f32 %v10279_v0, %v11944_v49 }
 0x7a8   : > { %v10281_v36 = vpop.eup %10280  ;;  %10290 = vrcp.f32 %v3357_v61 }
 0x7a9   : > { %9239 = vmatmul.mubr.msk.bf16.gmra.mrb[164].mxu0 %vm1220_vm2, %v3436_v7  ;;  %v3360_v32 = vpop.xlane.xlu1 %3359  ;;  %v3418_v58 = vmul.f32 %v10281_v36, %v11949_v48 }
 0x7aa   : > { %v10283_v17 = vpop.eup %10282  ;;  %10292 = vrcp.f32 %v3360_v32 }
 0x7ab   : > { %v3437_v28 = vpack.c.bf16 %v3418_v58, %v3417_v4  ;;  %v3419_v29 = vmul.f32 %v10283_v17, %v11953_v31 }
 0x7ac   : > { %v10285_v20 = vpop.eup %10284 }
 0x7ad   : > { %v3420_v41 = vmul.f32 %v10285_v20, %v11957_v11  ;;  %9250 = vmatprep.mubr.msk.bf16.mxu1 %vm1220_vm2, %v3437_v28 }
 0x7ae   : > { %v10287_v9 = vpop.eup %10286 }
 0x7af   : > { %v3438_v40 = vpack.c.bf16 %v3420_v41, %v3419_v29  ;;  %v3421_v5 = vmul.f32 %v10287_v9, %v11961_v13  ;;  %v8005_v13 = vld [vmem:[%s13576_s2 + $0x4] sm:$0xf] }
 0x7b0   : > { %v10289_v57 = vpop.eup %10288  ;;  %9983 = vmatprep.subr.msk.bf16.mxu0 %vm1962_vm3, %v8005_v13 }
 0x7b1   : > { %9251 = vmatmul.mubr.msk.bf16.vlgmr.msra.gmra.mrb[176].mxu1 %vm1220_vm2, %v3438_v40  ;;  %v3422_v49 = vmul.f32 %v10289_v57, %v11965_v59  ;;  %v3816_v59 = vsel %vm1962_vm3, %v8005_v13, 0 }
 0x7b2   : > { %v10291_v48 = vpop.eup %10290  ;;  %9259 = vmatpush3.bf16.msra.mxu0 %v3816_v59 }
 0x7b3   : > { %v3439_v63 = vpack.c.bf16 %v3422_v49, %v3421_v5  ;;  %v3423_v31 = vmul.f32 %v10291_v48, %v11969_v47  ;;  %v10032_v47 = vld [vmem:[%s13575_s1 + $0x30] sm:$0xff]  }
 0x7b4   : > { %v10293_v45 = vpop.eup %10292  ;;  %9326 = vmatprep.subr.bf16.mxu0 %v10032_v47 }
 0x7b5   : > { %9254 = vmatprep.mubr.msk.bf16.mxu1 %vm1220_vm2, %v3439_v63  ;;  %v3424_v11 = vmul.f32 %v10293_v45, %v11973_v19  ;;  %v10033_v19 = vld [vmem:[%s13575_s1 + $0x10] sm:$0xff]  }
 0x7b6   : > { %9292 = vmatprep.subr.bf16.mxu1 %v10033_v19 }
 0x7b7   : > { %v3440_v1 = vpack.c.bf16 %v3424_v11, %v3423_v31  ;;  %9293 = vmatpush3.bf16.msra.mxu1 %v10033_v19 }
 0x7b8   : > { %9360 = vmatprep.subr.bf16.mxu1 %v10034_v24 }
 0x7b9   : > { %9255 = vmatmul.mubr.msk.bf16.gmra.mrb[180].mxu1 %vm1220_vm2, %v3440_v1 }
 0x7ba   : > { %9294 = vmatprep.mubr.msk.bf16.mxu1 %vm265_vm0, %v10634_v18 }
 0x7c1   : > { %9295 = vmatmul.mubr.msk.bf16.vlgmr.msra.gmra.mrb[184].mxu1 %vm265_vm0, %v10639_v22 }
 0x7c2   : > { %9298 = vmatprep.mubr.msk.bf16.mxu1 %vm265_vm0, %v10644_v25  ;;  %9361 = vmatpush3.bf16.msra.mxu1 %v10034_v24 }
 0x7c9   : > { %9299 = vmatmul.mubr.msk.bf16.gmra.mrb[188].mxu1 %vm265_vm0, %v10666_v35 }
 0x7ca   : > { %9302 = vmatprep.mubr.msk.bf16.mxu1 %vm265_vm0, %v13667_v53 }
 0x7d1   : > { %9303 = vmatmul.mubr.msk.bf16.gmra.mrb[192].mxu1 %vm265_vm0, %v13668_v62 }
 0x7d2   : > { %9306 = vmatprep.mubr.msk.bf16.mxu1 %vm265_vm0, %v13669_v37 }
 0x7d9   : > { %9307 = vmatmul.mubr.msk.bf16.gmra.mrb[196].mxu1 %vm265_vm0, %v13670_v26 }
 0x7da   : > { %9310 = vmatprep.mubr.msk.bf16.mxu1 %vm265_vm0, %v13671_v15 }
 0x7e1   : > { %9311 = vmatmul.mubr.msk.bf16.gmra.mrb[200].mxu1 %vm265_vm0, %v13672_v43 }
 0x7e2   : > { %9314 = vmatprep.mubr.msk.bf16.mxu1 %vm265_vm0, %v13673_v2 }
 0x7e9   : > { %9315 = vmatmul.mubr.msk.bf16.gmra.mrb[204].mxu1 %vm265_vm0, %v13674_v21 }
 0x7ea   : > { %9318 = vmatprep.mubr.msk.bf16.mxu1 %vm265_vm0, %v13675_v8 }
 0x7f1   : > { %9319 = vmatmul.mubr.msk.bf16.gmra.mrb[208].mxu1 %vm265_vm0, %v13676_v27 }
 0x7f2   : > { %9322 = vmatprep.mubr.msk.bf16.mxu1 %vm265_vm0, %v13677_v14 }
 0x7f9   : > { %9323 = vmatmul.mubr.msk.bf16.gmra.mrb[212].mxu1 %vm265_vm0, %v13678_v55 }
 0x7fa   : > { %9362 = vmatprep.mubr.msk.bf16.mxu1 %vm265_vm0, %v10634_v18 }
 0x801   : > { %9363 = vmatmul.mubr.msk.bf16.vlgmr.msra.gmra.mrb[216].mxu1 %vm265_vm0, %v10639_v22 }
 0x802   : > { %9366 = vmatprep.mubr.msk.bf16.mxu1 %vm265_vm0, %v10644_v25 }
 0x809   : > { %9367 = vmatmul.mubr.msk.bf16.gmra.mrb[220].mxu1 %vm265_vm0, %v10666_v35 }
 0x80a   : > { %9370 = vmatprep.mubr.msk.bf16.mxu1 %vm265_vm0, %v13667_v53 }
 0x811   : > { %9371 = vmatmul.mubr.msk.bf16.gmra.mrb[224].mxu1 %vm265_vm0, %v13668_v62 }
 0x812   : > { %9374 = vmatprep.mubr.msk.bf16.mxu1 %vm265_vm0, %v13669_v37 }
 0x819   : > { %9375 = vmatmul.mubr.msk.bf16.gmra.mrb[228].mxu1 %vm265_vm0, %v13670_v26 }
 0x81a   : > { %9378 = vmatprep.mubr.msk.bf16.mxu1 %vm265_vm0, %v13671_v15 }
 0x821   : > { %9379 = vmatmul.mubr.msk.bf16.gmra.mrb[232].mxu1 %vm265_vm0, %v13672_v43 }
 0x822   : > { %9382 = vmatprep.mubr.msk.bf16.mxu1 %vm265_vm0, %v13673_v2 }
 0x829   : > { %9383 = vmatmul.mubr.msk.bf16.gmra.mrb[236].mxu1 %vm265_vm0, %v13674_v21 }
 0x82a   : > { %9386 = vmatprep.mubr.msk.bf16.mxu1 %vm265_vm0, %v13675_v8 }
 0x831   : > { %9387 = vmatmul.mubr.msk.bf16.gmra.mrb[240].mxu1 %vm265_vm0, %v13676_v27 }
 0x832   : > { %9390 = vmatprep.mubr.msk.bf16.mxu1 %vm265_vm0, %v13677_v14 }
 0x839   : > { %9391 = vmatmul.mubr.msk.bf16.gmra.mrb[244].mxu1 %vm265_vm0, %v13678_v55 }
 0x854   : > { %v9204_v34 = vpop.f32.mrb[152].mxu0 }
 0x855   : > { %v3487_v38 = vpop.f32.mrb[153].mxu0 }
 0x856   : > { %v9205_v12 = vpop.f32.mrb[154].mxu0 }
 0x857   : > { %v3750_v30 = vpack.c.bf16 %v9205_v12, %v9204_v34  ;;  %v3490_v6 = vpop.f32.mrb[155].mxu0 }
 0x858   : > { %v3749_v44 = vpack.c.bf16 %v3490_v6, %v3487_v38 }
 0x85a   : > { %9260 = vmatprep.mubr.msk.bf16.mxu0 %vm863_vm1, %v3749_v44 }
 0x85b   : > { %9261 = vmatmul.mubr.msk.bf16.vlgmr.msra.gmra.mrb[72].mxu0 %vm863_vm1, %v3750_v30 }
 0x85c   : > { %v9208_v39 = vpop.f32.mrb[156].mxu0  ;;  %9327 = vmatpush3.bf16.msra.mxu0 %v10032_v47 }
 0x85d   : > { %v3503_v54 = vpop.f32.mrb[157].mxu0 }
 0x85e   : > { %v9209_v42 = vpop.f32.mrb[158].mxu0 }
 0x85f   : > { %v3752_v23 = vpack.c.bf16 %v9209_v42, %v9208_v39  ;;  %v3506_v60 = vpop.f32.mrb[159].mxu0 }
 0x860   : > { %v3751_v51 = vpack.c.bf16 %v3506_v60, %v3503_v54 }
 0x862   : > { %9264 = vmatprep.mubr.msk.bf16.mxu0 %vm863_vm1, %v3751_v51 }
 0x863   : > { %9265 = vmatmul.mubr.msk.bf16.gmra.mrb[76].mxu0 %vm863_vm1, %v3752_v23 }
 0x864   : > { %v9220_v46 = vpop.f32.mrb[168].mxu1 }
 0x865   : > { %v3564_v50 = vpop.f32.mrb[169].mxu1 }
 0x866   : > { %v9221_v52 = vpop.f32.mrb[170].mxu1 }
 0x867   : > { %v3754_v16 = vpack.c.bf16 %v9221_v52, %v9220_v46  ;;  %v3567_v3 = vpop.f32.mrb[171].mxu1 }
 0x868   : > { %v3753_v10 = vpack.c.bf16 %v3567_v3, %v3564_v50 }
 0x86a   : > { %9268 = vmatprep.mubr.msk.bf16.mxu0 %vm863_vm1, %v3753_v10 }
 0x86b   : > { %9269 = vmatmul.mubr.msk.bf16.gmra.mrb[80].mxu0 %vm863_vm1, %v3754_v16 }
 0x86c   : > { %v9224_v56 = vpop.f32.mrb[172].mxu1 }
 0x86d   : > { %v3580_v33 = vpop.f32.mrb[173].mxu1 }
 0x86e   : > { %v9225_v0 = vpop.f32.mrb[174].mxu1 }
 0x86f   : > { %v3756_v61 = vpack.c.bf16 %v9225_v0, %v9224_v56  ;;  %v3583_v7 = vpop.f32.mrb[175].mxu1 }
 0x870   : > { %v3755_v36 = vpack.c.bf16 %v3583_v7, %v3580_v33 }
 0x872   : > { %9272 = vmatprep.mubr.msk.bf16.mxu0 %vm863_vm1, %v3755_v36 }
 0x873   : > { %9273 = vmatmul.mubr.msk.bf16.gmra.mrb[84].mxu0 %vm863_vm1, %v3756_v61 }
 0x874   : > { %v9236_v32 = vpop.f32.mrb[160].mxu0 }
 0x875   : > { %v3641_v4 = vpop.f32.mrb[161].mxu0 }
 0x876   : > { %v9237_v58 = vpop.f32.mrb[162].mxu0 }
 0x877   : > { %v3758_v17 = vpack.c.bf16 %v9237_v58, %v9236_v32  ;;  %v3644_v28 = vpop.f32.mrb[163].mxu0 }
 0x878   : > { %v3757_v20 = vpack.c.bf16 %v3644_v28, %v3641_v4 }
 0x87a   : > { %9276 = vmatprep.mubr.msk.bf16.mxu0 %vm863_vm1, %v3757_v20 }
 0x87b   : > { %9277 = vmatmul.mubr.msk.bf16.gmra.mrb[88].mxu0 %vm863_vm1, %v3758_v17 }
 0x87c   : > { %v9240_v29 = vpop.f32.mrb[164].mxu0 }
 0x87d   : > { %v3657_v41 = vpop.f32.mrb[165].mxu0 }
 0x87e   : > { %v9241_v9 = vpop.f32.mrb[166].mxu0 }
 0x87f   : > { %v3760_v40 = vpack.c.bf16 %v9241_v9, %v9240_v29  ;;  %v3660_v57 = vpop.f32.mrb[167].mxu0 }
 0x880   : > { %v3759_v5 = vpack.c.bf16 %v3660_v57, %v3657_v41 }
 0x882   : > { %9280 = vmatprep.mubr.msk.bf16.mxu0 %vm863_vm1, %v3759_v5 }
 0x883   : > { %9281 = vmatmul.mubr.msk.bf16.gmra.mrb[92].mxu0 %vm863_vm1, %v3760_v40 }
 0x884   : > { %v9252_v49 = vpop.f32.mrb[176].mxu1 }
 0x885   : > { %v3718_v48 = vpop.f32.mrb[177].mxu1 }
 0x886   : > { %v9253_v63 = vpop.f32.mrb[178].mxu1 }
 0x887   : > { %v3762_v45 = vpack.c.bf16 %v9253_v63, %v9252_v49  ;;  %v3721_v31 = vpop.f32.mrb[179].mxu1 }
 0x888   : > { %v3761_v11 = vpack.c.bf16 %v3721_v31, %v3718_v48 }
 0x88a   : > { %9284 = vmatprep.mubr.msk.bf16.mxu0 %vm863_vm1, %v3761_v11 }
 0x88b   : > { %9285 = vmatmul.mubr.msk.bf16.gmra.mrb[96].mxu0 %vm863_vm1, %v3762_v45 }
 0x88c   : > { %v9256_v1 = vpop.f32.mrb[180].mxu1 }
 0x88d   : > { %v3734_v13 = vpop.f32.mrb[181].mxu1 }
 0x88e   : > { %v9257_v59 = vpop.f32.mrb[182].mxu1 }
 0x88f   : > { %v3764_v47 = vpack.c.bf16 %v9257_v59, %v9256_v1  ;;  %v3737_v19 = vpop.f32.mrb[183].mxu1 }
 0x890   : > { %v3763_v24 = vpack.c.bf16 %v3737_v19, %v3734_v13 }
 0x892   : > { %9288 = vmatprep.mubr.msk.bf16.mxu0 %vm863_vm1, %v3763_v24 }
 0x893   : > { %9289 = vmatmul.mubr.msk.bf16.gmra.mrb[100].mxu0 %vm863_vm1, %v3764_v47 }
 0x894   : > { %9328 = vmatprep.mubr.msk.bf16.mxu0 %vm265_vm0, %v10634_v18  ;;  %v12165_v34 = vpop.f32.mrb[184].mxu1 }
 0x895   : > { %v4054_v38 = vpop.f32.mrb[185].mxu1 }
 0x896   : > { %v12167_v12 = vpop.f32.mrb[186].mxu1 }
 0x897   : > { %v4057_v6 = vpop.f32.mrb[187].mxu1 }
 0x898   : > { %v4521_v44 = vpack.c.bf16 %v4057_v6, %v4054_v38 }
 0x89b   : > { %9329 = vmatmul.mubr.msk.bf16.vlgmr.msra.gmra.mrb[168].mxu0 %vm265_vm0, %v10639_v22 }
 0x89c   : > { %9332 = vmatprep.mubr.msk.bf16.mxu0 %vm265_vm0, %v10644_v25  ;;  %v12172_v39 = vpop.f32.mrb[188].mxu1 }
 0x89d   : > { %v12174_v54 = vpop.f32.mrb[189].mxu1 }
 0x89e   : > { %v12176_v42 = vpop.f32.mrb[190].mxu1 }
 0x89f   : > { %v12180_v60 = vpop.f32.mrb[191].mxu1 }
 0x8a3   : > { %9333 = vmatmul.mubr.msk.bf16.gmra.mrb[172].mxu0 %vm265_vm0, %v10666_v35 }
 0x8a4   : > { %9336 = vmatprep.mubr.msk.bf16.mxu0 %vm265_vm0, %v13667_v53  ;;  %v12184_v46 = vpop.f32.mrb[192].mxu1 }
 0x8a5   : > { %v4086_v50 = vpop.f32.mrb[193].mxu1 }
 0x8a6   : > { %v12186_v52 = vpop.f32.mrb[194].mxu1 }
 0x8a7   : > { %v4089_v3 = vpop.f32.mrb[195].mxu1 }
 0x8a8   : > { %v4525_v10 = vpack.c.bf16 %v4089_v3, %v4086_v50 }
 0x8aa   : > { %9418 = vmatprep.mubr.msk.bf16.mxu1 %vm863_vm1, %v4525_v10 }
 0x8ab   : > { %9337 = vmatmul.mubr.msk.bf16.gmra.mrb[176].mxu0 %vm265_vm0, %v13668_v62 }
 0x8ac   : > { %9340 = vmatprep.mubr.msk.bf16.mxu0 %vm265_vm0, %v13669_v37  ;;  %v12191_v56 = vpop.f32.mrb[196].mxu1 }
 0x8ad   : > { %v12193_v33 = vpop.f32.mrb[197].mxu1 }
 0x8ae   : > { %v12195_v0 = vpop.f32.mrb[198].mxu1 }
 0x8af   : > { %v12199_v7 = vpop.f32.mrb[199].mxu1 }
 0x8b3   : > { %9341 = vmatmul.mubr.msk.bf16.gmra.mrb[180].mxu0 %vm265_vm0, %v13670_v26 }
 0x8b4   : > { %9344 = vmatprep.mubr.msk.bf16.mxu0 %vm265_vm0, %v13671_v15  ;;  %v12203_v32 = vpop.f32.mrb[200].mxu1 }
 0x8b5   : > { %v12205_v4 = vpop.f32.mrb[201].mxu1 }
 0x8b6   : > { %v12207_v58 = vpop.f32.mrb[202].mxu1 }
 0x8b7   : > { %v12211_v28 = vpop.f32.mrb[203].mxu1 }
 0x8bb   : > { %9345 = vmatmul.mubr.msk.bf16.gmra.mrb[184].mxu0 %vm265_vm0, %v13672_v43 }
 0x8bc   : > { %9348 = vmatprep.mubr.msk.bf16.mxu0 %vm265_vm0, %v13673_v2  ;;  %v12215_v29 = vpop.f32.mrb[204].mxu1 }
 0x8bd   : > { %v12217_v41 = vpop.f32.mrb[205].mxu1 }
 0x8be   : > { %v12219_v9 = vpop.f32.mrb[206].mxu1 }
 0x8bf   : > { %v12223_v57 = vpop.f32.mrb[207].mxu1 }
 0x8c3   : > { %9349 = vmatmul.mubr.msk.bf16.gmra.mrb[188].mxu0 %vm265_vm0, %v13674_v21 }
 0x8c4   : > { %9352 = vmatprep.mubr.msk.bf16.mxu0 %vm265_vm0, %v13675_v8  ;;  %v12227_v49 = vpop.f32.mrb[208].mxu1 }
 0x8c5   : > { %v12229_v48 = vpop.f32.mrb[209].mxu1 }
 0x8c6   : > { %v12231_v63 = vpop.f32.mrb[210].mxu1 }
 0x8c7   : > { %v12235_v31 = vpop.f32.mrb[211].mxu1 }
 0x8cb   : > { %9353 = vmatmul.mubr.msk.bf16.gmra.mrb[192].mxu0 %vm265_vm0, %v13676_v27 }
 0x8cc   : > { %9356 = vmatprep.mubr.msk.bf16.mxu0 %vm265_vm0, %v13677_v14  ;;  %v12239_v1 = vpop.f32.mrb[212].mxu1 }
 0x8cd   : > { %v12241_v13 = vpop.f32.mrb[213].mxu1 }
 0x8ce   : > { %v12243_v59 = vpop.f32.mrb[214].mxu1 }
 0x8cf   : > { %v12247_v19 = vpop.f32.mrb[215].mxu1 }
 0x8d3   : > { %9357 = vmatmul.mubr.msk.bf16.gmra.mrb[196].mxu0 %vm265_vm0, %v13678_v55 }
 0x8d4   : > { %9402 = vmatprep.mubr.msk.bf16.mxu0 %vm863_vm1, %v4521_v44  ;;  %v9364_v38 = vpop.f32.mrb[216].mxu1 }
 0x8d5   : > { %v4394_v6 = vpop.f32.mrb[217].mxu1 }
 0x8d6   : > { %v9365_v44 = vpop.f32.mrb[218].mxu1 }
 0x8d7   : > { %v12251_v50 = vpack.c.bf16 %v9365_v44, %v9364_v38  ;;  %v4397_v3 = vpop.f32.mrb[219].mxu1 }
 0x8d8   : > { %v12253_v10 = vpack.c.bf16 %v4397_v3, %v4394_v6 }
 0x8dc   : > { %v9368_v45 = vpop.f32.mrb[220].mxu1 }
 0x8dd   : > { %v4410_v40 = vpop.f32.mrb[221].mxu1 }
 0x8de   : > { %v9369_v5 = vpop.f32.mrb[222].mxu1 }
 0x8df   : > { %v12255_v17 = vpack.c.bf16 %v9369_v5, %v9368_v45  ;;  %v4413_v11 = vpop.f32.mrb[223].mxu1 }
 0x8e0   : > { %v12257_v47 = vpack.c.bf16 %v4413_v11, %v4410_v40 }
 0x8e4   : > { %v9372_v61 = vpop.f32.mrb[224].mxu1 }
 0x8e5   : > { %v4426_v36 = vpop.f32.mrb[225].mxu1 }
 0x8e6   : > { %v9373_v16 = vpop.f32.mrb[226].mxu1 }
 0x8e7   : > { %v12259_v24 = vpack.c.bf16 %v9373_v16, %v9372_v61  ;;  %v4429_v20 = vpop.f32.mrb[227].mxu1 }
 0x8e8   : > { %v12261_v23 = vpack.c.bf16 %v4429_v20, %v4426_v36 }
 0x8ec   : > { %v9376_v38 = vpop.f32.mrb[228].mxu1 }
 0x8ed   : > { %v4442_v44 = vpop.f32.mrb[229].mxu1 }
 0x8ee   : > { %v9377_v6 = vpop.f32.mrb[230].mxu1 }
 0x8ef   : > { %v12263_v3 = vpack.c.bf16 %v9377_v6, %v9376_v38  ;;  %v4445_v51 = vpop.f32.mrb[231].mxu1 }
 0x8f0   : > { %v12265_v30 = vpack.c.bf16 %v4445_v51, %v4442_v44 }
 0x8f4   : > { %v9380_v5 = vpop.f32.mrb[232].mxu1 }
 0x8f5   : > { %v4458_v45 = vpop.f32.mrb[233].mxu1 }
 0x8f6   : > { %v9381_v40 = vpop.f32.mrb[234].mxu1 }
 0x8f7   : > { %v12267_v11 = vpack.c.bf16 %v9381_v40, %v9380_v5  ;;  %v4461_v55 = vpop.f32.mrb[235].mxu1 }
 0x8f8   : > { %v12269_v14 = vpack.c.bf16 %v4461_v55, %v4458_v45 }
 0x8fc   : > { %v9384_v16 = vpop.f32.mrb[236].mxu1 }
 0x8fd   : > { %v4474_v36 = vpop.f32.mrb[237].mxu1 }
 0x8fe   : > { %v9385_v27 = vpop.f32.mrb[238].mxu1 }
 0x8ff   : > { %v12271_v21 = vpack.c.bf16 %v9385_v27, %v9384_v16  ;;  %v4477_v38 = vpop.f32.mrb[239].mxu1 }
 0x900   : > { %v12273_v44 = vpack.c.bf16 %v4477_v38, %v4474_v36 }
 0x904   : > { %v9388_v55 = vpop.f32.mrb[240].mxu1 }
 0x905   : > { %v4490_v40 = vpop.f32.mrb[241].mxu1 }
 0x906   : > { %v9389_v15 = vpop.f32.mrb[242].mxu1 }
 0x907   : > { %v12278_v16 = vpack.c.bf16 %v9389_v15, %v9388_v55 }
 0x96e   : > { %v9330_v61 = vpop.f32.mrb[168].mxu0 }
 0x96f   : > { %v4224_v20 = vpop.f32.mrb[169].mxu0 }
 0x970   : > { %v9331_v8 = vpop.f32.mrb[170].mxu0 }
 0x971   : > { %v4538_v6 = vpack.c.bf16 %v9331_v8, %v9330_v61  ;;  %v4227_v51 = vpop.f32.mrb[171].mxu0  ;;  %v4493_v8 = vpop.f32.mrb[243].mxu1 }
 0x972   : > { %v4537_v2 = vpack.c.bf16 %v4227_v51, %v4224_v20  ;;  %v12280_v38 = vpack.c.bf16 %v4493_v8, %v4490_v40 }
 0x973   : > { %v4585_v51 = vsel %vm863_vm1, %v4538_v6, 0 }
 0x974   : > { %v4582_v5 = vsel %vm863_vm1, %v4537_v2, 0  ;;  %9984 = vmatprep.subr.msk.bf16.mxu0 %vm863_vm1, %v4537_v2 }
 0x975   : > { %9395 = vmatpush3.bf16.xpose.msra.mxu0 %v4582_v5 }
 0x976   : > { %v9334_v45 = vpop.f32.mrb[172].mxu0  ;;  %9985 = vmatprep.subr.msk.bf16.mxu0 %vm863_vm1, %v4538_v6 }
 0x977   : > { %v4240_v43 = vpop.f32.mrb[173].mxu0 }
 0x978   : > { %v9335_v27 = vpop.f32.mrb[174].mxu0 }
 0x979   : > { %v4540_v61 = vpack.c.bf16 %v9335_v27, %v9334_v45  ;;  %v4243_v36 = vpop.f32.mrb[175].mxu0 }
 0x97a   : > { %v4539_v20 = vpack.c.bf16 %v4243_v36, %v4240_v43 }
 0x97c   : > { %v4588_v15 = vsel %vm863_vm1, %v4539_v20, 0 }
 0x97d   : > { %9397 = vmatpush3.bf16.xpose.msra.mxu0 %v4585_v51 }
 0x97e   : > { %v9338_v2 = vpop.f32.mrb[176].mxu0  ;;  %9986 = vmatprep.subr.msk.bf16.mxu0 %vm863_vm1, %v4539_v20 }
 0x97f   : > { %v4256_v5 = vpop.f32.mrb[177].mxu0 }
 0x980   : > { %v9339_v26 = vpop.f32.mrb[178].mxu0 }
 0x981   : > { %v4542_v37 = vpack.c.bf16 %v9339_v26, %v9338_v2  ;;  %v4259_v62 = vpop.f32.mrb[179].mxu0 }
 0x982   : > { %v4541_v53 = vpack.c.bf16 %v4259_v62, %v4256_v5  ;;  %v4591_v62 = vsel %vm863_vm1, %v4540_v61, 0 }
 0x983   : > { %v4674_v8 = vsel %vm863_vm1, %v4542_v37, 0 }
 0x984   : > { %v4671_v55 = vsel %vm863_vm1, %v4541_v53, 0  ;;  %9988 = vmatprep.subr.msk.bf16.mxu1 %vm863_vm1, %v4541_v53 }
 0x985   : > { %9399 = vmatpush3.bf16.xpose.msra.mxu0 %v4588_v15  ;;  %9411 = vmatpush3.bf16.xpose.msra.mxu1 %v4671_v55 }
 0x986   : > { %v9342_v43 = vpop.f32.mrb[180].mxu0  ;;  %9987 = vmatprep.subr.msk.bf16.mxu0 %vm863_vm1, %v4540_v61  ;;  %9989 = vmatprep.subr.msk.bf16.mxu1 %vm863_vm1, %v4542_v37 }
 0x987   : > { %v4272_v6 = vpop.f32.mrb[181].mxu0 }
 0x988   : > { %v9343_v45 = vpop.f32.mrb[182].mxu0 }
 0x989   : > { %v4544_v40 = vpack.c.bf16 %v9343_v45, %v9342_v43  ;;  %v4275_v27 = vpop.f32.mrb[183].mxu0  ;;  %v13679_v43 = vpack.c.bf16 %v12167_v12, %v12165_v34 }
 0x98a   : > { %v4543_v26 = vpack.c.bf16 %v4275_v27, %v4272_v6  ;;  %v13680_v6 = vpack.c.bf16 %v12180_v60, %v12174_v54  ;;  %v13682_v54 = vpack.c.bf16 %v12211_v28, %v12205_v4  ;;  %v13684_v28 = vpack.c.bf16 %v12199_v7, %v12193_v33 }
 0x98b   : > { %v13686_v33 = vpack.c.bf16 %v12235_v31, %v12229_v48 }
 0x98c   : > { %v4677_v15 = vsel %vm863_vm1, %v4543_v26, 0 }
 0x98d   : > { %9401 = vmatpush3.bf16.xpose.msra.mxu0 %v4591_v62  ;;  %9413 = vmatpush3.bf16.xpose.msra.mxu1 %v4674_v8  ;;  %v13681_v8 = vpack.c.bf16 %v12176_v42, %v12172_v39  ;;  %v13683_v42 = vpack.c.bf16 %v12186_v52, %v12184_v46 }
 0x98e   : > { %v9346_v36 = vpop.f32.mrb[184].mxu0  ;;  %9990 = vmatprep.subr.msk.bf16.mxu1 %vm863_vm1, %v4543_v26  ;;  %v4680_v26 = vsel %vm863_vm1, %v4544_v40, 0 }
 0x98f   : > { %v4288_v53 = vpop.f32.mrb[185].mxu0 }
 0x990   : > { %v9347_v20 = vpop.f32.mrb[186].mxu0 }
 0x991   : > { %v4546_v51 = vpack.c.bf16 %v9347_v20, %v9346_v36  ;;  %v4291_v2 = vpop.f32.mrb[187].mxu0 }
 0x992   : > { %v4545_v5 = vpack.c.bf16 %v4291_v2, %v4288_v53 }
 0x993   : > { %v4763_v62 = vsel %vm863_vm1, %v4546_v51, 0 }
 0x994   : > { %v4760_v55 = vsel %vm863_vm1, %v4545_v5, 0  ;;  %9403 = vmatmul.mubr.msk.bf16.vlgmr.msra.gmra.mrb[200].mxu0 %vm863_vm1, %v13679_v43  ;;  %9992 = vmatprep.subr.msk.bf16.mxu0 %vm863_vm1, %v4545_v5 }
 0x995   : > { %9415 = vmatpush3.bf16.xpose.msra.mxu1 %v4677_v15  ;;  %9427 = vmatpush3.bf16.xpose.msra.mxu0 %v4760_v55 }
 0x996   : > { %v9350_v37 = vpop.f32.mrb[188].mxu0  ;;  %9991 = vmatprep.subr.msk.bf16.mxu1 %vm863_vm1, %v4544_v40  ;;  %9993 = vmatprep.subr.msk.bf16.mxu0 %vm863_vm1, %v4546_v51 }
 0x997   : > { %v4304_v61 = vpop.f32.mrb[189].mxu0  ;;  %9406 = vmatprep.mubr.msk.bf16.mxu0 %vm863_vm1, %v13680_v6  ;;  %v13687_v6 = vpack.c.bf16 %v12207_v58, %v12203_v32  ;;  %v13689_v32 = vpack.c.bf16 %v12219_v9, %v12215_v29  ;;  %v13690_v58 = vpack.c.bf16 %v12231_v63, %v12227_v49  ;;  %v13691_v29 = vpack.c.bf16 %v12247_v19, %v12241_v13 }
 0x998   : > { %v9351_v45 = vpop.f32.mrb[190].mxu0 }
 0x999   : > { %v4548_v27 = vpack.c.bf16 %v9351_v45, %v9350_v37  ;;  %v4307_v34 = vpop.f32.mrb[191].mxu0 }
 0x99a   : > { %v4547_v12 = vpack.c.bf16 %v4307_v34, %v4304_v61  ;;  %v13685_v61 = vpack.c.bf16 %v12195_v0, %v12191_v56  ;;  %v13688_v56 = vpack.c.bf16 %v12223_v57, %v12217_v41 }
 0x99b   : > { %v4769_v43 = vsel %vm863_vm1, %v4548_v27, 0 }
 0x99c   : > { %9407 = vmatmul.mubr.msk.bf16.gmra.mrb[204].mxu0 %vm863_vm1, %v13681_v8  ;;  %v4766_v2 = vsel %vm863_vm1, %v4547_v12, 0 }
 0x99d   : > { %9417 = vmatpush3.bf16.xpose.msra.mxu1 %v4680_v26  ;;  %9429 = vmatpush3.bf16.xpose.msra.mxu0 %v4763_v62 }
 0x99e   : > { %v9354_v36 = vpop.f32.mrb[192].mxu0  ;;  %9994 = vmatprep.subr.msk.bf16.mxu0 %vm863_vm1, %v4547_v12  ;;  %9434 = vmatprep.mubr.msk.bf16.mxu0 %vm863_vm1, %v13682_v54 }
 0x99f   : > { %v4320_v60 = vpop.f32.mrb[193].mxu0 }
 0x9a0   : > { %v9355_v53 = vpop.f32.mrb[194].mxu0 }
 0x9a1   : > { %v4550_v40 = vpack.c.bf16 %v9355_v53, %v9354_v36  ;;  %v4323_v20 = vpop.f32.mrb[195].mxu0 }
 0x9a2   : > { %v4549_v51 = vpack.c.bf16 %v4323_v20, %v4320_v60 }
 0x9a3   : > { %v4852_v37 = vsel %vm863_vm1, %v4550_v40, 0 }
 0x9a4   : > { %v4849_v39 = vsel %vm863_vm1, %v4549_v51, 0  ;;  %9419 = vmatmul.mubr.msk.bf16.vlgmr.msra.gmra.mrb[248].mxu1 %vm863_vm1, %v13683_v42  ;;  %9996 = vmatprep.subr.msk.bf16.mxu1 %vm863_vm1, %v4549_v51 }
 0x9a5   : > { %9431 = vmatpush3.bf16.xpose.msra.mxu0 %v4766_v2  ;;  %9443 = vmatpush3.bf16.xpose.msra.mxu1 %v4849_v39 }
 0x9a6   : > { %9995 = vmatprep.subr.msk.bf16.mxu0 %vm863_vm1, %v4548_v27  ;;  %9997 = vmatprep.subr.msk.bf16.mxu1 %vm863_vm1, %v4550_v40  ;;  %v9358_v4 = vpop.f32.mrb[196].mxu0 }
 0x9a7   : > { %9422 = vmatprep.mubr.msk.bf16.mxu1 %vm863_vm1, %v13684_v28  ;;  %v4336_v5 = vpop.f32.mrb[197].mxu0 }
 0x9a8   : > { %v9359_v15 = vpop.f32.mrb[198].mxu0 }
 0x9a9   : > { %v4552_v55 = vpack.c.bf16 %v9359_v15, %v9358_v4  ;;  %v4339_v46 = vpop.f32.mrb[199].mxu0 }
 0x9aa   : > { %v4551_v52 = vpack.c.bf16 %v4339_v46, %v4336_v5 }
 0x9ab   : > { %v4858_v0 = vsel %vm863_vm1, %v4552_v55, 0 }
 0x9ac   : > { %9423 = vmatmul.mubr.msk.bf16.gmra.mrb[252].mxu1 %vm863_vm1, %v13685_v61  ;;  %v4855_v7 = vsel %vm863_vm1, %v4551_v52, 0 }
 0x9ad   : > { %9433 = vmatpush3.bf16.xpose.msra.mxu0 %v4769_v43  ;;  %9445 = vmatpush3.bf16.xpose.msra.mxu1 %v4852_v37 }
 0x9ae   : > { %9998 = vmatprep.subr.msk.bf16.mxu1 %vm863_vm1, %v4551_v52  ;;  %9450 = vmatprep.mubr.msk.bf16.mxu1 %vm863_vm1, %v13686_v33 }
 0x9af   : > { %9458 = vmatprep.subr.bf16.mxu0 %v12253_v10 }
 0x9b4   : > { %9435 = vmatmul.mubr.msk.bf16.vlgmr.msra.gmra.mrb[208].mxu0 %vm863_vm1, %v13687_v6 }
 0x9b5   : > { %9447 = vmatpush3.bf16.xpose.msra.mxu1 %v4855_v7  ;;  %9438 = vmatprep.mubr.msk.bf16.mxu0 %vm863_vm1, %v13688_v56 }
 0x9b6   : > { %9999 = vmatprep.subr.msk.bf16.mxu1 %vm863_vm1, %v4552_v55  ;;  %9459 = vmatpush3.bf16.msra.mxu0 %v12253_v10 }
 0x9b7   : > { %9460 = vmatprep.subr.bf16.mxu0 %v12251_v50 }
 0x9ba   : > { %9461 = vmatpush3.bf16.msra.mxu0 %v12251_v50 }
 0x9bb   : > { %9462 = vmatprep.subr.bf16.mxu0 %v12257_v47 }
 0x9bc   : > { %9439 = vmatmul.mubr.msk.bf16.gmra.mrb[212].mxu0 %vm863_vm1, %v13689_v32 }
 0x9bd   : > { %9449 = vmatpush3.bf16.xpose.msra.mxu1 %v4858_v0 }
 0x9be   : > { %9463 = vmatpush3.bf16.msra.mxu0 %v12257_v47  ;;  %9474 = vmatprep.subr.bf16.mxu1 %v12261_v23 }
 0x9bf   : > { %9464 = vmatprep.subr.bf16.mxu0 %v12255_v17 }
 0x9c2   : > { %9465 = vmatpush3.bf16.msra.mxu0 %v12255_v17  ;;  %v13692_v17 = vpack.c.bf16 %v12243_v59, %v12239_v1 }
 0x9c3   : > { %9490 = vmatprep.subr.bf16.mxu0 %v12269_v14 }
 0x9c4   : > { %9451 = vmatmul.mubr.msk.bf16.vlgmr.msra.gmra.mrb[0].mxu1 %vm863_vm1, %v13690_v58 }
 0x9c5   : > { %9454 = vmatprep.mubr.msk.bf16.mxu1 %vm863_vm1, %v13691_v29  ;;  %9475 = vmatpush3.bf16.msra.mxu1 %v12261_v23  ;;  %v9392_v23 = vpop.f32.mrb[244].mxu1 }
 0x9c6   : > { %9476 = vmatprep.subr.bf16.mxu1 %v12259_v24  ;;  %v4506_v41 = vpop.f32.mrb[245].mxu1 }
 0x9c7   : > { %v9393_v9 = vpop.f32.mrb[246].mxu1 }
 0x9c8   : > { %v12385_v57 = vpack.c.bf16 %v9393_v9, %v9392_v23  ;;  %v4509_v49 = vpop.f32.mrb[247].mxu1 }
 0x9c9   : > { %9477 = vmatpush3.bf16.msra.mxu1 %v12259_v24  ;;  %v12387_v48 = vpack.c.bf16 %v4509_v49, %v4506_v41 }
 0x9ca   : > { %9478 = vmatprep.subr.bf16.mxu1 %v12265_v30 }
 0x9cc   : > { %9455 = vmatmul.mubr.msk.bf16.gmra.mrb[4].mxu1 %vm863_vm1, %v13692_v17 }
 0x9cd   : > { %9479 = vmatpush3.bf16.msra.mxu1 %v12265_v30 }
 0x9ce   : > { %9480 = vmatprep.subr.bf16.mxu1 %v12263_v3 }
 0x9d1   : > { %9481 = vmatpush3.bf16.msra.mxu1 %v12263_v3 }
 0x9d2   : > { %9506 = vmatprep.subr.bf16.mxu1 %v12280_v38 }
 0xa67   : > { %v12389_v63 = vpop.f32.mrb[200].mxu0 }
 0xa68   : > { %v12391_v31 = vpop.f32.mrb[201].mxu0  ;;  %v4931_v47 = vsel %vm1220_vm2, %v12389_v63, -inf }
 0xa69   : > { %v12393_v1 = vpop.f32.mrb[202].mxu0  ;;  %v4925_v30 = vsel %vm1220_vm2, %v12391_v31, -inf }
 0xa6a   : > { %4926 = vmax.xlane.f32.xlu0 %v4925_v30  ;;  %v12397_v13 = vpop.f32.mrb[203].mxu0  ;;  %v4934_v24 = vsel %vm1220_vm2, %v12393_v1, -inf }
 0xa6b   : > { %v4928_v59 = vsel %vm1220_vm2, %v12397_v13, -inf }
 0xa6c   : > { %4929 = vmax.xlane.f32.xlu1 %v4928_v59 }
 0xa6e   : > { %4932 = vmax.xlane.f32.xlu0 %v4931_v47 }
 0xa6f   : > { %v12403_v19 = vpop.f32.mrb[204].mxu0 }
 0xa70   : > { %4935 = vmax.xlane.f32.xlu1 %v4934_v24  ;;  %v12407_v50 = vpop.f32.mrb[205].mxu0  ;;  %v4943_v34 = vsel %vm1220_vm2, %v12403_v19, -inf }
 0xa71   : > { %v12409_v10 = vpop.f32.mrb[206].mxu0  ;;  %v4937_v3 = vsel %vm1220_vm2, %v12407_v50, -inf }
 0xa72   : > { %4938 = vmax.xlane.f32.xlu0 %v4937_v3  ;;  %v12413_v45 = vpop.f32.mrb[207].mxu0  ;;  %v4946_v26 = vsel %vm1220_vm2, %v12409_v10, -inf }
 0xa73   : > { %v4940_v27 = vsel %vm1220_vm2, %v12413_v45, -inf }
 0xa74   : > { %4941 = vmax.xlane.f32.xlu1 %v4940_v27 }
 0xa76   : > { %4944 = vmax.xlane.f32.xlu0 %v4943_v34 }
 0xa77   : > { %v12419_v12 = vpop.f32.mrb[248].mxu1 }
 0xa78   : > { %v12423_v62 = vpop.f32.mrb[249].mxu1  ;;  %4947 = vmax.xlane.f32.xlu1 %v4946_v26  ;;  %v4955_v53 = vsel %vm1220_vm2, %v12419_v12, -inf }
 0xa79   : > { %v12425_v8 = vpop.f32.mrb[250].mxu1  ;;  %v4949_v36 = vsel %vm1220_vm2, %v12423_v62, -inf }
 0xa7a   : > { %v12429_v54 = vpop.f32.mrb[251].mxu1  ;;  %4950 = vmax.xlane.f32.xlu0 %v4949_v36  ;;  %v4958_v20 = vsel %vm1220_vm2, %v12425_v8, -inf }
 0xa7b   : > { %v4952_v60 = vsel %vm1220_vm2, %v12429_v54, -inf }
 0xa7c   : > { %4953 = vmax.xlane.f32.xlu1 %v4952_v60 }
 0xa7e   : > { %4956 = vmax.xlane.f32.xlu0 %v4955_v53 }
 0xa7f   : > { %v12435_v40 = vpop.f32.mrb[252].mxu1 }
 0xa80   : > { %v12439_v51 = vpop.f32.mrb[253].mxu1  ;;  %4959 = vmax.xlane.f32.xlu1 %v4958_v20  ;;  %v4967_v28 = vsel %vm1220_vm2, %v12435_v40, -inf }
 0xa81   : > { %v12441_v2 = vpop.f32.mrb[254].mxu1  ;;  %v4961_v39 = vsel %vm1220_vm2, %v12439_v51, -inf }
 0xa82   : > { %v12445_v42 = vpop.f32.mrb[255].mxu1  ;;  %4962 = vmax.xlane.f32.xlu0 %v4961_v39  ;;  %v4970_v15 = vsel %vm1220_vm2, %v12441_v2, -inf }
 0xa83   : > { %v4964_v4 = vsel %vm1220_vm2, %v12445_v42, -inf }
 0xa84   : > { %4965 = vmax.xlane.f32.xlu1 %v4964_v4 }
 0xa86   : > { %4968 = vmax.xlane.f32.xlu0 %v4967_v28 }
 0xa87   : > { %v12451_v5 = vpop.f32.mrb[208].mxu0 }
 0xa88   : > { %4971 = vmax.xlane.f32.xlu1 %v4970_v15  ;;  %v12455_v55 = vpop.f32.mrb[209].mxu0  ;;  %v4979_v61 = vsel %vm1220_vm2, %v12451_v5, -inf }
 0xa89   : > { %v12457_v46 = vpop.f32.mrb[210].mxu0  ;;  %v4973_v52 = vsel %vm1220_vm2, %v12455_v55, -inf }
 0xa8a   : > { %4974 = vmax.xlane.f32.xlu0 %v4973_v52  ;;  %v12461_v43 = vpop.f32.mrb[211].mxu0  ;;  %v4982_v7 = vsel %vm1220_vm2, %v12457_v46, -inf }
 0xa8b   : > { %v4976_v37 = vsel %vm1220_vm2, %v12461_v43, -inf }
 0xa8c   : > { %4977 = vmax.xlane.f32.xlu1 %v4976_v37 }
 0xa8e   : > { %4980 = vmax.xlane.f32.xlu0 %v4979_v61 }
 0xa8f   : > { %v12467_v33 = vpop.f32.mrb[212].mxu0 }
 0xa90   : > { %4983 = vmax.xlane.f32.xlu1 %v4982_v7  ;;  %v12471_v6 = vpop.f32.mrb[213].mxu0  ;;  %v4991_v29 = vsel %vm1220_vm2, %v12467_v33, -inf }
 0xa91   : > { %v12473_v56 = vpop.f32.mrb[214].mxu0  ;;  %v4985_v0 = vsel %vm1220_vm2, %v12471_v6, -inf }
 0xa92   : > { %4986 = vmax.xlane.f32.xlu0 %v4985_v0  ;;  %v12477_v32 = vpop.f32.mrb[215].mxu0  ;;  %v4994_v23 = vsel %vm1220_vm2, %v12473_v56, -inf }
 0xa93   : > { %v4988_v58 = vsel %vm1220_vm2, %v12477_v32, -inf }
 0xa94   : > { %4989 = vmax.xlane.f32.xlu1 %v4988_v58 }
 0xa96   : > { %4992 = vmax.xlane.f32.xlu0 %v4991_v29 }
 0xa97   : > { %v12483_v17 = vpop.f32.mrb[0].mxu1 }
 0xa98   : > { %4995 = vmax.xlane.f32.xlu1 %v4994_v23  ;;  %v12487_v41 = vpop.f32.mrb[1].mxu1  ;;  %v5003_v47 = vsel %vm1220_vm2, %v12483_v17, -inf }
 0xa99   : > { %v12489_v9 = vpop.f32.mrb[2].mxu1  ;;  %v4997_v49 = vsel %vm1220_vm2, %v12487_v41, -inf }
 0xa9a   : > { %4998 = vmax.xlane.f32.xlu0 %v4997_v49  ;;  %v12493_v30 = vpop.f32.mrb[3].mxu1  ;;  %v5006_v3 = vsel %vm1220_vm2, %v12489_v9, -inf }
 0xa9b   : > { %v5000_v59 = vsel %vm1220_vm2, %v12493_v30, -inf }
 0xa9c   : > { %5001 = vmax.xlane.f32.xlu1 %v5000_v59 }
 0xa9e   : > { %5004 = vmax.xlane.f32.xlu0 %v5003_v47 }
 0xa9f   : > { %v12499_v24 = vpop.f32.mrb[4].mxu1 }
 0xaa0   : > { %5007 = vmax.xlane.f32.xlu1 %v5006_v3  ;;  %v12503_v27 = vpop.f32.mrb[5].mxu1  ;;  %v5015_v53 = vsel %vm1220_vm2, %v12499_v24, -inf }
 0xaa1   : > { %v12505_v34 = vpop.f32.mrb[6].mxu1  ;;  %v5009_v26 = vsel %vm1220_vm2, %v12503_v27, -inf }
 0xaa2   : > { %5010 = vmax.xlane.f32.xlu0 %v5009_v26  ;;  %v12509_v36 = vpop.f32.mrb[7].mxu1  ;;  %v5018_v20 = vsel %vm1220_vm2, %v12505_v34, -inf }
 0xaa3   : > { %v5012_v60 = vsel %vm1220_vm2, %v12509_v36, -inf }
 0xaa4   : > { %5013 = vmax.xlane.f32.xlu1 %v5012_v60 }
 0xaa6   : > { %5016 = vmax.xlane.f32.xlu0 %v5015_v53 }
 0xaa8   : > { %5019 = vmax.xlane.f32.xlu1 %v5018_v20 }
 0xaf7   : > { %v4927_v39 = vpop.xlane.xlu0 %4926 }
 0xaf8   : > { %v5021_v4 = vsub.f32 %v12391_v31, %v4927_v39 }
 0xaf9   : > { %v4930_v28 = vpop.xlane.xlu1 %4929 }
 0xafa   : > { %v5053_v15 = vmul.f32 1.442695, %v5021_v4  ;;  %v5022_v52 = vsub.f32 %v12397_v13, %v4930_v28 }
 0xafb   : > { %v4933_v37 = vpop.xlane.xlu0 %4932 }
 0xafc   : > { %10294 = vpow2.f32 %v5053_v15  ;;  %v5055_v61 = vmul.f32 1.442695, %v5022_v52  ;;  %v5023_v7 = vsub.f32 %v12389_v63, %v4933_v37 }
 0xafd   : > { %v4936_v0 = vpop.xlane.xlu1 %4935 }
 0xafe   : > { %10296 = vpow2.f32 %v5055_v61  ;;  %v5057_v58 = vmul.f32 1.442695, %v5023_v7  ;;  %v5024_v29 = vsub.f32 %v12393_v1, %v4936_v0 }
 0xaff   : > { %v4939_v23 = vpop.xlane.xlu0 %4938 }
 0xb00   : > { %10298 = vpow2.f32 %v5057_v58  ;;  %v5059_v49 = vmul.f32 1.442695, %v5024_v29  ;;  %v5025_v59 = vsub.f32 %v12407_v50, %v4939_v23 }
 0xb01   : > { %v4942_v31 = vpop.xlane.xlu1 %4941 }
 0xb02   : > { %10300 = vpow2.f32 %v5059_v49  ;;  %v5061_v47 = vmul.f32 1.442695, %v5025_v59  ;;  %v5026_v13 = vsub.f32 %v12413_v45, %v4942_v31 }
 0xb03   : > { %v4945_v3 = vpop.xlane.xlu0 %4944 }
 0xb04   : > { %10302 = vpow2.f32 %v5061_v47  ;;  %v5063_v26 = vmul.f32 1.442695, %v5026_v13  ;;  %v5027_v63 = vsub.f32 %v12403_v19, %v4945_v3 }
 0xb05   : > { %v4948_v60 = vpop.xlane.xlu1 %4947 }
 0xb06   : > { %v12524_v53 = vpop.eup %10294  ;;  %10304 = vpow2.f32 %v5063_v26  ;;  %v5065_v1 = vmul.f32 1.442695, %v5027_v63  ;;  %v5028_v20 = vsub.f32 %v12409_v10, %v4948_v60 }
 0xb07   : > { %v4951_v39 = vpop.xlane.xlu0 %4950  ;;  %v5117_v50 = vsel %vm1220_vm2, %v12524_v53, 0.0 }
 0xb08   : > { %v12529_v4 = vpop.eup %10296  ;;  %10306 = vpow2.f32 %v5065_v1  ;;  %v5067_v45 = vmul.f32 1.442695, %v5028_v20  ;;  %v5029_v28 = vsub.f32 %v12423_v62, %v4951_v39  ;;  %5118 = vadd.xlane.f32.xlu0 %v5117_v50 }
 0xb09   : > { %v4954_v15 = vpop.xlane.xlu1 %4953  ;;  %v5120_v19 = vsel %vm1220_vm2, %v12529_v4, 0.0 }
 0xb0a   : > { %v12534_v52 = vpop.eup %10298  ;;  %10308 = vpow2.f32 %v5067_v45  ;;  %v5069_v37 = vmul.f32 1.442695, %v5029_v28  ;;  %v5030_v10 = vsub.f32 %v12429_v54, %v4954_v15  ;;  %5121 = vadd.xlane.f32.xlu1 %v5120_v19 }
 0xb0b   : > { %v4957_v61 = vpop.xlane.xlu0 %4956  ;;  %v5123_v7 = vsel %vm1220_vm2, %v12534_v52, 0.0 }
 0xb0c   : > { %v12539_v0 = vpop.eup %10300  ;;  %10310 = vpow2.f32 %v5069_v37  ;;  %v5071_v62 = vmul.f32 1.442695, %v5030_v10  ;;  %v5031_v58 = vsub.f32 %v12419_v12, %v4957_v61  ;;  %5124 = vadd.xlane.f32.xlu0 %v5123_v7 }
 0xb0d   : > { %v4960_v29 = vpop.xlane.xlu1 %4959  ;;  %v5126_v23 = vsel %vm1220_vm2, %v12539_v0, 0.0 }
 0xb0e   : > { %v12544_v49 = vpop.eup %10302  ;;  %10312 = vpow2.f32 %v5071_v62  ;;  %v5073_v54 = vmul.f32 1.442695, %v5031_v58  ;;  %v5032_v59 = vsub.f32 %v12425_v8, %v4960_v29  ;;  %5127 = vadd.xlane.f32.xlu1 %v5126_v23 }
 0xb0f   : > { %v4963_v31 = vpop.xlane.xlu0 %4962  ;;  %v5129_v47 = vsel %vm1220_vm2, %v12544_v49, 0.0 }
 0xb10   : > { %v12549_v13 = vpop.eup %10304  ;;  %10314 = vpow2.f32 %v5073_v54  ;;  %v5075_v12 = vmul.f32 1.442695, %v5032_v59  ;;  %v5033_v3 = vsub.f32 %v12439_v51, %v4963_v31  ;;  %5130 = vadd.xlane.f32.xlu0 %v5129_v47 }
 0xb11   : > { %v4966_v26 = vpop.xlane.xlu1 %4965  ;;  %v5132_v63 = vsel %vm1220_vm2, %v12549_v13, 0.0 }
 0xb12   : > { %v12554_v60 = vpop.eup %10306  ;;  %10316 = vpow2.f32 %v5075_v12  ;;  %v5077_v8 = vmul.f32 1.442695, %v5033_v3  ;;  %v5034_v1 = vsub.f32 %v12445_v42, %v4966_v26  ;;  %5133 = vadd.xlane.f32.xlu1 %v5132_v63 }
 0xb13   : > { %v4969_v20 = vpop.xlane.xlu0 %4968  ;;  %v5135_v39 = vsel %vm1220_vm2, %v12554_v60, 0.0 }
 0xb14   : > { %v12559_v50 = vpop.eup %10308  ;;  %10318 = vpow2.f32 %v5077_v8  ;;  %v5079_v51 = vmul.f32 1.442695, %v5034_v1  ;;  %v5035_v45 = vsub.f32 %v12435_v40, %v4969_v20  ;;  %5136 = vadd.xlane.f32.xlu0 %v5135_v39 }
 0xb15   : > { %v4972_v28 = vpop.xlane.xlu1 %4971  ;;  %v5138_v15 = vsel %vm1220_vm2, %v12559_v50, 0.0 }
 0xb16   : > { %v12564_v19 = vpop.eup %10310  ;;  %10320 = vpow2.f32 %v5079_v51  ;;  %v5081_v42 = vmul.f32 1.442695, %v5035_v45  ;;  %v5036_v37 = vsub.f32 %v12441_v2, %v4972_v28  ;;  %5139 = vadd.xlane.f32.xlu1 %v5138_v15 }
 0xb17   : > { %v4975_v10 = vpop.xlane.xlu0 %4974  ;;  %v5141_v61 = vsel %vm1220_vm2, %v12564_v19, 0.0 }
 0xb18   : > { %v12569_v7 = vpop.eup %10312  ;;  %10322 = vpow2.f32 %v5081_v42  ;;  %v5083_v40 = vmul.f32 1.442695, %v5036_v37  ;;  %v5037_v62 = vsub.f32 %v12455_v55, %v4975_v10  ;;  %5142 = vadd.xlane.f32.xlu0 %v5141_v61 }
 0xb19   : > { %v4978_v58 = vpop.xlane.xlu1 %4977  ;;  %v5144_v29 = vsel %vm1220_vm2, %v12569_v7, 0.0 }
 0xb1a   : > { %v12574_v23 = vpop.eup %10314  ;;  %10324 = vpow2.f32 %v5083_v40  ;;  %v5085_v2 = vmul.f32 1.442695, %v5037_v62  ;;  %v5038_v54 = vsub.f32 %v12461_v43, %v4978_v58  ;;  %5145 = vadd.xlane.f32.xlu1 %v5144_v29 }
 0xb1b   : > { %v4981_v59 = vpop.xlane.xlu0 %4980  ;;  %v5147_v31 = vsel %vm1220_vm2, %v12574_v23, 0.0 }
 0xb1c   : > { %v12579_v47 = vpop.eup %10316  ;;  %10326 = vpow2.f32 %v5085_v2  ;;  %v5087_v55 = vmul.f32 1.442695, %v5038_v54  ;;  %v5039_v12 = vsub.f32 %v12451_v5, %v4981_v59  ;;  %5148 = vadd.xlane.f32.xlu0 %v5147_v31 }
 0xb1d   : > { %v4984_v3 = vpop.xlane.xlu1 %4983  ;;  %v5150_v26 = vsel %vm1220_vm2, %v12579_v47, 0.0 }
 0xb1e   : > { %v12584_v63 = vpop.eup %10318  ;;  %10328 = vpow2.f32 %v5087_v55  ;;  %v5089_v43 = vmul.f32 1.442695, %v5039_v12  ;;  %v5040_v8 = vsub.f32 %v12457_v46, %v4984_v3  ;;  %5151 = vadd.xlane.f32.xlu1 %v5150_v26 }
 0xb1f   : > { %v4987_v1 = vpop.xlane.xlu0 %4986  ;;  %v5153_v20 = vsel %vm1220_vm2, %v12584_v63, 0.0 }
 0xb20   : > { %v12589_v39 = vpop.eup %10320  ;;  %10330 = vpow2.f32 %v5089_v43  ;;  %v5091_v5 = vmul.f32 1.442695, %v5040_v8  ;;  %v5041_v51 = vsub.f32 %v12471_v6, %v4987_v1  ;;  %5154 = vadd.xlane.f32.xlu0 %v5153_v20 }
 0xb21   : > { %v4990_v45 = vpop.xlane.xlu1 %4989  ;;  %v5156_v28 = vsel %vm1220_vm2, %v12589_v39, 0.0 }
 0xb22   : > { %v12594_v15 = vpop.eup %10322  ;;  %10332 = vpow2.f32 %v5091_v5  ;;  %v5093_v46 = vmul.f32 1.442695, %v5041_v51  ;;  %v5042_v42 = vsub.f32 %v12477_v32, %v4990_v45  ;;  %5157 = vadd.xlane.f32.xlu1 %v5156_v28 }
 0xb23   : > { %v4993_v37 = vpop.xlane.xlu0 %4992  ;;  %v5159_v10 = vsel %vm1220_vm2, %v12594_v15, 0.0 }
 0xb24   : > { %v12599_v61 = vpop.eup %10324  ;;  %10334 = vpow2.f32 %v5093_v46  ;;  %v5095_v6 = vmul.f32 1.442695, %v5042_v42  ;;  %v5043_v40 = vsub.f32 %v12467_v33, %v4993_v37  ;;  %5160 = vadd.xlane.f32.xlu0 %v5159_v10 }
 0xb25   : > { %v4996_v62 = vpop.xlane.xlu1 %4995  ;;  %v5162_v58 = vsel %vm1220_vm2, %v12599_v61, 0.0 }
 0xb26   : > { %v12604_v29 = vpop.eup %10326  ;;  %10336 = vpow2.f32 %v5095_v6  ;;  %v5097_v32 = vmul.f32 1.442695, %v5043_v40  ;;  %v5044_v2 = vsub.f32 %v12473_v56, %v4996_v62  ;;  %5163 = vadd.xlane.f32.xlu1 %v5162_v58 }
 0xb27   : > { %v4999_v54 = vpop.xlane.xlu0 %4998  ;;  %v5165_v59 = vsel %vm1220_vm2, %v12604_v29, 0.0 }
 0xb28   : > { %v12609_v31 = vpop.eup %10328  ;;  %10338 = vpow2.f32 %v5097_v32  ;;  %v5099_v33 = vmul.f32 1.442695, %v5044_v2  ;;  %v5045_v55 = vsub.f32 %v12487_v41, %v4999_v54  ;;  %5166 = vadd.xlane.f32.xlu0 %v5165_v59 }
 0xb29   : > { %v5002_v12 = vpop.xlane.xlu1 %5001  ;;  %v5168_v3 = vsel %vm1220_vm2, %v12609_v31, 0.0 }
 0xb2a   : > { %v12614_v26 = vpop.eup %10330  ;;  %10340 = vpow2.f32 %v5099_v33  ;;  %v5101_v56 = vmul.f32 1.442695, %v5045_v55  ;;  %v5046_v43 = vsub.f32 %v12493_v30, %v5002_v12  ;;  %5169 = vadd.xlane.f32.xlu1 %v5168_v3 }
 0xb2b   : > { %v5005_v8 = vpop.xlane.xlu0 %5004  ;;  %v5171_v1 = vsel %vm1220_vm2, %v12614_v26, 0.0 }
 0xb2c   : > { %v12619_v20 = vpop.eup %10332  ;;  %10342 = vpow2.f32 %v5101_v56  ;;  %v5103_v41 = vmul.f32 1.442695, %v5046_v43  ;;  %v5047_v5 = vsub.f32 %v12483_v17, %v5005_v8  ;;  %5172 = vadd.xlane.f32.xlu0 %v5171_v1 }
 0xb2d   : > { %v5008_v51 = vpop.xlane.xlu1 %5007  ;;  %v5174_v45 = vsel %vm1220_vm2, %v12619_v20, 0.0 }
 0xb2e   : > { %v12624_v28 = vpop.eup %10334  ;;  %10344 = vpow2.f32 %v5103_v41  ;;  %v5105_v30 = vmul.f32 1.442695, %v5047_v5  ;;  %v5048_v46 = vsub.f32 %v12489_v9, %v5008_v51  ;;  %5175 = vadd.xlane.f32.xlu1 %v5174_v45 }
 0xb2f   : > { %v5011_v42 = vpop.xlane.xlu0 %5010  ;;  %v5177_v37 = vsel %vm1220_vm2, %v12624_v28, 0.0 }
 0xb30   : > { %v12629_v10 = vpop.eup %10336  ;;  %10346 = vpow2.f32 %v5105_v30  ;;  %v5107_v17 = vmul.f32 1.442695, %v5048_v46  ;;  %v5049_v6 = vsub.f32 %v12503_v27, %v5011_v42  ;;  %5178 = vadd.xlane.f32.xlu0 %v5177_v37 }
 0xb31   : > { %v5014_v40 = vpop.xlane.xlu1 %5013  ;;  %v5180_v62 = vsel %vm1220_vm2, %v12629_v10, 0.0 }
 0xb32   : > { %v12634_v58 = vpop.eup %10338  ;;  %10348 = vpow2.f32 %v5107_v17  ;;  %v5109_v9 = vmul.f32 1.442695, %v5049_v6  ;;  %v5050_v32 = vsub.f32 %v12509_v36, %v5014_v40  ;;  %5181 = vadd.xlane.f32.xlu1 %v5180_v62 }
 0xb33   : > { %v5017_v2 = vpop.xlane.xlu0 %5016  ;;  %v5183_v54 = vsel %vm1220_vm2, %v12634_v58, 0.0 }
 0xb34   : > { %v12639_v59 = vpop.eup %10340  ;;  %10350 = vpow2.f32 %v5109_v9  ;;  %v5111_v27 = vmul.f32 1.442695, %v5050_v32  ;;  %v5051_v33 = vsub.f32 %v12499_v24, %v5017_v2  ;;  %5184 = vadd.xlane.f32.xlu0 %v5183_v54 }
 0xb35   : > { %v5020_v55 = vpop.xlane.xlu1 %5019  ;;  %v5186_v12 = vsel %vm1220_vm2, %v12639_v59, 0.0 }
 0xb36   : > { %v12644_v3 = vpop.eup %10342  ;;  %10352 = vpow2.f32 %v5111_v27  ;;  %v5113_v36 = vmul.f32 1.442695, %v5051_v33  ;;  %v5052_v56 = vsub.f32 %v12505_v34, %v5020_v55  ;;  %5187 = vadd.xlane.f32.xlu1 %v5186_v12 }
 0xb37   : > { %v5189_v43 = vsel %vm1220_vm2, %v12644_v3, 0.0 }
 0xb38   : > { %v12649_v8 = vpop.eup %10344  ;;  %10354 = vpow2.f32 %v5113_v36  ;;  %v5115_v1 = vmul.f32 1.442695, %v5052_v56  ;;  %5190 = vadd.xlane.f32.xlu0 %v5189_v43 }
 0xb39   : > { %v5192_v24 = vsel %vm1220_vm2, %v12649_v8, 0.0 }
 0xb3a   : > { %v12653_v41 = vpop.eup %10346  ;;  %10356 = vpow2.f32 %v5115_v1  ;;  %5193 = vadd.xlane.f32.xlu1 %v5192_v24 }
 0xb3b   : > { %v5195_v5 = vsel %vm1220_vm2, %v12653_v41, 0.0 }
 0xb3c   : > { %v12657_v34 = vpop.eup %10348  ;;  %5196 = vadd.xlane.f32.xlu0 %v5195_v5 }
 0xb3d   : > { %v5198_v51 = vsel %vm1220_vm2, %v12657_v34, 0.0 }
 0xb3e   : > { %v12661_v45 = vpop.eup %10350  ;;  %5199 = vadd.xlane.f32.xlu1 %v5198_v51 }
 0xb3f   : > { %v5201_v30 = vsel %vm1220_vm2, %v12661_v45, 0.0 }
 0xb40   : > { %v12665_v46 = vpop.eup %10352  ;;  %5202 = vadd.xlane.f32.xlu0 %v5201_v30 }
 0xb41   : > { %v5204_v42 = vsel %vm1220_vm2, %v12665_v46, 0.0 }
 0xb42   : > { %v12669_v37 = vpop.eup %10354  ;;  %5205 = vadd.xlane.f32.xlu1 %v5204_v42 }
 0xb43   : > { %v5207_v17 = vsel %vm1220_vm2, %v12669_v37, 0.0 }
 0xb44   : > { %v12673_v6 = vpop.eup %10356  ;;  %5208 = vadd.xlane.f32.xlu0 %v5207_v17 }
 0xb45   : > { %v5210_v40 = vsel %vm1220_vm2, %v12673_v6, 0.0 }
 0xb46   : > { %5211 = vadd.xlane.f32.xlu1 %v5210_v40 }
 0xb95   : > { %v5119_v62 = vpop.xlane.xlu0 %5118 }
 0xb96   : > { %10358 = vrcp.f32 %v5119_v62 }
 0xb97   : > { %v5122_v9 = vpop.xlane.xlu1 %5121 }
 0xb98   : > { %10360 = vrcp.f32 %v5122_v9 }
 0xb99   : > { %v5125_v32 = vpop.xlane.xlu0 %5124 }
 0xb9a   : > { %10362 = vrcp.f32 %v5125_v32 }
 0xb9b   : > { %v5128_v2 = vpop.xlane.xlu1 %5127 }
 0xb9c   : > { %10364 = vrcp.f32 %v5128_v2 }
 0xb9d   : > { %v5131_v54 = vpop.xlane.xlu0 %5130 }
 0xb9e   : > { %10366 = vrcp.f32 %v5131_v54 }
 0xb9f   : > { %v5134_v27 = vpop.xlane.xlu1 %5133 }
 0xba0   : > { %v10359_v33 = vpop.eup %10358  ;;  %10368 = vrcp.f32 %v5134_v27 }
 0xba1   : > { %v5137_v55 = vpop.xlane.xlu0 %5136  ;;  %v5245_v56 = vmul.f32 %v10359_v33, %v12524_v53 }
 0xba2   : > { %v10361_v12 = vpop.eup %10360  ;;  %10370 = vrcp.f32 %v5137_v55 }
 0xba3   : > { %v5140_v36 = vpop.xlane.xlu1 %5139  ;;  %v5246_v43 = vmul.f32 %v10361_v12, %v12529_v4 }
 0xba4   : > { %v10363_v1 = vpop.eup %10362  ;;  %10372 = vrcp.f32 %v5140_v36 }
 0xba5   : > { %v5143_v24 = vpop.xlane.xlu0 %5142  ;;  %v5277_v5 = vpack.c.bf16 %v5246_v43, %v5245_v56  ;;  %v5247_v30 = vmul.f32 %v10363_v1, %v12534_v52 }
 0xba6   : > { %v10365_v51 = vpop.eup %10364  ;;  %10374 = vrcp.f32 %v5143_v24 }
 0xba7   : > { %v5248_v42 = vmul.f32 %v10365_v51, %v12539_v0  ;;  %9466 = vmatprep.mubr.msk.bf16.mxu0 %vm1220_vm2, %v5277_v5  ;;  %v5146_v17 = vpop.xlane.xlu1 %5145 }
 0xba8   : > { %v10367_v40 = vpop.eup %10366  ;;  %10376 = vrcp.f32 %v5146_v17 }
 0xba9   : > { %v5278_v62 = vpack.c.bf16 %v5248_v42, %v5247_v30  ;;  %v5149_v9 = vpop.xlane.xlu0 %5148  ;;  %v5249_v32 = vmul.f32 %v10367_v40, %v12544_v49 }
 0xbaa   : > { %v10369_v53 = vpop.eup %10368  ;;  %10378 = vrcp.f32 %v5149_v9 }
 0xbab   : > { %9467 = vmatmul.mubr.msk.bf16.vlgmr.msra.gmra.mrb[216].mxu0 %vm1220_vm2, %v5278_v62  ;;  %v5152_v4 = vpop.xlane.xlu1 %5151  ;;  %v5250_v2 = vmul.f32 %v10369_v53, %v12549_v13 }
 0xbac   : > { %v10371_v54 = vpop.eup %10370  ;;  %9491 = vmatpush3.bf16.msra.mxu0 %v12269_v14  ;;  %10380 = vrcp.f32 %v5152_v4 }
 0xbad   : > { %9492 = vmatprep.subr.bf16.mxu0 %v12267_v11  ;;  %v5155_v52 = vpop.xlane.xlu0 %5154  ;;  %v5279_v0 = vpack.c.bf16 %v5250_v2, %v5249_v32  ;;  %v5251_v55 = vmul.f32 %v10371_v54, %v12554_v60 }
 0xbae   : > { %v10373_v27 = vpop.eup %10372  ;;  %10382 = vrcp.f32 %v5155_v52 }
 0xbaf   : > { %9470 = vmatprep.mubr.msk.bf16.mxu0 %vm1220_vm2, %v5279_v0  ;;  %v5158_v33 = vpop.xlane.xlu1 %5157  ;;  %v5252_v12 = vmul.f32 %v10373_v27, %v12559_v50 }
 0xbb0   : > { %v10375_v49 = vpop.eup %10374  ;;  %9493 = vmatpush3.bf16.msra.mxu0 %v12267_v11  ;;  %10384 = vrcp.f32 %v5158_v33 }
 0xbb1   : > { %9494 = vmatprep.subr.bf16.mxu0 %v12273_v44  ;;  %v5161_v14 = vpop.xlane.xlu0 %5160  ;;  %v5280_v13 = vpack.c.bf16 %v5252_v12, %v5251_v55  ;;  %v5253_v43 = vmul.f32 %v10375_v49, %v12564_v19 }
 0xbb2   : > { %v10377_v36 = vpop.eup %10376  ;;  %10386 = vrcp.f32 %v5161_v14 }
 0xbb3   : > { %9471 = vmatmul.mubr.msk.bf16.gmra.mrb[220].mxu0 %vm1220_vm2, %v5280_v13  ;;  %v5164_v56 = vpop.xlane.xlu1 %5163  ;;  %v5254_v1 = vmul.f32 %v10377_v36, %v12569_v7 }
 0xbb4   : > { %v10379_v60 = vpop.eup %10378  ;;  %9495 = vmatpush3.bf16.msra.mxu0 %v12273_v44  ;;  %10388 = vrcp.f32 %v5164_v56 }
 0xbb5   : > { %9496 = vmatprep.subr.bf16.mxu0 %v12271_v21  ;;  %v5167_v11 = vpop.xlane.xlu0 %5166  ;;  %v5281_v50 = vpack.c.bf16 %v5254_v1, %v5253_v43  ;;  %v5255_v5 = vmul.f32 %v10379_v60, %v12574_v23 }
 0xbb6   : > { %v10381_v24 = vpop.eup %10380  ;;  %10390 = vrcp.f32 %v5167_v11 }
 0xbb7   : > { %v5256_v51 = vmul.f32 %v10381_v24, %v12579_v47  ;;  %9482 = vmatprep.mubr.msk.bf16.mxu1 %vm1220_vm2, %v5281_v50  ;;  %v5170_v30 = vpop.xlane.xlu1 %5169 }
 0xbb8   : > { %v10383_v19 = vpop.eup %10382  ;;  %9497 = vmatpush3.bf16.msra.mxu0 %v12271_v21  ;;  %10392 = vrcp.f32 %v5170_v30 }
 0xbb9   : > { %v5282_v7 = vpack.c.bf16 %v5256_v51, %v5255_v5  ;;  %v5173_v44 = vpop.xlane.xlu0 %5172  ;;  %v5257_v40 = vmul.f32 %v10383_v19, %v12584_v63 }
 0xbba   : > { %v10385_v42 = vpop.eup %10384  ;;  %10394 = vrcp.f32 %v5173_v44 }
 0xbbb   : > { %9483 = vmatmul.mubr.msk.bf16.vlgmr.msra.gmra.mrb[8].mxu1 %vm1220_vm2, %v5282_v7  ;;  %v5176_v17 = vpop.xlane.xlu1 %5175  ;;  %v5258_v23 = vmul.f32 %v10385_v42, %v12589_v39 }
 0xbbc   : > { %v10387_v62 = vpop.eup %10386  ;;  %9507 = vmatpush3.bf16.msra.mxu1 %v12280_v38  ;;  %10396 = vrcp.f32 %v5176_v17 }
 0xbbd   : > { %9508 = vmatprep.subr.bf16.mxu1 %v12278_v16  ;;  %v5179_v47 = vpop.xlane.xlu0 %5178  ;;  %v5283_v21 = vpack.c.bf16 %v5258_v23, %v5257_v40  ;;  %v5259_v53 = vmul.f32 %v10387_v62, %v12594_v15 }
 0xbbe   : > { %v10389_v9 = vpop.eup %10388  ;;  %10398 = vrcp.f32 %v5179_v47 }
 0xbbf   : > { %v5260_v4 = vmul.f32 %v10389_v9, %v12599_v61  ;;  %9486 = vmatprep.mubr.msk.bf16.mxu1 %vm1220_vm2, %v5283_v21  ;;  %v5182_v32 = vpop.xlane.xlu1 %5181  ;;  %v13693_v21 = vld [vmem:[#allocation8_spill] sm:$0xff]  ;;  %v13694_v9 = vld [vmem:[#allocation10_spill] sm:$0xff] }
 0xbc0   : > { %v10391_v63 = vpop.eup %10390  ;;  %9509 = vmatpush3.bf16.msra.mxu1 %v12278_v16  ;;  %10400 = vrcp.f32 %v5182_v32  ;;  %v13697_v32 = vld [vmem:[#allocation2_spill] sm:$0xff] }
 0xbc1   : > { %v5284_v39 = vpack.c.bf16 %v5260_v4, %v5259_v53  ;;  %9510 = vmatprep.subr.bf16.mxu1 %v12387_v48  ;;  %v5185_v38 = vpop.xlane.xlu0 %5184  ;;  %v5261_v15 = vmul.f32 %v10391_v63, %v12604_v29  ;;  %v13695_v53 = vld [vmem:[#allocation12_spill] sm:$0xff]  ;;  %v13696_v4 = vld [vmem:[#allocation13_spill] sm:$0xff] }
 0xbc2   : > { %v10393_v2 = vpop.eup %10392  ;;  %10402 = vrcp.f32 %v5185_v38  ;;  %v10037_v63 = vld [vmem:[%s13575_s1 + $0x58] sm:$0xff]  }
 0xbc3   : > { %9487 = vmatmul.mubr.msk.bf16.gmra.mrb[12].mxu1 %vm1220_vm2, %v5284_v39  ;;  %v5188_v54 = vpop.xlane.xlu1 %5187  ;;  %v5262_v61 = vmul.f32 %v10393_v2, %v12609_v31 }
 0xbc4   : > { %v10395_v52 = vpop.eup %10394  ;;  %9511 = vmatpush3.bf16.msra.mxu1 %v12387_v48  ;;  %10404 = vrcp.f32 %v5188_v54 }
 0xbc5   : > { %9512 = vmatprep.subr.bf16.mxu1 %v12385_v57  ;;  %v5191_v16 = vpop.xlane.xlu0 %5190  ;;  %v5285_v0 = vpack.c.bf16 %v5262_v61, %v5261_v15  ;;  %v5263_v33 = vmul.f32 %v10395_v52, %v12614_v26  ;;  %v13698_v52 = vld [vmem:[#allocation3_spill] sm:$0xff] }
 0xbc6   : > { %v10397_v27 = vpop.eup %10396  ;;  %10406 = vrcp.f32 %v5191_v16  ;;  %v13699_v16 = vld [vmem:[#allocation4_spill] sm:$0xff] }
 0xbc7   : > { %v5264_v55 = vmul.f32 %v10397_v27, %v12619_v20  ;;  %9498 = vmatprep.mubr.msk.bf16.mxu0 %vm1220_vm2, %v5285_v0  ;;  %v5194_v12 = vpop.xlane.xlu1 %5193 }
 0xbc8   : > { %v10399_v29 = vpop.eup %10398  ;;  %9513 = vmatpush3.bf16.msra.mxu1 %v12385_v57  ;;  %10408 = vrcp.f32 %v5194_v12 }
 0xbc9   : > { %v5286_v31 = vpack.c.bf16 %v5264_v55, %v5263_v33  ;;  %v5197_v48 = vpop.xlane.xlu0 %5196  ;;  %v5265_v13 = vmul.f32 %v10399_v29, %v12624_v28 }
 0xbca   : > { %v10401_v49 = vpop.eup %10400  ;;  %10410 = vrcp.f32 %v5197_v48  ;;  %v13701_v48 = vld [vmem:[#allocation6_spill] sm:$0xff] }
 0xbcb   : > { %9499 = vmatmul.mubr.msk.bf16.vlgmr.msra.gmra.mrb[224].mxu0 %vm1220_vm2, %v5286_v31  ;;  %v5200_v14 = vpop.xlane.xlu1 %5199  ;;  %v5266_v26 = vmul.f32 %v10401_v49, %v12629_v10  ;;  %v13700_v31 = vld [vmem:[#allocation5_spill] sm:$0xff] }
 0xbcc   : > { %v10403_v36 = vpop.eup %10402  ;;  %10412 = vrcp.f32 %v5200_v14 }
 0xbcd   : > { %v5203_v20 = vpop.xlane.xlu0 %5202  ;;  %v5287_v56 = vpack.c.bf16 %v5266_v26, %v5265_v13  ;;  %v5267_v1 = vmul.f32 %v10403_v36, %v12634_v58 }
 0xbce   : > { %v10405_v43 = vpop.eup %10404  ;;  %10414 = vrcp.f32 %v5203_v20 }
 0xbcf   : > { %9502 = vmatprep.mubr.msk.bf16.mxu0 %vm1220_vm2, %v5287_v56  ;;  %v5206_v57 = vpop.xlane.xlu1 %5205  ;;  %v5268_v60 = vmul.f32 %v10405_v43, %v12639_v59  ;;  %v13702_v56 = vld [vmem:[#allocation7_spill] sm:$0xff]  ;;  %v13703_v43 = vld [vmem:[#allocation9_spill] sm:$0xff] }
 0xbd0   : > { %v10407_v11 = vpop.eup %10406  ;;  %10416 = vrcp.f32 %v5206_v57 }
 0xbd1   : > { %v5209_v50 = vpop.xlane.xlu0 %5208  ;;  %v5288_v24 = vpack.c.bf16 %v5268_v60, %v5267_v1  ;;  %v5269_v5 = vmul.f32 %v10407_v11, %v12644_v3 }
 0xbd2   : > { %v10409_v28 = vpop.eup %10408  ;;  %10418 = vrcp.f32 %v5209_v50 }
 0xbd3   : > { %9503 = vmatmul.mubr.msk.bf16.gmra.mrb[228].mxu0 %vm1220_vm2, %v5288_v24  ;;  %v5212_v10 = vpop.xlane.xlu1 %5211  ;;  %v5270_v51 = vmul.f32 %v10409_v28, %v12649_v8  ;;  %v13704_v28 = vld [vmem:[#allocation11_spill] sm:$0xff] }
 0xbd4   : > { %v10411_v30 = vpop.eup %10410  ;;  %10420 = vrcp.f32 %v5212_v10 }
 0xbd5   : > { %v5289_v19 = vpack.c.bf16 %v5270_v51, %v5269_v5  ;;  %v5271_v58 = vmul.f32 %v10411_v30, %v12653_v41 }
 0xbd6   : > { %v10413_v7 = vpop.eup %10412 }
 0xbd7   : > { %v5272_v59 = vmul.f32 %v10413_v7, %v12657_v34  ;;  %9514 = vmatprep.mubr.msk.bf16.mxu1 %vm1220_vm2, %v5289_v19 }
 0xbd8   : > { %v10415_v44 = vpop.eup %10414 }
 0xbd9   : > { %v5290_v42 = vpack.c.bf16 %v5272_v59, %v5271_v58  ;;  %v5273_v40 = vmul.f32 %v10415_v44, %v12661_v45  ;;  %v8111_v45 = vld [vmem:[%s13576_s2 + $0x8] sm:$0xf] }
 0xbda   : > { %v10417_v17 = vpop.eup %10416  ;;  %10000 = vmatprep.subr.msk.bf16.mxu0 %vm1962_vm3, %v8111_v45 }
 0xbdb   : > { %9515 = vmatmul.mubr.msk.bf16.vlgmr.msra.gmra.mrb[16].mxu1 %vm1220_vm2, %v5290_v42  ;;  %v5274_v3 = vmul.f32 %v10417_v17, %v12665_v46  ;;  %v5668_v46 = vsel %vm1962_vm3, %v8111_v45, 0 }
 0xbdc   : > { %v10419_v8 = vpop.eup %10418  ;;  %9523 = vmatpush3.bf16.msra.mxu0 %v5668_v46 }
 0xbdd   : > { %v5291_v23 = vpack.c.bf16 %v5274_v3, %v5273_v40  ;;  %v5275_v47 = vmul.f32 %v10419_v8, %v12669_v37  ;;  %v10035_v37 = vld [vmem:[%s13575_s1 + $0x38] sm:$0xff]  }
 0xbde   : > { %v10421_v62 = vpop.eup %10420  ;;  %9590 = vmatprep.subr.bf16.mxu0 %v10035_v37 }
 0xbdf   : > { %v5276_v41 = vmul.f32 %v10421_v62, %v12673_v6  ;;  %9518 = vmatprep.mubr.msk.bf16.mxu1 %vm1220_vm2, %v5291_v23  ;;  %v10036_v6 = vld [vmem:[%s13575_s1 + $0x18] sm:$0xff]  }
 0xbe0   : > { %9556 = vmatprep.subr.bf16.mxu1 %v10036_v6 }
 0xbe1   : > { %v5292_v34 = vpack.c.bf16 %v5276_v41, %v5275_v47  ;;  %9557 = vmatpush3.bf16.msra.mxu1 %v10036_v6 }
 0xbe2   : > { %9624 = vmatprep.subr.bf16.mxu1 %v10037_v63 }
 0xbe3   : > { %9519 = vmatmul.mubr.msk.bf16.gmra.mrb[20].mxu1 %vm1220_vm2, %v5292_v34 }
 0xbe4   : > { %9558 = vmatprep.mubr.msk.bf16.mxu1 %vm265_vm0, %v10634_v18 }
 0xbeb   : > { %9559 = vmatmul.mubr.msk.bf16.vlgmr.msra.gmra.mrb[24].mxu1 %vm265_vm0, %v10639_v22 }
 0xbec   : > { %9562 = vmatprep.mubr.msk.bf16.mxu1 %vm265_vm0, %v10644_v25  ;;  %9625 = vmatpush3.bf16.msra.mxu1 %v10037_v63 }
 0xbf3   : > { %9563 = vmatmul.mubr.msk.bf16.gmra.mrb[28].mxu1 %vm265_vm0, %v10666_v35 }
 0xbf4   : > { %9566 = vmatprep.mubr.msk.bf16.mxu1 %vm265_vm0, %v13693_v21 }
 0xbfb   : > { %9567 = vmatmul.mubr.msk.bf16.gmra.mrb[32].mxu1 %vm265_vm0, %v13694_v9 }
 0xbfc   : > { %9570 = vmatprep.mubr.msk.bf16.mxu1 %vm265_vm0, %v13695_v53 }
 0xc03   : > { %9571 = vmatmul.mubr.msk.bf16.gmra.mrb[36].mxu1 %vm265_vm0, %v13696_v4 }
 0xc04   : > { %9574 = vmatprep.mubr.msk.bf16.mxu1 %vm265_vm0, %v13697_v32 }
 0xc0b   : > { %9575 = vmatmul.mubr.msk.bf16.gmra.mrb[40].mxu1 %vm265_vm0, %v13698_v52 }
 0xc0c   : > { %9578 = vmatprep.mubr.msk.bf16.mxu1 %vm265_vm0, %v13699_v16 }
 0xc13   : > { %9579 = vmatmul.mubr.msk.bf16.gmra.mrb[44].mxu1 %vm265_vm0, %v13700_v31 }
 0xc14   : > { %9582 = vmatprep.mubr.msk.bf16.mxu1 %vm265_vm0, %v13701_v48 }
 0xc1b   : > { %9583 = vmatmul.mubr.msk.bf16.gmra.mrb[48].mxu1 %vm265_vm0, %v13702_v56 }
 0xc1c   : > { %9586 = vmatprep.mubr.msk.bf16.mxu1 %vm265_vm0, %v13703_v43 }
 0xc23   : > { %9587 = vmatmul.mubr.msk.bf16.gmra.mrb[52].mxu1 %vm265_vm0, %v13704_v28 }
 0xc24   : > { %9626 = vmatprep.mubr.msk.bf16.mxu1 %vm265_vm0, %v10634_v18 }
 0xc2b   : > { %9627 = vmatmul.mubr.msk.bf16.vlgmr.msra.gmra.mrb[56].mxu1 %vm265_vm0, %v10639_v22 }
 0xc2c   : > { %9630 = vmatprep.mubr.msk.bf16.mxu1 %vm265_vm0, %v10644_v25 }
 0xc33   : > { %9631 = vmatmul.mubr.msk.bf16.gmra.mrb[60].mxu1 %vm265_vm0, %v10666_v35 }
 0xc34   : > { %9634 = vmatprep.mubr.msk.bf16.mxu1 %vm265_vm0, %v13693_v21 }
 0xc3b   : > { %9635 = vmatmul.mubr.msk.bf16.gmra.mrb[64].mxu1 %vm265_vm0, %v13694_v9 }
 0xc3c   : > { %9638 = vmatprep.mubr.msk.bf16.mxu1 %vm265_vm0, %v13695_v53 }
 0xc43   : > { %9639 = vmatmul.mubr.msk.bf16.gmra.mrb[68].mxu1 %vm265_vm0, %v13696_v4 }
 0xc44   : > { %9642 = vmatprep.mubr.msk.bf16.mxu1 %vm265_vm0, %v13697_v32 }
 0xc4b   : > { %9643 = vmatmul.mubr.msk.bf16.gmra.mrb[72].mxu1 %vm265_vm0, %v13698_v52 }
 0xc4c   : > { %9646 = vmatprep.mubr.msk.bf16.mxu1 %vm265_vm0, %v13699_v16 }
 0xc53   : > { %9647 = vmatmul.mubr.msk.bf16.gmra.mrb[76].mxu1 %vm265_vm0, %v13700_v31 }
 0xc54   : > { %9650 = vmatprep.mubr.msk.bf16.mxu1 %vm265_vm0, %v13701_v48 }
 0xc5b   : > { %9651 = vmatmul.mubr.msk.bf16.gmra.mrb[80].mxu1 %vm265_vm0, %v13702_v56 }
 0xc5c   : > { %9654 = vmatprep.mubr.msk.bf16.mxu1 %vm265_vm0, %v13703_v43 }
 0xc63   : > { %9655 = vmatmul.mubr.msk.bf16.gmra.mrb[84].mxu1 %vm265_vm0, %v13704_v28 }
 0xc7e   : > { %v9468_v39 = vpop.f32.mrb[216].mxu0 }
 0xc7f   : > { %v5339_v38 = vpop.f32.mrb[217].mxu0 }
 0xc80   : > { %v9469_v2 = vpop.f32.mrb[218].mxu0 }
 0xc81   : > { %v5602_v54 = vpack.c.bf16 %v9469_v2, %v9468_v39  ;;  %v5342_v15 = vpop.f32.mrb[219].mxu0 }
 0xc82   : > { %v5601_v61 = vpack.c.bf16 %v5342_v15, %v5339_v38 }
 0xc84   : > { %9524 = vmatprep.mubr.msk.bf16.mxu0 %vm863_vm1, %v5601_v61 }
 0xc85   : > { %9525 = vmatmul.mubr.msk.bf16.vlgmr.msra.gmra.mrb[72].mxu0 %vm863_vm1, %v5602_v54 }
 0xc86   : > { %v9472_v0 = vpop.f32.mrb[220].mxu0  ;;  %9591 = vmatpush3.bf16.msra.mxu0 %v10035_v37 }
 0xc87   : > { %v5355_v27 = vpop.f32.mrb[221].mxu0 }
 0xc88   : > { %v9473_v33 = vpop.f32.mrb[222].mxu0 }
 0xc89   : > { %v5604_v55 = vpack.c.bf16 %v9473_v33, %v9472_v0  ;;  %v5358_v12 = vpop.f32.mrb[223].mxu0 }
 0xc8a   : > { %v5603_v29 = vpack.c.bf16 %v5358_v12, %v5355_v27 }
 0xc8c   : > { %9528 = vmatprep.mubr.msk.bf16.mxu0 %vm863_vm1, %v5603_v29 }
 0xc8d   : > { %9529 = vmatmul.mubr.msk.bf16.gmra.mrb[76].mxu0 %vm863_vm1, %v5604_v55 }
 0xc8e   : > { %v9484_v49 = vpop.f32.mrb[8].mxu1 }
 0xc8f   : > { %v5416_v14 = vpop.f32.mrb[9].mxu1 }
 0xc90   : > { %v9485_v13 = vpop.f32.mrb[10].mxu1 }
 0xc91   : > { %v5606_v26 = vpack.c.bf16 %v9485_v13, %v9484_v49  ;;  %v5419_v36 = vpop.f32.mrb[11].mxu1 }
 0xc92   : > { %v5605_v20 = vpack.c.bf16 %v5419_v36, %v5416_v14 }
 0xc94   : > { %9532 = vmatprep.mubr.msk.bf16.mxu0 %vm863_vm1, %v5605_v20 }
 0xc95   : > { %9533 = vmatmul.mubr.msk.bf16.gmra.mrb[80].mxu0 %vm863_vm1, %v5606_v26 }
 0xc96   : > { %v9488_v57 = vpop.f32.mrb[12].mxu1 }
 0xc97   : > { %v5432_v1 = vpop.f32.mrb[13].mxu1 }
 0xc98   : > { %v9489_v60 = vpop.f32.mrb[14].mxu1 }
 0xc99   : > { %v5608_v11 = vpack.c.bf16 %v9489_v60, %v9488_v57  ;;  %v5435_v50 = vpop.f32.mrb[15].mxu1 }
 0xc9a   : > { %v5607_v24 = vpack.c.bf16 %v5435_v50, %v5432_v1 }
 0xc9c   : > { %9536 = vmatprep.mubr.msk.bf16.mxu0 %vm863_vm1, %v5607_v24 }
 0xc9d   : > { %9537 = vmatmul.mubr.msk.bf16.gmra.mrb[84].mxu0 %vm863_vm1, %v5608_v11 }
 0xc9e   : > { %v9500_v10 = vpop.f32.mrb[224].mxu0 }
 0xc9f   : > { %v5493_v5 = vpop.f32.mrb[225].mxu0 }
 0xca0   : > { %v9501_v51 = vpop.f32.mrb[226].mxu0 }
 0xca1   : > { %v5610_v30 = vpack.c.bf16 %v9501_v51, %v9500_v10  ;;  %v5496_v19 = vpop.f32.mrb[227].mxu0 }
 0xca2   : > { %v5609_v7 = vpack.c.bf16 %v5496_v19, %v5493_v5 }
 0xca4   : > { %9540 = vmatprep.mubr.msk.bf16.mxu0 %vm863_vm1, %v5609_v7 }
 0xca5   : > { %9541 = vmatmul.mubr.msk.bf16.gmra.mrb[88].mxu0 %vm863_vm1, %v5610_v30 }
 0xca6   : > { %v9504_v58 = vpop.f32.mrb[228].mxu0 }
 0xca7   : > { %v5509_v59 = vpop.f32.mrb[229].mxu0 }
 0xca8   : > { %v9505_v44 = vpop.f32.mrb[230].mxu0 }
 0xca9   : > { %v5612_v42 = vpack.c.bf16 %v9505_v44, %v9504_v58  ;;  %v5512_v17 = vpop.f32.mrb[231].mxu0 }
 0xcaa   : > { %v5611_v40 = vpack.c.bf16 %v5512_v17, %v5509_v59 }
 0xcac   : > { %9544 = vmatprep.mubr.msk.bf16.mxu0 %vm863_vm1, %v5611_v40 }
 0xcad   : > { %9545 = vmatmul.mubr.msk.bf16.gmra.mrb[92].mxu0 %vm863_vm1, %v5612_v42 }
 0xcae   : > { %v9516_v3 = vpop.f32.mrb[16].mxu1 }
 0xcaf   : > { %v5570_v8 = vpop.f32.mrb[17].mxu1 }
 0xcb0   : > { %v9517_v23 = vpop.f32.mrb[18].mxu1 }
 0xcb1   : > { %v5614_v62 = vpack.c.bf16 %v9517_v23, %v9516_v3  ;;  %v5573_v47 = vpop.f32.mrb[19].mxu1 }
 0xcb2   : > { %v5613_v41 = vpack.c.bf16 %v5573_v47, %v5570_v8 }
 0xcb4   : > { %9548 = vmatprep.mubr.msk.bf16.mxu0 %vm863_vm1, %v5613_v41 }
 0xcb5   : > { %9549 = vmatmul.mubr.msk.bf16.gmra.mrb[96].mxu0 %vm863_vm1, %v5614_v62 }
 0xcb6   : > { %v9520_v34 = vpop.f32.mrb[20].mxu1 }
 0xcb7   : > { %v5586_v45 = vpop.f32.mrb[21].mxu1 }
 0xcb8   : > { %v9521_v46 = vpop.f32.mrb[22].mxu1 }
 0xcb9   : > { %v5616_v37 = vpack.c.bf16 %v9521_v46, %v9520_v34  ;;  %v5589_v6 = vpop.f32.mrb[23].mxu1 }
 0xcba   : > { %v5615_v63 = vpack.c.bf16 %v5589_v6, %v5586_v45 }
 0xcbc   : > { %9552 = vmatprep.mubr.msk.bf16.mxu0 %vm863_vm1, %v5615_v63 }
 0xcbd   : > { %9553 = vmatmul.mubr.msk.bf16.gmra.mrb[100].mxu0 %vm863_vm1, %v5616_v37 }
 0xcbe   : > { %9592 = vmatprep.mubr.msk.bf16.mxu0 %vm265_vm0, %v10634_v18  ;;  %v12865_v18 = vpop.f32.mrb[24].mxu1 }
 0xcc5   : > { %9593 = vmatmul.mubr.msk.bf16.vlgmr.msra.gmra.mrb[232].mxu0 %vm265_vm0, %v10639_v22  ;;  %v5906_v22 = vpop.f32.mrb[25].mxu1 }
 0xcc6   : > { %9596 = vmatprep.mubr.msk.bf16.mxu0 %vm265_vm0, %v10644_v25  ;;  %v12867_v25 = vpop.f32.mrb[26].mxu1 }
 0xccd   : > { %9597 = vmatmul.mubr.msk.bf16.gmra.mrb[236].mxu0 %vm265_vm0, %v10666_v35  ;;  %v6374_v35 = vpack.c.bf16 %v12867_v25, %v12865_v18 }
 0xcce   : > { %9600 = vmatprep.mubr.msk.bf16.mxu0 %vm265_vm0, %v13693_v21  ;;  %v5909_v21 = vpop.f32.mrb[27].mxu1 }
 0xcd5   : > { %9601 = vmatmul.mubr.msk.bf16.gmra.mrb[240].mxu0 %vm265_vm0, %v13694_v9  ;;  %v6373_v9 = vpack.c.bf16 %v5909_v21, %v5906_v22 }
 0xcd6   : > { %9604 = vmatprep.mubr.msk.bf16.mxu0 %vm265_vm0, %v13695_v53  ;;  %v12872_v53 = vpop.f32.mrb[28].mxu1 }
 0xcdd   : > { %9605 = vmatmul.mubr.msk.bf16.gmra.mrb[244].mxu0 %vm265_vm0, %v13696_v4  ;;  %v12874_v4 = vpop.f32.mrb[29].mxu1 }
 0xcde   : > { %9608 = vmatprep.mubr.msk.bf16.mxu0 %vm265_vm0, %v13697_v32  ;;  %v12876_v32 = vpop.f32.mrb[30].mxu1 }
 0xcdf   : > { %v6376_v39 = vpack.c.bf16 %v12876_v32, %v12872_v53  ;;  %v12880_v38 = vpop.f32.mrb[31].mxu1 }
 0xce0   : > { %v6375_v2 = vpack.c.bf16 %v12880_v38, %v12874_v4  ;;  %v12884_v54 = vpop.f32.mrb[32].mxu1 }
 0xce1   : > { %v5938_v15 = vpop.f32.mrb[33].mxu1 }
 0xce2   : > { %v12886_v61 = vpop.f32.mrb[34].mxu1 }
 0xce5   : > { %9609 = vmatmul.mubr.msk.bf16.gmra.mrb[248].mxu0 %vm265_vm0, %v13698_v52  ;;  %v6378_v52 = vpack.c.bf16 %v12886_v61, %v12884_v54 }
 0xce6   : > { %9612 = vmatprep.mubr.msk.bf16.mxu0 %vm265_vm0, %v13699_v16  ;;  %v5941_v16 = vpop.f32.mrb[35].mxu1 }
 0xce7   : > { %v6377_v0 = vpack.c.bf16 %v5941_v16, %v5938_v15  ;;  %v12891_v27 = vpop.f32.mrb[36].mxu1 }
 0xce8   : > { %v12893_v33 = vpop.f32.mrb[37].mxu1 }
 0xce9   : > { %9682 = vmatprep.mubr.msk.bf16.mxu1 %vm863_vm1, %v6377_v0  ;;  %v12895_v55 = vpop.f32.mrb[38].mxu1 }
 0xcea   : > { %v6380_v12 = vpack.c.bf16 %v12895_v55, %v12891_v27  ;;  %v12899_v29 = vpop.f32.mrb[39].mxu1 }
 0xced   : > { %9613 = vmatmul.mubr.msk.bf16.gmra.mrb[252].mxu0 %vm265_vm0, %v13700_v31  ;;  %v6379_v31 = vpack.c.bf16 %v12899_v29, %v12893_v33 }
 0xcee   : > { %9616 = vmatprep.mubr.msk.bf16.mxu0 %vm265_vm0, %v13701_v48  ;;  %v12903_v48 = vpop.f32.mrb[40].mxu1 }
 0xcef   : > { %v12905_v49 = vpop.f32.mrb[41].mxu1 }
 0xcf0   : > { %v12907_v14 = vpop.f32.mrb[42].mxu1 }
 0xcf1   : > { %v6382_v13 = vpack.c.bf16 %v12907_v14, %v12903_v48  ;;  %v12911_v26 = vpop.f32.mrb[43].mxu1 }
 0xcf2   : > { %v6381_v36 = vpack.c.bf16 %v12911_v26, %v12905_v49  ;;  %v12915_v20 = vpop.f32.mrb[44].mxu1 }
 0xcf5   : > { %9617 = vmatmul.mubr.msk.bf16.gmra.mrb[0].mxu0 %vm265_vm0, %v13702_v56  ;;  %v12917_v56 = vpop.f32.mrb[45].mxu1 }
 0xcf6   : > { %9620 = vmatprep.mubr.msk.bf16.mxu0 %vm265_vm0, %v13703_v43  ;;  %v12919_v43 = vpop.f32.mrb[46].mxu1 }
 0xcf7   : > { %v12923_v1 = vpop.f32.mrb[47].mxu1  ;;  %v13705_v55 = vpack.c.bf16 %v12919_v43, %v12915_v20 }
 0xcf8   : > { %v6383_v60 = vpack.c.bf16 %v12923_v1, %v12917_v56  ;;  %v12927_v11 = vpop.f32.mrb[48].mxu1 }
 0xcf9   : > { %v12929_v50 = vpop.f32.mrb[49].mxu1 }
 0xcfa   : > { %v12931_v24 = vpop.f32.mrb[50].mxu1 }
 0xcfb   : > { %v12935_v10 = vpop.f32.mrb[51].mxu1 }
 0xcfc   : > { %v6385_v5 = vpack.c.bf16 %v12935_v10, %v12929_v50  ;;  %v12939_v51 = vpop.f32.mrb[52].mxu1 }
 0xcfd   : > { %9621 = vmatmul.mubr.msk.bf16.gmra.mrb[4].mxu0 %vm265_vm0, %v13704_v28  ;;  %v12941_v30 = vpop.f32.mrb[53].mxu1 }
 0xcfe   : > { %9666 = vmatprep.mubr.msk.bf16.mxu0 %vm863_vm1, %v6373_v9  ;;  %v12943_v19 = vpop.f32.mrb[54].mxu1 }
 0xcff   : > { %v12947_v58 = vpop.f32.mrb[55].mxu1 }
 0xd00   : > { %v9628_v44 = vpop.f32.mrb[56].mxu1  ;;  %v13707_v29 = vpack.c.bf16 %v12947_v58, %v12941_v30 }
 0xd01   : > { %v6246_v42 = vpop.f32.mrb[57].mxu1 }
 0xd02   : > { %v9629_v17 = vpop.f32.mrb[58].mxu1 }
 0xd03   : > { %v12951_v40 = vpack.c.bf16 %v9629_v17, %v9628_v44  ;;  %v6249_v3 = vpop.f32.mrb[59].mxu1 }
 0xd04   : > { %v12953_v8 = vpack.c.bf16 %v6249_v3, %v6246_v42 }
 0xd06   : > { %v9632_v23 = vpop.f32.mrb[60].mxu1 }
 0xd07   : > { %v6262_v62 = vpop.f32.mrb[61].mxu1 }
 0xd08   : > { %v9633_v47 = vpop.f32.mrb[62].mxu1 }
 0xd09   : > { %v12955_v41 = vpack.c.bf16 %v9633_v47, %v9632_v23  ;;  %v6265_v34 = vpop.f32.mrb[63].mxu1 }
 0xd0a   : > { %v12957_v45 = vpack.c.bf16 %v6265_v34, %v6262_v62 }
 0xd0e   : > { %v9636_v46 = vpop.f32.mrb[64].mxu1 }
 0xd0f   : > { %v6278_v37 = vpop.f32.mrb[65].mxu1 }
 0xd10   : > { %v9637_v6 = vpop.f32.mrb[66].mxu1 }
 0xd11   : > { %v12959_v63 = vpack.c.bf16 %v9637_v6, %v9636_v46  ;;  %v6281_v22 = vpop.f32.mrb[67].mxu1 }
 0xd12   : > { %v12961_v21 = vpack.c.bf16 %v6281_v22, %v6278_v37 }
 0xd16   : > { %v9640_v9 = vpop.f32.mrb[68].mxu1 }
 0xd17   : > { %v6294_v15 = vpop.f32.mrb[69].mxu1 }
 0xd18   : > { %v9641_v16 = vpop.f32.mrb[70].mxu1 }
 0xd19   : > { %v12963_v0 = vpack.c.bf16 %v9641_v16, %v9640_v9  ;;  %v6297_v44 = vpop.f32.mrb[71].mxu1 }
 0xd1a   : > { %v12965_v42 = vpack.c.bf16 %v6297_v44, %v6294_v15 }
 0xd1e   : > { %v12967_v17 = vpop.f32.mrb[72].mxu1 }
 0xd1f   : > { %v6310_v48 = vpop.f32.mrb[73].mxu1 }
 0xd20   : > { %v9645_v14 = vpop.f32.mrb[74].mxu1 }
 0xd21   : > { %v13074_v20 = vpack.c.bf16 %v9645_v14, %v12967_v17 }
 0xd98   : > { %v9594_v3 = vpop.f32.mrb[232].mxu0 }
 0xd99   : > { %v6076_v23 = vpop.f32.mrb[233].mxu0 }
 0xd9a   : > { %v9595_v62 = vpop.f32.mrb[234].mxu0 }
 0xd9b   : > { %v6390_v47 = vpack.c.bf16 %v9595_v62, %v9594_v3  ;;  %v6079_v34 = vpop.f32.mrb[235].mxu0 }
 0xd9c   : > { %v6389_v46 = vpack.c.bf16 %v6079_v34, %v6076_v23 }
 0xd9d   : > { %v6437_v7 = vsel %vm863_vm1, %v6390_v47, 0 }
 0xd9e   : > { %v6434_v6 = vsel %vm863_vm1, %v6389_v46, 0  ;;  %10001 = vmatprep.subr.msk.bf16.mxu0 %vm863_vm1, %v6389_v46 }
 0xd9f   : > { %9659 = vmatpush3.bf16.xpose.msra.mxu0 %v6434_v6 }
 0xda0   : > { %v9598_v37 = vpop.f32.mrb[236].mxu0  ;;  %10002 = vmatprep.subr.msk.bf16.mxu0 %vm863_vm1, %v6390_v47 }
 0xda1   : > { %v6092_v22 = vpop.f32.mrb[237].mxu0 }
 0xda2   : > { %v9599_v9 = vpop.f32.mrb[238].mxu0 }
 0xda3   : > { %v6392_v15 = vpack.c.bf16 %v9599_v9, %v9598_v37  ;;  %v6095_v16 = vpop.f32.mrb[239].mxu0 }
 0xda4   : > { %v6391_v44 = vpack.c.bf16 %v6095_v16, %v6092_v22 }
 0xda5   : > { %v6443_v16 = vsel %vm863_vm1, %v6392_v15, 0 }
 0xda6   : > { %v6440_v6 = vsel %vm863_vm1, %v6391_v44, 0 }
 0xda7   : > { %9661 = vmatpush3.bf16.xpose.msra.mxu0 %v6437_v7 }
 0xda8   : > { %v9602_v59 = vpop.f32.mrb[240].mxu0  ;;  %10003 = vmatprep.subr.msk.bf16.mxu0 %vm863_vm1, %v6391_v44 }
 0xda9   : > { %v6108_v3 = vpop.f32.mrb[241].mxu0 }
 0xdaa   : > { %v9603_v23 = vpop.f32.mrb[242].mxu0 }
 0xdab   : > { %v6394_v62 = vpack.c.bf16 %v9603_v23, %v9602_v59  ;;  %v6111_v34 = vpop.f32.mrb[243].mxu0 }
 0xdac   : > { %v6393_v46 = vpack.c.bf16 %v6111_v34, %v6108_v3 }
 0xdad   : > { %v6526_v44 = vsel %vm863_vm1, %v6394_v62, 0 }
 0xdae   : > { %v6523_v28 = vsel %vm863_vm1, %v6393_v46, 0  ;;  %10005 = vmatprep.subr.msk.bf16.mxu1 %vm863_vm1, %v6393_v46 }
 0xdaf   : > { %9663 = vmatpush3.bf16.xpose.msra.mxu0 %v6440_v6  ;;  %9675 = vmatpush3.bf16.xpose.msra.mxu1 %v6523_v28 }
 0xdb0   : > { %10004 = vmatprep.subr.msk.bf16.mxu0 %vm863_vm1, %v6392_v15  ;;  %10006 = vmatprep.subr.msk.bf16.mxu1 %vm863_vm1, %v6394_v62  ;;  %v9606_v7 = vpop.f32.mrb[244].mxu0 }
 0xdb1   : > { %v6124_v47 = vpop.f32.mrb[245].mxu0 }
 0xdb2   : > { %v9607_v37 = vpop.f32.mrb[246].mxu0 }
 0xdb3   : > { %v6396_v22 = vpack.c.bf16 %v9607_v37, %v9606_v7  ;;  %v6127_v9 = vpop.f32.mrb[247].mxu0 }
 0xdb4   : > { %v6395_v59 = vpack.c.bf16 %v6127_v9, %v6124_v47 }
 0xdb6   : > { %v6529_v57 = vsel %vm863_vm1, %v6395_v59, 0 }
 0xdb7   : > { %9665 = vmatpush3.bf16.xpose.msra.mxu0 %v6443_v16  ;;  %9677 = vmatpush3.bf16.xpose.msra.mxu1 %v6526_v44 }
 0xdb8   : > { %v9610_v3 = vpop.f32.mrb[248].mxu0  ;;  %10007 = vmatprep.subr.msk.bf16.mxu1 %vm863_vm1, %v6395_v59 }
 0xdb9   : > { %v6140_v28 = vpop.f32.mrb[249].mxu0 }
 0xdba   : > { %v9611_v23 = vpop.f32.mrb[250].mxu0 }
 0xdbb   : > { %v6398_v34 = vpack.c.bf16 %v9611_v23, %v9610_v3  ;;  %v6143_v46 = vpop.f32.mrb[251].mxu0 }
 0xdbc   : > { %v6397_v6 = vpack.c.bf16 %v6143_v46, %v6140_v28 }
 0xdbe   : > { %v6612_v7 = vsel %vm863_vm1, %v6397_v6, 0  ;;  %9667 = vmatmul.mubr.msk.bf16.vlgmr.msra.gmra.mrb[8].mxu0 %vm863_vm1, %v6374_v35  ;;  %10009 = vmatprep.subr.msk.bf16.mxu0 %vm863_vm1, %v6397_v6  ;;  %v6532_v35 = vsel %vm863_vm1, %v6396_v22, 0 }
 0xdbf   : > { %9679 = vmatpush3.bf16.xpose.msra.mxu1 %v6529_v57  ;;  %9691 = vmatpush3.bf16.xpose.msra.mxu0 %v6612_v7  ;;  %v6615_v57 = vsel %vm863_vm1, %v6398_v34, 0 }
 0xdc0   : > { %v9614_v15 = vpop.f32.mrb[252].mxu0  ;;  %9670 = vmatprep.mubr.msk.bf16.mxu0 %vm863_vm1, %v6375_v2  ;;  %10008 = vmatprep.subr.msk.bf16.mxu1 %vm863_vm1, %v6396_v22 }
 0xdc1   : > { %v6156_v62 = vpop.f32.mrb[253].mxu0  ;;  %10010 = vmatprep.subr.msk.bf16.mxu0 %vm863_vm1, %v6398_v34 }
 0xdc2   : > { %v9615_v47 = vpop.f32.mrb[254].mxu0 }
 0xdc3   : > { %v6400_v37 = vpack.c.bf16 %v9615_v47, %v9614_v15  ;;  %v6159_v18 = vpop.f32.mrb[255].mxu0 }
 0xdc4   : > { %v6399_v25 = vpack.c.bf16 %v6159_v18, %v6156_v62 }
 0xdc6   : > { %9671 = vmatmul.mubr.msk.bf16.gmra.mrb[12].mxu0 %vm863_vm1, %v6376_v39  ;;  %v6618_v16 = vsel %vm863_vm1, %v6399_v25, 0 }
 0xdc7   : > { %9681 = vmatpush3.bf16.xpose.msra.mxu1 %v6532_v35  ;;  %9693 = vmatpush3.bf16.xpose.msra.mxu0 %v6615_v57 }
 0xdc8   : > { %v9618_v4 = vpop.f32.mrb[0].mxu0  ;;  %10011 = vmatprep.subr.msk.bf16.mxu0 %vm863_vm1, %v6399_v25  ;;  %9698 = vmatprep.mubr.msk.bf16.mxu0 %vm863_vm1, %v6381_v36 }
 0xdc9   : > { %v6172_v38 = vpop.f32.mrb[1].mxu0 }
 0xdca   : > { %v9619_v2 = vpop.f32.mrb[2].mxu0 }
 0xdcb   : > { %v6402_v22 = vpack.c.bf16 %v9619_v2, %v9618_v4  ;;  %v6175_v9 = vpop.f32.mrb[3].mxu0 }
 0xdcc   : > { %v6401_v59 = vpack.c.bf16 %v6175_v9, %v6172_v38 }
 0xdcd   : > { %v6704_v36 = vsel %vm863_vm1, %v6402_v22, 0 }
 0xdce   : > { %v6701_v53 = vsel %vm863_vm1, %v6401_v59, 0  ;;  %9683 = vmatmul.mubr.msk.bf16.vlgmr.msra.gmra.mrb[88].mxu1 %vm863_vm1, %v6378_v52  ;;  %10013 = vmatprep.subr.msk.bf16.mxu1 %vm863_vm1, %v6401_v59  ;;  %v6621_v52 = vsel %vm863_vm1, %v6400_v37, 0 }
 0xdcf   : > { %9695 = vmatpush3.bf16.xpose.msra.mxu0 %v6618_v16  ;;  %9707 = vmatpush3.bf16.xpose.msra.mxu1 %v6701_v53 }
 0xdd0   : > { %9686 = vmatprep.mubr.msk.bf16.mxu1 %vm863_vm1, %v6379_v31  ;;  %10012 = vmatprep.subr.msk.bf16.mxu0 %vm863_vm1, %v6400_v37  ;;  %v9622_v32 = vpop.f32.mrb[4].mxu0  ;;  %v13708_v31 = vpack.c.bf16 %v12943_v19, %v12939_v51 }
 0xdd1   : > { %10014 = vmatprep.subr.msk.bf16.mxu1 %vm863_vm1, %v6402_v22  ;;  %v6188_v39 = vpop.f32.mrb[5].mxu0 }
 0xdd2   : > { %v9623_v49 = vpop.f32.mrb[6].mxu0 }
 0xdd3   : > { %v6404_v26 = vpack.c.bf16 %v9623_v49, %v9622_v32  ;;  %v6191_v54 = vpop.f32.mrb[7].mxu0 }
 0xdd4   : > { %v6403_v61 = vpack.c.bf16 %v6191_v54, %v6188_v39 }
 0xdd5   : > { %v6710_v27 = vsel %vm863_vm1, %v6404_v26, 0 }
 0xdd6   : > { %9687 = vmatmul.mubr.msk.bf16.gmra.mrb[92].mxu1 %vm863_vm1, %v6380_v12  ;;  %v6707_v33 = vsel %vm863_vm1, %v6403_v61, 0  ;;  %v13706_v12 = vpack.c.bf16 %v12931_v24, %v12927_v11 }
 0xdd7   : > { %9697 = vmatpush3.bf16.xpose.msra.mxu0 %v6621_v52  ;;  %9709 = vmatpush3.bf16.xpose.msra.mxu1 %v6704_v36 }
 0xdd8   : > { %10015 = vmatprep.subr.msk.bf16.mxu1 %vm863_vm1, %v6403_v61  ;;  %9714 = vmatprep.mubr.msk.bf16.mxu1 %vm863_vm1, %v6385_v5 }
 0xdd9   : > { %9722 = vmatprep.subr.bf16.mxu0 %v12953_v8 }
 0xdde   : > { %9699 = vmatmul.mubr.msk.bf16.vlgmr.msra.gmra.mrb[16].mxu0 %vm863_vm1, %v6382_v13  ;;  %v6313_v13 = vpop.f32.mrb[75].mxu1 }
 0xddf   : > { %9711 = vmatpush3.bf16.xpose.msra.mxu1 %v6707_v33  ;;  %9702 = vmatprep.mubr.msk.bf16.mxu0 %vm863_vm1, %v6383_v60  ;;  %v13076_v56 = vpack.c.bf16 %v6313_v13, %v6310_v48  ;;  %v9648_v43 = vpop.f32.mrb[76].mxu1 }
 0xde0   : > { %10016 = vmatprep.subr.msk.bf16.mxu1 %vm863_vm1, %v6404_v26  ;;  %9723 = vmatpush3.bf16.msra.mxu0 %v12953_v8  ;;  %v6326_v1 = vpop.f32.mrb[77].mxu1 }
 0xde1   : > { %9724 = vmatprep.subr.bf16.mxu0 %v12951_v40  ;;  %v9649_v60 = vpop.f32.mrb[78].mxu1 }
 0xde2   : > { %v6329_v11 = vpop.f32.mrb[79].mxu1  ;;  %v13079_v50 = vpack.c.bf16 %v9649_v60, %v9648_v43 }
 0xde3   : > { %v13081_v24 = vpack.c.bf16 %v6329_v11, %v6326_v1  ;;  %v9652_v10 = vpop.f32.mrb[80].mxu1 }
 0xde4   : > { %9725 = vmatpush3.bf16.msra.mxu0 %v12951_v40  ;;  %v6342_v5 = vpop.f32.mrb[81].mxu1 }
 0xde5   : > { %9726 = vmatprep.subr.bf16.mxu0 %v12957_v45  ;;  %v9653_v51 = vpop.f32.mrb[82].mxu1 }
 0xde6   : > { %9703 = vmatmul.mubr.msk.bf16.gmra.mrb[20].mxu0 %vm863_vm1, %v13705_v55  ;;  %v6345_v30 = vpop.f32.mrb[83].mxu1  ;;  %v13083_v19 = vpack.c.bf16 %v9653_v51, %v9652_v10 }
 0xde7   : > { %9713 = vmatpush3.bf16.xpose.msra.mxu1 %v6710_v27  ;;  %v13085_v58 = vpack.c.bf16 %v6345_v30, %v6342_v5  ;;  %v9656_v40 = vpop.f32.mrb[84].mxu1 }
 0xde8   : > { %9727 = vmatpush3.bf16.msra.mxu0 %v12957_v45  ;;  %9738 = vmatprep.subr.bf16.mxu1 %v12961_v21  ;;  %v6358_v8 = vpop.f32.mrb[85].mxu1 }
 0xde9   : > { %9728 = vmatprep.subr.bf16.mxu0 %v12955_v41 }
 0xdec   : > { %9729 = vmatpush3.bf16.msra.mxu0 %v12955_v41  ;;  %v9657_v41 = vpop.f32.mrb[86].mxu1 }
 0xded   : > { %9754 = vmatprep.subr.bf16.mxu0 %v13076_v56  ;;  %v6361_v45 = vpop.f32.mrb[87].mxu1 }
 0xdee   : > { %9715 = vmatmul.mubr.msk.bf16.vlgmr.msra.gmra.mrb[96].mxu1 %vm863_vm1, %v13706_v12 }
 0xdef   : > { %9718 = vmatprep.mubr.msk.bf16.mxu1 %vm863_vm1, %v13707_v29  ;;  %9739 = vmatpush3.bf16.msra.mxu1 %v12961_v21  ;;  %v13090_v21 = vpack.c.bf16 %v6361_v45, %v6358_v8 }
 0xdf0   : > { %9740 = vmatprep.subr.bf16.mxu1 %v12959_v63 }
 0xdf3   : > { %9741 = vmatpush3.bf16.msra.mxu1 %v12959_v63  ;;  %v13088_v63 = vpack.c.bf16 %v9657_v41, %v9656_v40 }
 0xdf4   : > { %9742 = vmatprep.subr.bf16.mxu1 %v12965_v42 }
 0xdf6   : > { %9719 = vmatmul.mubr.msk.bf16.gmra.mrb[100].mxu1 %vm863_vm1, %v13708_v31 }
 0xdf7   : > { %9743 = vmatpush3.bf16.msra.mxu1 %v12965_v42 }
 0xdf8   : > { %9744 = vmatprep.subr.bf16.mxu1 %v12963_v0 }
 0xdfb   : > { %9745 = vmatpush3.bf16.msra.mxu1 %v12963_v0 }
 0xdfc   : > { %9770 = vmatprep.subr.bf16.mxu1 %v13085_v58 }
 0xe91   : > { %v13092_v0 = vpop.f32.mrb[8].mxu0 }
 0xe92   : > { %v13094_v42 = vpop.f32.mrb[9].mxu0  ;;  %v6783_v23 = vsel %vm1220_vm2, %v13092_v0, -inf }
 0xe93   : > { %v13096_v17 = vpop.f32.mrb[10].mxu0  ;;  %v6777_v44 = vsel %vm1220_vm2, %v13094_v42, -inf }
 0xe94   : > { %6778 = vmax.xlane.f32.xlu0 %v6777_v44  ;;  %v13100_v3 = vpop.f32.mrb[11].mxu0  ;;  %v6786_v46 = vsel %vm1220_vm2, %v13096_v17, -inf }
 0xe95   : > { %v6780_v28 = vsel %vm1220_vm2, %v13100_v3, -inf }
 0xe96   : > { %6781 = vmax.xlane.f32.xlu1 %v6780_v28 }
 0xe98   : > { %6784 = vmax.xlane.f32.xlu0 %v6783_v23 }
 0xe99   : > { %v13106_v34 = vpop.f32.mrb[12].mxu0 }
 0xe9a   : > { %6787 = vmax.xlane.f32.xlu1 %v6786_v46  ;;  %v13110_v6 = vpop.f32.mrb[13].mxu0  ;;  %v6795_v37 = vsel %vm1220_vm2, %v13106_v34, -inf }
 0xe9b   : > { %v13112_v7 = vpop.f32.mrb[14].mxu0  ;;  %v6789_v15 = vsel %vm1220_vm2, %v13110_v6, -inf }
 0xe9c   : > { %6790 = vmax.xlane.f32.xlu0 %v6789_v15  ;;  %v13116_v62 = vpop.f32.mrb[15].mxu0  ;;  %v6798_v25 = vsel %vm1220_vm2, %v13112_v7, -inf }
 0xe9d   : > { %v6792_v47 = vsel %vm1220_vm2, %v13116_v62, -inf }
 0xe9e   : > { %6793 = vmax.xlane.f32.xlu1 %v6792_v47 }
 0xea0   : > { %6796 = vmax.xlane.f32.xlu0 %v6795_v37 }
 0xea1   : > { %v13122_v18 = vpop.f32.mrb[88].mxu1 }
 0xea2   : > { %v13126_v35 = vpop.f32.mrb[89].mxu1  ;;  %6799 = vmax.xlane.f32.xlu1 %v6798_v25  ;;  %v6807_v22 = vsel %vm1220_vm2, %v13122_v18, -inf }
 0xea3   : > { %v13128_v57 = vpop.f32.mrb[90].mxu1  ;;  %v6801_v4 = vsel %vm1220_vm2, %v13126_v35, -inf }
 0xea4   : > { %v13132_v38 = vpop.f32.mrb[91].mxu1  ;;  %6802 = vmax.xlane.f32.xlu0 %v6801_v4  ;;  %v6810_v59 = vsel %vm1220_vm2, %v13128_v57, -inf }
 0xea5   : > { %v6804_v2 = vsel %vm1220_vm2, %v13132_v38, -inf }
 0xea6   : > { %6805 = vmax.xlane.f32.xlu1 %v6804_v2 }
 0xea8   : > { %6808 = vmax.xlane.f32.xlu0 %v6807_v22 }
 0xea9   : > { %v13138_v9 = vpop.f32.mrb[92].mxu1 }
 0xeaa   : > { %v13142_v16 = vpop.f32.mrb[93].mxu1  ;;  %6811 = vmax.xlane.f32.xlu1 %v6810_v59  ;;  %v6819_v26 = vsel %vm1220_vm2, %v13138_v9, -inf }
 0xeab   : > { %v13144_v53 = vpop.f32.mrb[94].mxu1  ;;  %v6813_v32 = vsel %vm1220_vm2, %v13142_v16, -inf }
 0xeac   : > { %v13148_v39 = vpop.f32.mrb[95].mxu1  ;;  %6814 = vmax.xlane.f32.xlu0 %v6813_v32  ;;  %v6822_v61 = vsel %vm1220_vm2, %v13144_v53, -inf }
 0xead   : > { %v6816_v49 = vsel %vm1220_vm2, %v13148_v39, -inf }
 0xeae   : > { %6817 = vmax.xlane.f32.xlu1 %v6816_v49 }
 0xeb0   : > { %6820 = vmax.xlane.f32.xlu0 %v6819_v26 }
 0xeb1   : > { %v13154_v54 = vpop.f32.mrb[16].mxu0 }
 0xeb2   : > { %6823 = vmax.xlane.f32.xlu1 %v6822_v61  ;;  %v13158_v52 = vpop.f32.mrb[17].mxu0  ;;  %v6831_v12 = vsel %vm1220_vm2, %v13154_v54, -inf }
 0xeb3   : > { %v13160_v36 = vpop.f32.mrb[18].mxu0  ;;  %v6825_v33 = vsel %vm1220_vm2, %v13158_v52, -inf }
 0xeb4   : > { %6826 = vmax.xlane.f32.xlu0 %v6825_v33  ;;  %v13164_v27 = vpop.f32.mrb[19].mxu0  ;;  %v6834_v31 = vsel %vm1220_vm2, %v13160_v36, -inf }
 0xeb5   : > { %v6828_v55 = vsel %vm1220_vm2, %v13164_v27, -inf }
 0xeb6   : > { %6829 = vmax.xlane.f32.xlu1 %v6828_v55 }
 0xeb8   : > { %6832 = vmax.xlane.f32.xlu0 %v6831_v12 }
 0xeb9   : > { %v13170_v29 = vpop.f32.mrb[20].mxu0 }
 0xeba   : > { %6835 = vmax.xlane.f32.xlu1 %v6834_v31  ;;  %v13174_v48 = vpop.f32.mrb[21].mxu0  ;;  %v6843_v60 = vsel %vm1220_vm2, %v13170_v29, -inf }
 0xebb   : > { %v13176_v14 = vpop.f32.mrb[22].mxu0  ;;  %v6837_v13 = vsel %vm1220_vm2, %v13174_v48, -inf }
 0xebc   : > { %6838 = vmax.xlane.f32.xlu0 %v6837_v13  ;;  %v13180_v43 = vpop.f32.mrb[23].mxu0  ;;  %v6846_v10 = vsel %vm1220_vm2, %v13176_v14, -inf }
 0xebd   : > { %v6840_v1 = vsel %vm1220_vm2, %v13180_v43, -inf }
 0xebe   : > { %6841 = vmax.xlane.f32.xlu1 %v6840_v1 }
 0xec0   : > { %6844 = vmax.xlane.f32.xlu0 %v6843_v60 }
 0xec1   : > { %v13186_v11 = vpop.f32.mrb[96].mxu1 }
 0xec2   : > { %6847 = vmax.xlane.f32.xlu1 %v6846_v10  ;;  %v13190_v5 = vpop.f32.mrb[97].mxu1  ;;  %v6855_v41 = vsel %vm1220_vm2, %v13186_v11, -inf }
 0xec3   : > { %v13192_v51 = vpop.f32.mrb[98].mxu1  ;;  %v6849_v30 = vsel %vm1220_vm2, %v13190_v5, -inf }
 0xec4   : > { %6850 = vmax.xlane.f32.xlu0 %v6849_v30  ;;  %v13196_v40 = vpop.f32.mrb[99].mxu1  ;;  %v6858_v44 = vsel %vm1220_vm2, %v13192_v51, -inf }
 0xec5   : > { %v6852_v8 = vsel %vm1220_vm2, %v13196_v40, -inf }
 0xec6   : > { %6853 = vmax.xlane.f32.xlu1 %v6852_v8 }
 0xec8   : > { %6856 = vmax.xlane.f32.xlu0 %v6855_v41 }
 0xec9   : > { %v13202_v45 = vpop.f32.mrb[100].mxu1 }
 0xeca   : > { %6859 = vmax.xlane.f32.xlu1 %v6858_v44  ;;  %v13206_v28 = vpop.f32.mrb[101].mxu1  ;;  %v6867_v37 = vsel %vm1220_vm2, %v13202_v45, -inf }
 0xecb   : > { %v13208_v23 = vpop.f32.mrb[102].mxu1  ;;  %v6861_v46 = vsel %vm1220_vm2, %v13206_v28, -inf }
 0xecc   : > { %6862 = vmax.xlane.f32.xlu0 %v6861_v46  ;;  %v13212_v15 = vpop.f32.mrb[103].mxu1  ;;  %v6870_v25 = vsel %vm1220_vm2, %v13208_v23, -inf }
 0xecd   : > { %v6864_v47 = vsel %vm1220_vm2, %v13212_v15, -inf }
 0xece   : > { %6865 = vmax.xlane.f32.xlu1 %v6864_v47 }
 0xed0   : > { %6868 = vmax.xlane.f32.xlu0 %v6867_v37 }
 0xed2   : > { %6871 = vmax.xlane.f32.xlu1 %v6870_v25 }
 0xf21   : > { %v6779_v4 = vpop.xlane.xlu0 %6778 }
 0xf22   : > { %v6873_v2 = vsub.f32 %v13094_v42, %v6779_v4 }
 0xf23   : > { %v6782_v22 = vpop.xlane.xlu1 %6781 }
 0xf24   : > { %v6905_v59 = vmul.f32 1.442695, %v6873_v2  ;;  %v6874_v32 = vsub.f32 %v13100_v3, %v6782_v22 }
 0xf25   : > { %v6785_v49 = vpop.xlane.xlu0 %6784 }
 0xf26   : > { %10422 = vpow2.f32 %v6905_v59  ;;  %v6907_v26 = vmul.f32 1.442695, %v6874_v32  ;;  %v6875_v61 = vsub.f32 %v13092_v0, %v6785_v49 }
 0xf27   : > { %v6788_v33 = vpop.xlane.xlu1 %6787 }
 0xf28   : > { %10424 = vpow2.f32 %v6907_v26  ;;  %v6909_v55 = vmul.f32 1.442695, %v6875_v61  ;;  %v6876_v12 = vsub.f32 %v13096_v17, %v6788_v33 }
 0xf29   : > { %v6791_v31 = vpop.xlane.xlu0 %6790 }
 0xf2a   : > { %10426 = vpow2.f32 %v6909_v55  ;;  %v6911_v13 = vmul.f32 1.442695, %v6876_v12  ;;  %v6877_v1 = vsub.f32 %v13110_v6, %v6791_v31 }
 0xf2b   : > { %v6794_v42 = vpop.xlane.xlu1 %6793 }
 0xf2c   : > { %10428 = vpow2.f32 %v6911_v13  ;;  %v6913_v60 = vmul.f32 1.442695, %v6877_v1  ;;  %v6878_v3 = vsub.f32 %v13116_v62, %v6794_v42 }
 0xf2d   : > { %v6797_v10 = vpop.xlane.xlu0 %6796 }
 0xf2e   : > { %10430 = vpow2.f32 %v6913_v60  ;;  %v6915_v30 = vmul.f32 1.442695, %v6878_v3  ;;  %v6879_v0 = vsub.f32 %v13106_v34, %v6797_v10 }
 0xf2f   : > { %v6800_v8 = vpop.xlane.xlu1 %6799 }
 0xf30   : > { %v13227_v41 = vpop.eup %10422  ;;  %10432 = vpow2.f32 %v6915_v30  ;;  %v6917_v17 = vmul.f32 1.442695, %v6879_v0  ;;  %v6880_v44 = vsub.f32 %v13112_v7, %v6800_v8 }
 0xf31   : > { %v6803_v46 = vpop.xlane.xlu0 %6802  ;;  %v6969_v6 = vsel %vm1220_vm2, %v13227_v41, 0.0 }
 0xf32   : > { %v13232_v47 = vpop.eup %10424  ;;  %10434 = vpow2.f32 %v6917_v17  ;;  %v6919_v62 = vmul.f32 1.442695, %v6880_v44  ;;  %v6881_v37 = vsub.f32 %v13126_v35, %v6803_v46  ;;  %6970 = vadd.xlane.f32.xlu0 %v6969_v6 }
 0xf33   : > { %v6806_v25 = vpop.xlane.xlu1 %6805  ;;  %v6972_v34 = vsel %vm1220_vm2, %v13232_v47, 0.0 }
 0xf34   : > { %v13237_v4 = vpop.eup %10426  ;;  %10436 = vpow2.f32 %v6919_v62  ;;  %v6921_v2 = vmul.f32 1.442695, %v6881_v37  ;;  %v6882_v7 = vsub.f32 %v13132_v38, %v6806_v25  ;;  %6973 = vadd.xlane.f32.xlu1 %v6972_v34 }
 0xf35   : > { %v6809_v22 = vpop.xlane.xlu0 %6808  ;;  %v6975_v59 = vsel %vm1220_vm2, %v13237_v4, 0.0 }
 0xf36   : > { %v13242_v32 = vpop.eup %10428  ;;  %10438 = vpow2.f32 %v6921_v2  ;;  %v6923_v35 = vmul.f32 1.442695, %v6882_v7  ;;  %v6883_v49 = vsub.f32 %v13122_v18, %v6809_v22  ;;  %6976 = vadd.xlane.f32.xlu0 %v6975_v59 }
 0xf37   : > { %v6812_v26 = vpop.xlane.xlu1 %6811  ;;  %v6978_v61 = vsel %vm1220_vm2, %v13242_v32, 0.0 }
 0xf38   : > { %v13247_v33 = vpop.eup %10430  ;;  %10440 = vpow2.f32 %v6923_v35  ;;  %v6925_v38 = vmul.f32 1.442695, %v6883_v49  ;;  %v6884_v55 = vsub.f32 %v13128_v57, %v6812_v26  ;;  %6979 = vadd.xlane.f32.xlu1 %v6978_v61 }
 0xf39   : > { %v6815_v12 = vpop.xlane.xlu0 %6814  ;;  %v6981_v31 = vsel %vm1220_vm2, %v13247_v33, 0.0 }
 0xf3a   : > { %v13252_v13 = vpop.eup %10432  ;;  %10442 = vpow2.f32 %v6925_v38  ;;  %v6927_v18 = vmul.f32 1.442695, %v6884_v55  ;;  %v6885_v1 = vsub.f32 %v13142_v16, %v6815_v12  ;;  %6982 = vadd.xlane.f32.xlu0 %v6981_v31 }
 0xf3b   : > { %v6818_v42 = vpop.xlane.xlu1 %6817  ;;  %v6984_v60 = vsel %vm1220_vm2, %v13252_v13, 0.0 }
 0xf3c   : > { %v13257_v3 = vpop.eup %10434  ;;  %10444 = vpow2.f32 %v6927_v18  ;;  %v6929_v57 = vmul.f32 1.442695, %v6885_v1  ;;  %v6886_v10 = vsub.f32 %v13148_v39, %v6818_v42  ;;  %6985 = vadd.xlane.f32.xlu1 %v6984_v60 }
 0xf3d   : > { %v6821_v30 = vpop.xlane.xlu0 %6820  ;;  %v6987_v0 = vsel %vm1220_vm2, %v13257_v3, 0.0 }
 0xf3e   : > { %v13262_v8 = vpop.eup %10436  ;;  %10446 = vpow2.f32 %v6929_v57  ;;  %v6931_v16 = vmul.f32 1.442695, %v6886_v10  ;;  %v6887_v17 = vsub.f32 %v13138_v9, %v6821_v30  ;;  %6988 = vadd.xlane.f32.xlu0 %v6987_v0 }
 0xf3f   : > { %v6824_v44 = vpop.xlane.xlu1 %6823  ;;  %v6990_v46 = vsel %vm1220_vm2, %v13262_v8, 0.0 }
 0xf40   : > { %v13267_v6 = vpop.eup %10438  ;;  %10448 = vpow2.f32 %v6931_v16  ;;  %v6933_v39 = vmul.f32 1.442695, %v6887_v17  ;;  %v6888_v62 = vsub.f32 %v13144_v53, %v6824_v44  ;;  %6991 = vadd.xlane.f32.xlu1 %v6990_v46 }
 0xf41   : > { %v6827_v37 = vpop.xlane.xlu0 %6826  ;;  %v6993_v25 = vsel %vm1220_vm2, %v13267_v6, 0.0 }
 0xf42   : > { %v13272_v34 = vpop.eup %10440  ;;  %10450 = vpow2.f32 %v6933_v39  ;;  %v6935_v9 = vmul.f32 1.442695, %v6888_v62  ;;  %v6889_v2 = vsub.f32 %v13158_v52, %v6827_v37  ;;  %6994 = vadd.xlane.f32.xlu0 %v6993_v25 }
 0xf43   : > { %v6830_v7 = vpop.xlane.xlu1 %6829  ;;  %v6996_v22 = vsel %vm1220_vm2, %v13272_v34, 0.0 }
 0xf44   : > { %v13277_v59 = vpop.eup %10442  ;;  %10452 = vpow2.f32 %v6935_v9  ;;  %v6937_v53 = vmul.f32 1.442695, %v6889_v2  ;;  %v6890_v35 = vsub.f32 %v13164_v27, %v6830_v7  ;;  %6997 = vadd.xlane.f32.xlu1 %v6996_v22 }
 0xf45   : > { %v6833_v49 = vpop.xlane.xlu0 %6832  ;;  %v6999_v26 = vsel %vm1220_vm2, %v13277_v59, 0.0 }
 0xf46   : > { %v13282_v61 = vpop.eup %10444  ;;  %10454 = vpow2.f32 %v6937_v53  ;;  %v6939_v52 = vmul.f32 1.442695, %v6890_v35  ;;  %v6891_v38 = vsub.f32 %v13154_v54, %v6833_v49  ;;  %7000 = vadd.xlane.f32.xlu0 %v6999_v26 }
 0xf47   : > { %v6836_v55 = vpop.xlane.xlu1 %6835  ;;  %v7002_v12 = vsel %vm1220_vm2, %v13282_v61, 0.0 }
 0xf48   : > { %v13287_v31 = vpop.eup %10446  ;;  %10456 = vpow2.f32 %v6939_v52  ;;  %v6941_v27 = vmul.f32 1.442695, %v6891_v38  ;;  %v6892_v18 = vsub.f32 %v13160_v36, %v6836_v55  ;;  %7003 = vadd.xlane.f32.xlu1 %v7002_v12 }
 0xf49   : > { %v6839_v1 = vpop.xlane.xlu0 %6838  ;;  %v7005_v42 = vsel %vm1220_vm2, %v13287_v31, 0.0 }
 0xf4a   : > { %v13292_v60 = vpop.eup %10448  ;;  %10458 = vpow2.f32 %v6941_v27  ;;  %v6943_v54 = vmul.f32 1.442695, %v6892_v18  ;;  %v6893_v57 = vsub.f32 %v13174_v48, %v6839_v1  ;;  %7006 = vadd.xlane.f32.xlu0 %v7005_v42 }
 0xf4b   : > { %v6842_v10 = vpop.xlane.xlu1 %6841  ;;  %v7008_v30 = vsel %vm1220_vm2, %v13292_v60, 0.0 }
 0xf4c   : > { %v13297_v0 = vpop.eup %10450  ;;  %10460 = vpow2.f32 %v6943_v54  ;;  %v6945_v36 = vmul.f32 1.442695, %v6893_v57  ;;  %v6894_v16 = vsub.f32 %v13180_v43, %v6842_v10  ;;  %7009 = vadd.xlane.f32.xlu1 %v7008_v30 }
 0xf4d   : > { %v6845_v17 = vpop.xlane.xlu0 %6844  ;;  %v7011_v44 = vsel %vm1220_vm2, %v13297_v0, 0.0 }
 0xf4e   : > { %v13302_v46 = vpop.eup %10452  ;;  %10462 = vpow2.f32 %v6945_v36  ;;  %v6947_v48 = vmul.f32 1.442695, %v6894_v16  ;;  %v6895_v39 = vsub.f32 %v13170_v29, %v6845_v17  ;;  %7012 = vadd.xlane.f32.xlu0 %v7011_v44 }
 0xf4f   : > { %v6848_v62 = vpop.xlane.xlu1 %6847  ;;  %v7014_v37 = vsel %vm1220_vm2, %v13302_v46, 0.0 }
 0xf50   : > { %v13307_v25 = vpop.eup %10454  ;;  %10464 = vpow2.f32 %v6947_v48  ;;  %v6949_v43 = vmul.f32 1.442695, %v6895_v39  ;;  %v6896_v9 = vsub.f32 %v13176_v14, %v6848_v62  ;;  %7015 = vadd.xlane.f32.xlu1 %v7014_v37 }
 0xf51   : > { %v6851_v2 = vpop.xlane.xlu0 %6850  ;;  %v7017_v7 = vsel %vm1220_vm2, %v13307_v25, 0.0 }
 0xf52   : > { %v13312_v22 = vpop.eup %10456  ;;  %10466 = vpow2.f32 %v6949_v43  ;;  %v6951_v29 = vmul.f32 1.442695, %v6896_v9  ;;  %v6897_v53 = vsub.f32 %v13190_v5, %v6851_v2  ;;  %7018 = vadd.xlane.f32.xlu0 %v7017_v7 }
 0xf53   : > { %v6854_v35 = vpop.xlane.xlu1 %6853  ;;  %v7020_v49 = vsel %vm1220_vm2, %v13312_v22, 0.0 }
 0xf54   : > { %v13317_v26 = vpop.eup %10458  ;;  %10468 = vpow2.f32 %v6951_v29  ;;  %v6953_v14 = vmul.f32 1.442695, %v6897_v53  ;;  %v6898_v52 = vsub.f32 %v13196_v40, %v6854_v35  ;;  %7021 = vadd.xlane.f32.xlu1 %v7020_v49 }
 0xf55   : > { %v6857_v38 = vpop.xlane.xlu0 %6856  ;;  %v7023_v55 = vsel %vm1220_vm2, %v13317_v26, 0.0 }
 0xf56   : > { %v13322_v12 = vpop.eup %10460  ;;  %10470 = vpow2.f32 %v6953_v14  ;;  %v6955_v5 = vmul.f32 1.442695, %v6898_v52  ;;  %v6899_v27 = vsub.f32 %v13186_v11, %v6857_v38  ;;  %7024 = vadd.xlane.f32.xlu0 %v7023_v55 }
 0xf57   : > { %v6860_v18 = vpop.xlane.xlu1 %6859  ;;  %v7026_v1 = vsel %vm1220_vm2, %v13322_v12, 0.0 }
 0xf58   : > { %v13327_v42 = vpop.eup %10462  ;;  %10472 = vpow2.f32 %v6955_v5  ;;  %v6957_v40 = vmul.f32 1.442695, %v6899_v27  ;;  %v6900_v54 = vsub.f32 %v13192_v51, %v6860_v18  ;;  %7027 = vadd.xlane.f32.xlu1 %v7026_v1 }
 0xf59   : > { %v6863_v57 = vpop.xlane.xlu0 %6862  ;;  %v7029_v10 = vsel %vm1220_vm2, %v13327_v42, 0.0 }
 0xf5a   : > { %v13332_v30 = vpop.eup %10464  ;;  %10474 = vpow2.f32 %v6957_v40  ;;  %v6959_v11 = vmul.f32 1.442695, %v6900_v54  ;;  %v6901_v36 = vsub.f32 %v13206_v28, %v6863_v57  ;;  %7030 = vadd.xlane.f32.xlu0 %v7029_v10 }
 0xf5b   : > { %v6866_v16 = vpop.xlane.xlu1 %6865  ;;  %v7032_v17 = vsel %vm1220_vm2, %v13332_v30, 0.0 }
 0xf5c   : > { %v13337_v44 = vpop.eup %10466  ;;  %10476 = vpow2.f32 %v6959_v11  ;;  %v6961_v51 = vmul.f32 1.442695, %v6901_v36  ;;  %v6902_v48 = vsub.f32 %v13212_v15, %v6866_v16  ;;  %7033 = vadd.xlane.f32.xlu1 %v7032_v17 }
 0xf5d   : > { %v6869_v39 = vpop.xlane.xlu0 %6868  ;;  %v7035_v62 = vsel %vm1220_vm2, %v13337_v44, 0.0 }
 0xf5e   : > { %v13342_v37 = vpop.eup %10468  ;;  %10478 = vpow2.f32 %v6961_v51  ;;  %v6963_v28 = vmul.f32 1.442695, %v6902_v48  ;;  %v6903_v43 = vsub.f32 %v13202_v45, %v6869_v39  ;;  %7036 = vadd.xlane.f32.xlu0 %v7035_v62 }
 0xf5f   : > { %v6872_v9 = vpop.xlane.xlu1 %6871  ;;  %v7038_v2 = vsel %vm1220_vm2, %v13342_v37, 0.0 }
 0xf60   : > { %v13347_v7 = vpop.eup %10470  ;;  %10480 = vpow2.f32 %v6963_v28  ;;  %v6965_v15 = vmul.f32 1.442695, %v6903_v43  ;;  %v6904_v29 = vsub.f32 %v13208_v23, %v6872_v9  ;;  %7039 = vadd.xlane.f32.xlu1 %v7038_v2 }
 0xf61   : > { %v7041_v53 = vsel %vm1220_vm2, %v13347_v7, 0.0 }
 0xf62   : > { %v13352_v35 = vpop.eup %10472  ;;  %10482 = vpow2.f32 %v6965_v15  ;;  %v6967_v49 = vmul.f32 1.442695, %v6904_v29  ;;  %7042 = vadd.xlane.f32.xlu0 %v7041_v53 }
 0xf63   : > { %v7044_v45 = vsel %vm1220_vm2, %v13352_v35, 0.0 }
 0xf64   : > { %v13356_v14 = vpop.eup %10474  ;;  %10484 = vpow2.f32 %v6967_v49  ;;  %7045 = vadd.xlane.f32.xlu1 %v7044_v45 }
 0xf65   : > { %v7047_v52 = vsel %vm1220_vm2, %v13356_v14, 0.0 }
 0xf66   : > { %v13360_v23 = vpop.eup %10476  ;;  %7048 = vadd.xlane.f32.xlu0 %v7047_v52 }
 0xf67   : > { %v7050_v38 = vsel %vm1220_vm2, %v13360_v23, 0.0 }
 0xf68   : > { %v13364_v55 = vpop.eup %10478  ;;  %7051 = vadd.xlane.f32.xlu1 %v7050_v38 }
 0xf69   : > { %v7053_v5 = vsel %vm1220_vm2, %v13364_v55, 0.0 }
 0xf6a   : > { %v13368_v27 = vpop.eup %10480  ;;  %7054 = vadd.xlane.f32.xlu0 %v7053_v5 }
 0xf6b   : > { %v7056_v18 = vsel %vm1220_vm2, %v13368_v27, 0.0 }
 0xf6c   : > { %v13372_v1 = vpop.eup %10482  ;;  %7057 = vadd.xlane.f32.xlu1 %v7056_v18 }
 0xf6d   : > { %v7059_v40 = vsel %vm1220_vm2, %v13372_v1, 0.0 }
 0xf6e   : > { %v13376_v54 = vpop.eup %10484  ;;  %7060 = vadd.xlane.f32.xlu0 %v7059_v40 }
 0xf6f   : > { %v7062_v57 = vsel %vm1220_vm2, %v13376_v54, 0.0 }
 0xf70   : > { %7063 = vadd.xlane.f32.xlu1 %v7062_v57 }
 0xfbf   : > { %v6971_v10 = vpop.xlane.xlu0 %6970 }
 0xfc0   : > { %10486 = vrcp.f32 %v6971_v10 }
 0xfc1   : > { %v6974_v11 = vpop.xlane.xlu1 %6973 }
 0xfc2   : > { %10488 = vrcp.f32 %v6974_v11 }
 0xfc3   : > { %v6977_v36 = vpop.xlane.xlu0 %6976 }
 0xfc4   : > { %10490 = vrcp.f32 %v6977_v36 }
 0xfc5   : > { %v6980_v16 = vpop.xlane.xlu1 %6979 }
 0xfc6   : > { %10492 = vrcp.f32 %v6980_v16 }
 0xfc7   : > { %v6983_v17 = vpop.xlane.xlu0 %6982 }
 0xfc8   : > { %10494 = vrcp.f32 %v6983_v17 }
 0xfc9   : > { %v6986_v51 = vpop.xlane.xlu1 %6985 }
 0xfca   : > { %v10487_v48 = vpop.eup %10486  ;;  %10496 = vrcp.f32 %v6986_v51 }
 0xfcb   : > { %v6989_v39 = vpop.xlane.xlu0 %6988  ;;  %v7097_v43 = vmul.f32 %v10487_v48, %v13227_v41 }
 0xfcc   : > { %v10489_v62 = vpop.eup %10488  ;;  %10498 = vrcp.f32 %v6989_v39 }
 0xfcd   : > { %v6992_v28 = vpop.xlane.xlu1 %6991  ;;  %v7098_v9 = vmul.f32 %v10489_v62, %v13232_v47 }
 0xfce   : > { %v10491_v2 = vpop.eup %10490  ;;  %10500 = vrcp.f32 %v6992_v28 }
 0xfcf   : > { %v6995_v15 = vpop.xlane.xlu0 %6994  ;;  %v7129_v29 = vpack.c.bf16 %v7098_v9, %v7097_v43  ;;  %v7099_v49 = vmul.f32 %v10491_v2, %v13237_v4 }
 0xfd0   : > { %v10493_v53 = vpop.eup %10492  ;;  %10502 = vrcp.f32 %v6995_v15 }
 0xfd1   : > { %v7100_v45 = vmul.f32 %v10493_v53, %v13242_v32  ;;  %9730 = vmatprep.mubr.msk.bf16.mxu0 %vm1220_vm2, %v7129_v29  ;;  %v6998_v52 = vpop.xlane.xlu1 %6997 }
 0xfd2   : > { %v10495_v38 = vpop.eup %10494  ;;  %10504 = vrcp.f32 %v6998_v52 }
 0xfd3   : > { %v7130_v5 = vpack.c.bf16 %v7100_v45, %v7099_v49  ;;  %v7001_v18 = vpop.xlane.xlu0 %7000  ;;  %v7101_v40 = vmul.f32 %v10495_v38, %v13247_v33 }
 0xfd4   : > { %v10497_v41 = vpop.eup %10496  ;;  %10506 = vrcp.f32 %v7001_v18 }
 0xfd5   : > { %9731 = vmatmul.mubr.msk.bf16.vlgmr.msra.gmra.mrb[24].mxu0 %vm1220_vm2, %v7130_v5  ;;  %v7004_v47 = vpop.xlane.xlu1 %7003  ;;  %v7102_v57 = vmul.f32 %v10497_v41, %v13252_v13 }
 0xfd6   : > { %v10499_v10 = vpop.eup %10498  ;;  %9755 = vmatpush3.bf16.msra.mxu0 %v13076_v56  ;;  %10508 = vrcp.f32 %v7004_v47 }
 0xfd7   : > { %9756 = vmatprep.subr.bf16.mxu0 %v13074_v20  ;;  %v7007_v4 = vpop.xlane.xlu0 %7006  ;;  %v7131_v32 = vpack.c.bf16 %v7102_v57, %v7101_v40  ;;  %v7103_v36 = vmul.f32 %v10499_v10, %v13257_v3 }
 0xfd8   : > { %v10501_v11 = vpop.eup %10500  ;;  %10510 = vrcp.f32 %v7007_v4 }
 0xfd9   : > { %v7104_v16 = vmul.f32 %v10501_v11, %v13262_v8  ;;  %9734 = vmatprep.mubr.msk.bf16.mxu0 %vm1220_vm2, %v7131_v32  ;;  %v7010_v17 = vpop.xlane.xlu1 %7009 }
 0xfda   : > { %v10503_v33 = vpop.eup %10502  ;;  %9757 = vmatpush3.bf16.msra.mxu0 %v13074_v20  ;;  %10512 = vrcp.f32 %v7010_v17 }
 0xfdb   : > { %v7132_v13 = vpack.c.bf16 %v7104_v16, %v7103_v36  ;;  %9758 = vmatprep.subr.bf16.mxu0 %v13081_v24  ;;  %v7013_v56 = vpop.xlane.xlu0 %7012  ;;  %v7105_v3 = vmul.f32 %v10503_v33, %v13267_v6 }
 0xfdc   : > { %v10505_v51 = vpop.eup %10504  ;;  %10514 = vrcp.f32 %v7013_v56 }
 0xfdd   : > { %9735 = vmatmul.mubr.msk.bf16.gmra.mrb[28].mxu0 %vm1220_vm2, %v7132_v13  ;;  %v7016_v48 = vpop.xlane.xlu1 %7015  ;;  %v7106_v8 = vmul.f32 %v10505_v51, %v13272_v34 }
 0xfde   : > { %v10507_v39 = vpop.eup %10506  ;;  %9759 = vmatpush3.bf16.msra.mxu0 %v13081_v24  ;;  %10516 = vrcp.f32 %v7016_v48 }
 0xfdf   : > { %9760 = vmatprep.subr.bf16.mxu0 %v13079_v50  ;;  %v7019_v20 = vpop.xlane.xlu0 %7018  ;;  %v7133_v62 = vpack.c.bf16 %v7106_v8, %v7105_v3  ;;  %v7107_v43 = vmul.f32 %v10507_v39, %v13277_v59 }
 0xfe0   : > { %v10509_v28 = vpop.eup %10508  ;;  %10518 = vrcp.f32 %v7019_v20 }
 0xfe1   : > { %v7108_v9 = vmul.f32 %v10509_v28, %v13282_v61  ;;  %9746 = vmatprep.mubr.msk.bf16.mxu1 %vm1220_vm2, %v7133_v62  ;;  %v7022_v2 = vpop.xlane.xlu1 %7021 }
 0xfe2   : > { %v10511_v6 = vpop.eup %10510  ;;  %9761 = vmatpush3.bf16.msra.mxu0 %v13079_v50  ;;  %10520 = vrcp.f32 %v7022_v2 }
 0xfe3   : > { %v7134_v34 = vpack.c.bf16 %v7108_v9, %v7107_v43  ;;  %v7025_v24 = vpop.xlane.xlu0 %7024  ;;  %v7109_v53 = vmul.f32 %v10511_v6, %v13287_v31 }
 0xfe4   : > { %v10513_v15 = vpop.eup %10512  ;;  %10522 = vrcp.f32 %v7025_v24 }
 0xfe5   : > { %9747 = vmatmul.mubr.msk.bf16.vlgmr.msra.gmra.mrb[104].mxu1 %vm1220_vm2, %v7134_v34  ;;  %v7028_v29 = vpop.xlane.xlu1 %7027  ;;  %v7110_v59 = vmul.f32 %v10513_v15, %v13292_v60 }
 0xfe6   : > { %v10515_v49 = vpop.eup %10514  ;;  %9771 = vmatpush3.bf16.msra.mxu1 %v13085_v58  ;;  %10524 = vrcp.f32 %v7028_v29 }
 0xfe7   : > { %9772 = vmatprep.subr.bf16.mxu1 %v13083_v19  ;;  %v7031_v61 = vpop.xlane.xlu0 %7030  ;;  %v7135_v50 = vpack.c.bf16 %v7110_v59, %v7109_v53  ;;  %v7111_v52 = vmul.f32 %v10515_v49, %v13297_v0  ;;  %v8217_v53 = vld [vmem:[%s13576_s2 + $0xc] sm:$0xf] }
 0xfe8   : > { %v10517_v45 = vpop.eup %10516  ;;  %10526 = vrcp.f32 %v7031_v61  ;;  %10017 = vmatprep.subr.msk.bf16.mxu0 %vm1962_vm3, %v8217_v53 }
 0xfe9   : > { %v7112_v38 = vmul.f32 %v10517_v45, %v13302_v46  ;;  %9750 = vmatprep.mubr.msk.bf16.mxu1 %vm1220_vm2, %v7135_v50  ;;  %v7034_v5 = vpop.xlane.xlu1 %7033 }
 0xfea   : > { %v10519_v31 = vpop.eup %10518  ;;  %9773 = vmatpush3.bf16.msra.mxu1 %v13083_v19  ;;  %10528 = vrcp.f32 %v7034_v5 }
 0xfeb   : > { %v7136_v60 = vpack.c.bf16 %v7112_v38, %v7111_v52  ;;  %9774 = vmatprep.subr.bf16.mxu1 %v13090_v21  ;;  %v7037_v58 = vpop.xlane.xlu0 %7036  ;;  %v7113_v0 = vmul.f32 %v10519_v31, %v13307_v25 }
 0xfec   : > { %v10521_v18 = vpop.eup %10520  ;;  %10530 = vrcp.f32 %v7037_v58 }
 0xfed   : > { %9751 = vmatmul.mubr.msk.bf16.gmra.mrb[108].mxu1 %vm1220_vm2, %v7136_v60  ;;  %v7040_v41 = vpop.xlane.xlu1 %7039  ;;  %v7114_v46 = vmul.f32 %v10521_v18, %v13312_v22 }
 0xfee   : > { %v10523_v47 = vpop.eup %10522  ;;  %9775 = vmatpush3.bf16.msra.mxu1 %v13090_v21  ;;  %10532 = vrcp.f32 %v7040_v41 }
 0xfef   : > { %9776 = vmatprep.subr.bf16.mxu1 %v13088_v63  ;;  %v7043_v19 = vpop.xlane.xlu0 %7042  ;;  %v7137_v40 = vpack.c.bf16 %v7114_v46, %v7113_v0  ;;  %v7115_v10 = vmul.f32 %v10523_v47, %v13317_v26 }
 0xff0   : > { %v10525_v57 = vpop.eup %10524  ;;  %10534 = vrcp.f32 %v7043_v19 }
 0xff1   : > { %v7116_v4 = vmul.f32 %v10525_v57, %v13322_v12  ;;  %9762 = vmatprep.mubr.msk.bf16.mxu0 %vm1220_vm2, %v7137_v40  ;;  %v7046_v32 = vpop.xlane.xlu1 %7045 }
 0xff2   : > { %v10527_v25 = vpop.eup %10526  ;;  %9777 = vmatpush3.bf16.msra.mxu1 %v13088_v63  ;;  %10536 = vrcp.f32 %v7046_v32 }
 0xff3   : > { %v7138_v22 = vpack.c.bf16 %v7116_v4, %v7115_v10  ;;  %v7049_v21 = vpop.xlane.xlu0 %7048  ;;  %v7117_v16 = vmul.f32 %v10527_v25, %v13327_v42 }
 0xff4   : > { %v10529_v11 = vpop.eup %10528  ;;  %10538 = vrcp.f32 %v7049_v21 }
 0xff5   : > { %9763 = vmatmul.mubr.msk.bf16.vlgmr.msra.gmra.mrb[32].mxu0 %vm1220_vm2, %v7138_v22  ;;  %v7052_v36 = vpop.xlane.xlu1 %7051  ;;  %v7118_v26 = vmul.f32 %v10529_v11, %v13332_v30 }
 0xff6   : > { %v10531_v17 = vpop.eup %10530  ;;  %10540 = vrcp.f32 %v7052_v36 }
 0xff7   : > { %v7055_v12 = vpop.xlane.xlu0 %7054  ;;  %v7139_v33 = vpack.c.bf16 %v7118_v26, %v7117_v16  ;;  %v7119_v63 = vmul.f32 %v10531_v17, %v13337_v44 }
 0xff8   : > { %v10533_v13 = vpop.eup %10532  ;;  %10542 = vrcp.f32 %v7055_v12 }
 0xff9   : > { %v7120_v56 = vmul.f32 %v10533_v13, %v13342_v37  ;;  %9766 = vmatprep.mubr.msk.bf16.mxu0 %vm1220_vm2, %v7139_v33  ;;  %v7058_v51 = vpop.xlane.xlu1 %7057 }
 0xffa   : > { %v10535_v48 = vpop.eup %10534  ;;  %10544 = vrcp.f32 %v7058_v51 }
 0xffb   : > { %v7140_v3 = vpack.c.bf16 %v7120_v56, %v7119_v63  ;;  %v7061_v8 = vpop.xlane.xlu0 %7060  ;;  %v7121_v39 = vmul.f32 %v10535_v48, %v13347_v7 }
 0xffc   : > { %v10537_v42 = vpop.eup %10536  ;;  %10546 = vrcp.f32 %v7061_v8 }
 0xffd   : > { %9767 = vmatmul.mubr.msk.bf16.gmra.mrb[36].mxu0 %vm1220_vm2, %v7140_v3  ;;  %v7064_v30 = vpop.xlane.xlu1 %7063  ;;  %v7122_v20 = vmul.f32 %v10537_v42, %v13352_v35 }
 0xffe   : > { %v10539_v62 = vpop.eup %10538  ;;  %10548 = vrcp.f32 %v7064_v30 }
 0xfff   : > { %v7141_v44 = vpack.c.bf16 %v7122_v20, %v7121_v39  ;;  %v7123_v28 = vmul.f32 %v10539_v62, %v13356_v14 }
0x1000   : > { %v10541_v37 = vpop.eup %10540 }
0x1001   : > { %v7124_v43 = vmul.f32 %v10541_v37, %v13360_v23  ;;  %9778 = vmatprep.mubr.msk.bf16.mxu1 %vm1220_vm2, %v7141_v44  ;;  %v13466_v37 = vld [vmem:[%s13577_s3] ss:$0 sm:$0xff] }
0x1002   : > { %v10543_v9 = vpop.eup %10542 }
0x1003   : > { %v7142_v2 = vpack.c.bf16 %v7124_v43, %v7123_v28  ;;  %v7125_v34 = vmul.f32 %v10543_v9, %v13364_v55  ;;  %v7520_v55 = vsel %vm1962_vm3, %v8217_v53, 0 }
0x1004   : > { %v10545_v6 = vpop.eup %10544  ;;  %9787 = vmatpush3.bf16.msra.mxu0 %v7520_v55 }
0x1005   : > { %9779 = vmatmul.mubr.msk.bf16.vlgmr.msra.gmra.mrb[112].mxu1 %vm1220_vm2, %v7142_v2  ;;  %v7126_v7 = vmul.f32 %v10545_v6, %v13368_v27 }
0x1006   : > { %v10547_v35 = vpop.eup %10546 }
0x1007   : > { %v7143_v24 = vpack.c.bf16 %v7126_v7, %v7125_v34  ;;  %v7127_v29 = vmul.f32 %v10547_v35, %v13372_v1 }
0x1008   : > { %v10549_v15 = vpop.eup %10548 }
0x1009   : > { %v7128_v14 = vmul.f32 %v10549_v15, %v13376_v54  ;;  %9782 = vmatprep.mubr.msk.bf16.mxu1 %vm1220_vm2, %v7143_v24 }
0x100b   : > { %v7144_v23 = vpack.c.bf16 %v7128_v14, %v7127_v29 }
0x100d   : > { %9783 = vmatmul.mubr.msk.bf16.gmra.mrb[116].mxu1 %vm1220_vm2, %v7144_v23 }
0x10a8   : > { %v9732_v27 = vpop.f32.mrb[24].mxu0 }
0x10a9   : > { %v7191_v59 = vpop.f32.mrb[25].mxu0 }
0x10aa   : > { %v9733_v49 = vpop.f32.mrb[26].mxu0 }
0x10ab   : > { %v7454_v1 = vpack.c.bf16 %v9733_v49, %v9732_v27  ;;  %v7194_v61 = vpop.f32.mrb[27].mxu0 }
0x10ac   : > { %v7453_v54 = vpack.c.bf16 %v7194_v61, %v7191_v59 }
0x10ae   : > { %9788 = vmatprep.mubr.msk.bf16.mxu0 %vm863_vm1, %v7453_v54 }
0x10af   : > { %9789 = vmatmul.mubr.msk.bf16.vlgmr.msra.gmra.mrb[72].mxu0 %vm863_vm1, %v7454_v1 }
0x10b0   : > { %v9736_v50 = vpop.f32.mrb[28].mxu0 }
0x10b1   : > { %v7207_v45 = vpop.f32.mrb[29].mxu0 }
0x10b2   : > { %v9737_v52 = vpop.f32.mrb[30].mxu0 }
0x10b3   : > { %v7456_v38 = vpack.c.bf16 %v9737_v52, %v9736_v50  ;;  %v7210_v5 = vpop.f32.mrb[31].mxu0 }
0x10b4   : > { %v7455_v31 = vpack.c.bf16 %v7210_v5, %v7207_v45 }
0x10b6   : > { %9792 = vmatprep.mubr.msk.bf16.mxu0 %vm863_vm1, %v7455_v31 }
0x10b7   : > { %9793 = vmatmul.mubr.msk.bf16.gmra.mrb[76].mxu0 %vm863_vm1, %v7456_v38 }
0x10b8   : > { %v9748_v60 = vpop.f32.mrb[104].mxu1 }
0x10b9   : > { %v7268_v58 = vpop.f32.mrb[105].mxu1 }
0x10ba   : > { %v9749_v18 = vpop.f32.mrb[106].mxu1 }
0x10bb   : > { %v7458_v41 = vpack.c.bf16 %v9749_v18, %v9748_v60  ;;  %v7271_v0 = vpop.f32.mrb[107].mxu1 }
0x10bc   : > { %v7457_v46 = vpack.c.bf16 %v7271_v0, %v7268_v58 }
0x10be   : > { %9796 = vmatprep.mubr.msk.bf16.mxu0 %vm863_vm1, %v7457_v46 }
0x10bf   : > { %9797 = vmatmul.mubr.msk.bf16.gmra.mrb[80].mxu0 %vm863_vm1, %v7458_v41 }
0x10c0   : > { %v9752_v47 = vpop.f32.mrb[108].mxu1 }
0x10c1   : > { %v7284_v19 = vpop.f32.mrb[109].mxu1 }
0x10c2   : > { %v9753_v40 = vpop.f32.mrb[110].mxu1 }
0x10c3   : > { %v7460_v57 = vpack.c.bf16 %v9753_v40, %v9752_v47  ;;  %v7287_v10 = vpop.f32.mrb[111].mxu1 }
0x10c4   : > { %v7459_v4 = vpack.c.bf16 %v7287_v10, %v7284_v19 }
0x10c6   : > { %9800 = vmatprep.mubr.msk.bf16.mxu0 %vm863_vm1, %v7459_v4 }
0x10c7   : > { %9801 = vmatmul.mubr.msk.bf16.gmra.mrb[84].mxu0 %vm863_vm1, %v7460_v57 }
0x10c8   : > { %v9764_v32 = vpop.f32.mrb[32].mxu0 }
0x10c9   : > { %v7345_v25 = vpop.f32.mrb[33].mxu0 }
0x10ca   : > { %v9765_v22 = vpop.f32.mrb[34].mxu0 }
0x10cb   : > { %v7462_v21 = vpack.c.bf16 %v9765_v22, %v9764_v32  ;;  %v7348_v11 = vpop.f32.mrb[35].mxu0 }
0x10cc   : > { %v7461_v36 = vpack.c.bf16 %v7348_v11, %v7345_v25 }
0x10ce   : > { %9804 = vmatprep.mubr.msk.bf16.mxu0 %vm863_vm1, %v7461_v36 }
0x10cf   : > { %9805 = vmatmul.mubr.msk.bf16.gmra.mrb[88].mxu0 %vm863_vm1, %v7462_v21 }
0x10d0   : > { %v9768_v16 = vpop.f32.mrb[36].mxu0 }
0x10d1   : > { %v7361_v26 = vpop.f32.mrb[37].mxu0 }
0x10d2   : > { %v9769_v17 = vpop.f32.mrb[38].mxu0 }
0x10d3   : > { %v7464_v12 = vpack.c.bf16 %v9769_v17, %v9768_v16  ;;  %v7364_v33 = vpop.f32.mrb[39].mxu0 }
0x10d4   : > { %v7463_v13 = vpack.c.bf16 %v7364_v33, %v7361_v26 }
0x10d6   : > { %9808 = vmatprep.mubr.msk.bf16.mxu0 %vm863_vm1, %v7463_v13 }
0x10d7   : > { %9809 = vmatmul.mubr.msk.bf16.gmra.mrb[92].mxu0 %vm863_vm1, %v7464_v12 }
0x10d8   : > { %v9780_v63 = vpop.f32.mrb[112].mxu1 }
0x10d9   : > { %v7422_v56 = vpop.f32.mrb[113].mxu1 }
0x10da   : > { %v9781_v51 = vpop.f32.mrb[114].mxu1 }
0x10db   : > { %v7466_v48 = vpack.c.bf16 %v9781_v51, %v9780_v63  ;;  %v7425_v3 = vpop.f32.mrb[115].mxu1 }
0x10dc   : > { %v7465_v8 = vpack.c.bf16 %v7425_v3, %v7422_v56 }
0x10de   : > { %9812 = vmatprep.mubr.msk.bf16.mxu0 %vm863_vm1, %v7465_v8 }
0x10df   : > { %9813 = vmatmul.mubr.msk.bf16.gmra.mrb[96].mxu0 %vm863_vm1, %v7466_v48 }
0x10e0   : > { %v9784_v42 = vpop.f32.mrb[116].mxu1 }
0x10e1   : > { %v7438_v30 = vpop.f32.mrb[117].mxu1 }
0x10e2   : > { %v9785_v39 = vpop.f32.mrb[118].mxu1 }
0x10e3   : > { %v7468_v20 = vpack.c.bf16 %v9785_v39, %v9784_v42  ;;  %v7441_v62 = vpop.f32.mrb[119].mxu1 }
0x10e4   : > { %v7467_v44 = vpack.c.bf16 %v7441_v62, %v7438_v30 }
0x10e6   : > { %9816 = vmatprep.mubr.msk.bf16.mxu0 %vm863_vm1, %v7467_v44 }
0x10e7   : > { %9817 = vmatmul.mubr.msk.bf16.gmra.mrb[100].mxu0 %vm863_vm1, %v7468_v20 }
0x1182   : > { %v9790_v28 = vpop.f32.mrb[72].mxu0 }
0x1183   : > { %v9822_v43 = vadd.f32 %v9790_v28, %v13466_v37  ;;  %v7556_v9 = vpop.f32.mrb[73].mxu0 }
0x1184   : > { %v9823_v2 = vadd.f32 %v13466_v37, %v7556_v9  ;;  %v9791_v6 = vpop.f32.mrb[74].mxu0 }
0x1185   : > { %7717 = vst.msk [vmem:[%s13473_s9 + $0x10] sm:$0xff] %vm265_vm0, %v9822_v43  ;;  %v9824_v34 = vadd.f32 %v9791_v6, %v13466_v37  ;;  %v7559_v7 = vpop.f32.mrb[75].mxu0 }
0x1186   : > { %7715 = vst.msk [vmem:[%s13473_s9] sm:$0xff] %vm265_vm0, %v9823_v2  ;;  %v9825_v35 = vadd.f32 %v13466_v37, %v7559_v7 }
0x1187   : > { %7718 = vst.msk [vmem:[%s13473_s9 + $0x18] sm:$0xff] %vm265_vm0, %v9824_v34 }
0x1188   : > { %7716 = vst.msk [vmem:[%s13473_s9 + $0x8] sm:$0xff] %vm265_vm0, %v9825_v35 }
0x118a   : > { %v9794_v24 = vpop.f32.mrb[76].mxu0 }
0x118b   : > { %v9826_v15 = vadd.f32 %v9794_v24, %v13466_v37  ;;  %v7572_v29 = vpop.f32.mrb[77].mxu0 }
0x118c   : > { %v9827_v14 = vadd.f32 %v13466_v37, %v7572_v29  ;;  %v9795_v23 = vpop.f32.mrb[78].mxu0 }
0x118d   : > { %7721 = vst.msk [vmem:[%s13473_s9 + $0x30] sm:$0xff] %vm265_vm0, %v9826_v15  ;;  %v9828_v53 = vadd.f32 %v9795_v23, %v13466_v37  ;;  %v7575_v55 = vpop.f32.mrb[79].mxu0 }
0x118e   : > { %7719 = vst.msk [vmem:[%s13473_s9 + $0x20] sm:$0xff] %vm265_vm0, %v9827_v14  ;;  %v9829_v27 = vadd.f32 %v13466_v37, %v7575_v55 }
0x118f   : > { %7722 = vst.msk [vmem:[%s13473_s9 + $0x38] sm:$0xff] %vm265_vm0, %v9828_v53 }
0x1190   : > { %7720 = vst.msk [vmem:[%s13473_s9 + $0x28] sm:$0xff] %vm265_vm0, %v9829_v27 }
0x1192   : > { %v9798_v59 = vpop.f32.mrb[80].mxu0 }
0x1193   : > { %v9830_v49 = vadd.f32 %v9798_v59, %v13466_v37  ;;  %v7588_v1 = vpop.f32.mrb[81].mxu0 }
0x1194   : > { %v9831_v61 = vadd.f32 %v13466_v37, %v7588_v1  ;;  %v9799_v54 = vpop.f32.mrb[82].mxu0 }
0x1195   : > { %7725 = vst.msk [vmem:[%s13473_s9 + $0x50] sm:$0xff] %vm265_vm0, %v9830_v49  ;;  %v9832_v50 = vadd.f32 %v9799_v54, %v13466_v37  ;;  %v7591_v45 = vpop.f32.mrb[83].mxu0 }
0x1196   : > { %7723 = vst.msk [vmem:[%s13473_s9 + $0x40] sm:$0xff] %vm265_vm0, %v9831_v61  ;;  %v9833_v52 = vadd.f32 %v13466_v37, %v7591_v45 }
0x1197   : > { %7726 = vst.msk [vmem:[%s13473_s9 + $0x58] sm:$0xff] %vm265_vm0, %v9832_v50 }
0x1198   : > { %7724 = vst.msk [vmem:[%s13473_s9 + $0x48] sm:$0xff] %vm265_vm0, %v9833_v52 }
0x119a   : > { %v9802_v38 = vpop.f32.mrb[84].mxu0 }
0x119b   : > { %v9834_v5 = vadd.f32 %v9802_v38, %v13466_v37  ;;  %v7604_v31 = vpop.f32.mrb[85].mxu0 }
0x119c   : > { %v9835_v60 = vadd.f32 %v13466_v37, %v7604_v31  ;;  %v9803_v58 = vpop.f32.mrb[86].mxu0 }
0x119d   : > { %7729 = vst.msk [vmem:[%s13473_s9 + $0x70] sm:$0xff] %vm265_vm0, %v9834_v5  ;;  %v9836_v18 = vadd.f32 %v9803_v58, %v13466_v37  ;;  %v7607_v41 = vpop.f32.mrb[87].mxu0 }
0x119e   : > { %7727 = vst.msk [vmem:[%s13473_s9 + $0x60] sm:$0xff] %vm265_vm0, %v9835_v60  ;;  %v9837_v0 = vadd.f32 %v13466_v37, %v7607_v41 }
0x119f   : > { %7730 = vst.msk [vmem:[%s13473_s9 + $0x78] sm:$0xff] %vm265_vm0, %v9836_v18 }
0x11a0   : > { %7728 = vst.msk [vmem:[%s13473_s9 + $0x68] sm:$0xff] %vm265_vm0, %v9837_v0 }
0x11a2   : > { %v9806_v46 = vpop.f32.mrb[88].mxu0 }
0x11a3   : > { %v9838_v47 = vadd.f32 %v9806_v46, %v13466_v37  ;;  %v7620_v19 = vpop.f32.mrb[89].mxu0 }
0x11a4   : > { %v9839_v40 = vadd.f32 %v13466_v37, %v7620_v19  ;;  %v9807_v57 = vpop.f32.mrb[90].mxu0 }
0x11a5   : > { %7733 = vst.msk [vmem:[%s13473_s9 + $0x90] sm:$0xff] %vm265_vm0, %v9838_v47  ;;  %v9840_v10 = vadd.f32 %v9807_v57, %v13466_v37  ;;  %v7623_v4 = vpop.f32.mrb[91].mxu0 }
0x11a6   : > { %7731 = vst.msk [vmem:[%s13473_s9 + $0x80] sm:$0xff] %vm265_vm0, %v9839_v40  ;;  %v9841_v32 = vadd.f32 %v13466_v37, %v7623_v4 }
0x11a7   : > { %7734 = vst.msk [vmem:[%s13473_s9 + $0x98] sm:$0xff] %vm265_vm0, %v9840_v10 }
0x11a8   : > { %7732 = vst.msk [vmem:[%s13473_s9 + $0x88] sm:$0xff] %vm265_vm0, %v9841_v32 }
0x11aa   : > { %v9810_v25 = vpop.f32.mrb[92].mxu0 }
0x11ab   : > { %v9842_v22 = vadd.f32 %v9810_v25, %v13466_v37  ;;  %v7636_v21 = vpop.f32.mrb[93].mxu0 }
0x11ac   : > { %v9843_v11 = vadd.f32 %v13466_v37, %v7636_v21  ;;  %v9811_v36 = vpop.f32.mrb[94].mxu0 }
0x11ad   : > { %7737 = vst.msk [vmem:[%s13473_s9 + $0xb0] sm:$0xff] %vm265_vm0, %v9842_v22  ;;  %v9844_v16 = vadd.f32 %v9811_v36, %v13466_v37  ;;  %v7639_v26 = vpop.f32.mrb[95].mxu0 }
0x11ae   : > { %7735 = vst.msk [vmem:[%s13473_s9 + $0xa0] sm:$0xff] %vm265_vm0, %v9843_v11  ;;  %v9845_v17 = vadd.f32 %v13466_v37, %v7639_v26 }
0x11af   : > { %7738 = vst.msk [vmem:[%s13473_s9 + $0xb8] sm:$0xff] %vm265_vm0, %v9844_v16 }
0x11b0   : > { %7736 = vst.msk [vmem:[%s13473_s9 + $0xa8] sm:$0xff] %vm265_vm0, %v9845_v17 }
0x11b2   : > { %v9814_v12 = vpop.f32.mrb[96].mxu0 }
0x11b3   : > { %v9846_v33 = vadd.f32 %v9814_v12, %v13466_v37  ;;  %v7652_v13 = vpop.f32.mrb[97].mxu0 }
0x11b4   : > { %v9847_v63 = vadd.f32 %v13466_v37, %v7652_v13  ;;  %v9815_v56 = vpop.f32.mrb[98].mxu0 }
0x11b5   : > { %7741 = vst.msk [vmem:[%s13473_s9 + $0xd0] sm:$0xff] %vm265_vm0, %v9846_v33  ;;  %v9848_v51 = vadd.f32 %v9815_v56, %v13466_v37  ;;  %v7655_v48 = vpop.f32.mrb[99].mxu0 }
0x11b6   : > { %7739 = vst.msk [vmem:[%s13473_s9 + $0xc0] sm:$0xff] %vm265_vm0, %v9847_v63  ;;  %v9849_v3 = vadd.f32 %v13466_v37, %v7655_v48 }
0x11b7   : > { %7742 = vst.msk [vmem:[%s13473_s9 + $0xd8] sm:$0xff] %vm265_vm0, %v9848_v51 }
0x11b8   : > { %7740 = vst.msk [vmem:[%s13473_s9 + $0xc8] sm:$0xff] %vm265_vm0, %v9849_v3 }
0x11ba   : > { %v9818_v8 = vpop.f32.mrb[100].mxu0 }
0x11bb   : > { %v9850_v42 = vadd.f32 %v9818_v8, %v13466_v37  ;;  %v7668_v30 = vpop.f32.mrb[101].mxu0 }
0x11bc   : > { %v9851_v39 = vadd.f32 %v13466_v37, %v7668_v30  ;;  %v9819_v20 = vpop.f32.mrb[102].mxu0 }
0x11bd   : > { %7745 = vst.msk [vmem:[%s13473_s9 + $0xf0] sm:$0xff] %vm265_vm0, %v9850_v42  ;;  %v9852_v62 = vadd.f32 %v9819_v20, %v13466_v37  ;;  %v7671_v44 = vpop.f32.mrb[103].mxu0 }
0x11be   : > { %7743 = vst.msk [vmem:[%s13473_s9 + $0xe0] sm:$0xff] %vm265_vm0, %v9851_v39  ;;  %v9853_v28 = vadd.f32 %v13466_v37, %v7671_v44 }
0x11bf   : > { %7746 = vst.msk [vmem:[%s13473_s9 + $0xf8] sm:$0xff] %vm265_vm0, %v9852_v62 }
0x11c0   : > { %7744 = vst.msk [vmem:[%s13473_s9 + $0xe8] sm:$0xff] %vm265_vm0, %v9853_v28 }
0x11c1 PF: > { %s14_s15 = sadd.s32 1, %s10556_s15  }
0x11c2   : > { %p11_p4 = scmp.ge.s32.totalorder %s14_s15, 4  }
0x11c4   :  { %13 = sbr.rel (!%p11_p4) target bundleno = 1 (0x1), region = 80 }

</bundles_post_ra>
